<compile_context>
chip_gen: v7x
topology: tpu7x:2x2x1
jax: 0.10.0
libtpu: 0.0.40
codegen_flags: <defaults>
</compile_context>

<pallas_src>
import math

import jax
import jax.numpy as jnp
from jax import lax
from jax.experimental import pallas as pl
from jax.experimental.pallas import tpu as pltpu

# ----------------------------- model dimensions -----------------------------
B, S, H = 4, 16, 128          # batch, seq, hidden (768 scaled down to 128)
NUM_HEADS = 2
HEAD_DIM = H // NUM_HEADS     # 64
FF = 4 * H                    # 512
NUM_LAYERS = 2
VOCAB = 64
NUM_CLASSES = 4               # classifier output_dim
OUT_LANES = 128               # classifier padded to a full 128-lane tile
LAMBDA = 0.9                  # self.Lambda
TAU = 0.3                     # self.tau (SupConLoss temperature)


# ------------------------------ small helpers -------------------------------
def _layernorm(x, g, b, eps=1e-12):
    mu = jnp.mean(x, axis=-1, keepdims=True)
    var = jnp.mean((x - mu) * (x - mu), axis=-1, keepdims=True)
    return (x - mu) * lax.rsqrt(var + eps) * g + b


def _gelu(x):
    # tanh approximation (PyTorch nn.GELU default is erf; tiny numeric delta).
    c = math.sqrt(2.0 / math.pi)
    return 0.5 * x * (1.0 + jnp.tanh(c * (x + 0.044715 * x * x * x)))


# --------------------------- fused forward kernel ---------------------------
def fused_forward_kernel(
        labels_ref,                         # SMEM (B,) int32 (scalar prefetch)
        ids_ref,                            # (B*S, 1) int32
        mask_ref,                           # (B, S) f32
        word_emb_ref,                       # (VOCAB, H) bf16
        pos_emb_ref,                        # (S, H) f32
        emb_g_ref, emb_b_ref,               # (1, H) f32
        wqkv_ref, bqkv_ref,                 # (H, 3H) bf16, (1, 3H) f32  [layer block]
        wo_ref, bo_ref,                     # (H, H) bf16, (1, H) f32
        ln1_g_ref, ln1_b_ref,               # (1, H) f32
        wff1_ref, bff1_ref,                 # (H, FF) bf16, (1, FF) f32
        wff2_ref, bff2_ref,                 # (FF, H) bf16, (1, H) f32
        ln2_g_ref, ln2_b_ref,               # (1, H) f32
        wc_ref, bc_ref,                     # (H, 128) bf16, (1, 128) f32
        out_ref,                            # (8, 128) f32 output slab
        x_sc):                              # VMEM scratch (B*S, H) f32 (carry)
    l = pl.program_id(0)
    scale = 1.0 / math.sqrt(HEAD_DIM)

    # ---- embeddings (one-hot gather + LayerNorm), first grid step only ----
    @pl.when(l == 0)
    def _():
        vocab_iota = lax.broadcasted_iota(jnp.int32, (B * S, VOCAB), 1)
        onehot = (ids_ref[...] == vocab_iota).astype(jnp.bfloat16)      # (B*S, VOCAB)
        emb = jnp.dot(onehot, word_emb_ref[...],
                      preferred_element_type=jnp.float32)               # (B*S, H)
        pos = jnp.concatenate([pos_emb_ref[...]] * B, axis=0)           # (B*S, H)
        x_sc[...] = _layernorm(emb + pos, emb_g_ref[...], emb_b_ref[...])

    # ---- one transformer layer per grid step ----
    x2 = x_sc[...]                                                       # (B*S, H) f32
    xb = x2.astype(jnp.bfloat16)
    qkv = jnp.dot(xb, wqkv_ref[...],
                  preferred_element_type=jnp.float32) + bqkv_ref[...]    # (B*S, 3H)
    q = qkv[:, 0:H]
    k = qkv[:, H:2 * H]
    v = qkv[:, 2 * H:3 * H]

    # per-head split via lane masks (VPU selects, no lane slicing / relayout);
    # masking Q and V is enough: the K=128 contraction then only sees head-h lanes.
    lane = lax.broadcasted_iota(jnp.int32, (B * S, H), 1)
    qh, vh = [], []
    for h in range(NUM_HEADS):
        in_h = (lane >= h * HEAD_DIM) & (lane < (h + 1) * HEAD_DIM)
        qh.append(jnp.where(in_h, q, 0.0).reshape(B, S, H))
        vh.append(jnp.where(in_h, v, 0.0).reshape(B, S, H))
    qs = jnp.concatenate(qh, axis=0).astype(jnp.bfloat16)                # (NH*B, S, H)
    vs = jnp.concatenate(vh, axis=0).astype(jnp.bfloat16)                # (NH*B, S, H)
    ks = jnp.concatenate([k.reshape(B, S, H)] * NUM_HEADS,
                         axis=0).astype(jnp.bfloat16)                    # (NH*B, S, H)

    bias3 = ((1.0 - mask_ref[...]) * (-1e9))[:, None, :]                 # (B, 1, S)
    bias_hb = jnp.concatenate([bias3] * NUM_HEADS, axis=0)               # (NH*B, 1, S)

    sc = jnp.einsum('bqd,bkd->bqk', qs, ks,
                    preferred_element_type=jnp.float32) * scale + bias_hb
    sc = sc - jnp.max(sc, axis=-1, keepdims=True)
    e = jnp.exp(sc)
    p = e * pl.reciprocal(jnp.sum(e, axis=-1, keepdims=True), approx=True)
    ctx = jnp.einsum('bqk,bkd->bqd', p.astype(jnp.bfloat16), vs,
                     preferred_element_type=jnp.float32)                 # (NH*B, S, H)

    # merge heads: each head's context is nonzero only in its own lanes -> add
    ctx_sum = ctx[0:B]
    for h in range(1, NUM_HEADS):
        ctx_sum = ctx_sum + ctx[h * B:(h + 1) * B]
    ctx2 = ctx_sum.reshape(B * S, H)
    attn = jnp.dot(ctx2.astype(jnp.bfloat16), wo_ref[...],
                   preferred_element_type=jnp.float32) + bo_ref[...]

    h1 = _layernorm(x2 + attn, ln1_g_ref[...], ln1_b_ref[...])
    ff = _gelu(jnp.dot(h1.astype(jnp.bfloat16), wff1_ref[...],
                       preferred_element_type=jnp.float32) + bff1_ref[...])
    ff2 = jnp.dot(ff.astype(jnp.bfloat16), wff2_ref[...],
                  preferred_element_type=jnp.float32) + bff2_ref[...]
    x_sc[...] = _layernorm(h1 + ff2, ln2_g_ref[...], ln2_b_ref[...])

    # ---- classifier + CE + SupCon, last grid step only ----
    @pl.when(l == NUM_LAYERS - 1)
    def _():
        # CLS pooling: B single-row sublane reads (cheap gather, no transpose)
        pooled = jnp.concatenate(
            [x_sc[pl.ds(b * S, 1), :] for b in range(B)], axis=0)        # (B, H) f32
        logits = jnp.dot(pooled.astype(jnp.bfloat16), wc_ref[...],
                         preferred_element_type=jnp.float32) + bc_ref[...]  # (B, 128)

        # labels from SMEM -> (B,1)/(1,B) vectors (B tiny, unrolled)
        row = lax.broadcasted_iota(jnp.int32, (B, 1), 0)
        colb = lax.broadcasted_iota(jnp.int32, (1, B), 1)
        lab_col = jnp.zeros((B, 1), jnp.int32)
        lab_row = jnp.zeros((1, B), jnp.int32)
        for i in range(B):
            li = labels_ref[i]
            lab_col = jnp.where(row == i, li, lab_col)
            lab_row = jnp.where(colb == i, li, lab_row)

        # cross entropy (mean) over the real NUM_CLASSES columns (rest masked)
        col = lax.broadcasted_iota(jnp.int32, (B, OUT_LANES), 1)
        valid = col < NUM_CLASSES
        zl = jnp.where(valid, logits, -1e9)
        m = jnp.max(zl, axis=-1, keepdims=True)
        z = zl - m
        ez = jnp.where(valid, jnp.exp(z), 0.0)
        lse = jnp.log(jnp.sum(ez, axis=-1, keepdims=True))
        onehot = (col == lab_col).astype(jnp.float32)
        nll = lse - jnp.sum(onehot * z, axis=-1, keepdims=True)          # (B, 1)
        ce = jnp.sum(nll, axis=0, keepdims=True) * (1.0 / B)             # (1, 1)

        # supervised contrastive loss on pooled CLS features
        feat = pooled * lax.rsqrt(
            jnp.sum(pooled * pooled, axis=-1, keepdims=True) + 1e-12)
        sim = jnp.einsum('ih,jh->ij', feat, feat,
                         preferred_element_type=jnp.float32) * (1.0 / TAU)
        sim = sim - jnp.max(sim, axis=-1, keepdims=True)
        ri = lax.broadcasted_iota(jnp.int32, (B, B), 0)
        ci = lax.broadcasted_iota(jnp.int32, (B, B), 1)
        not_self = (ri != ci).astype(jnp.float32)
        pos = (lab_col == lab_row).astype(jnp.float32) * not_self
        exp_sim = jnp.exp(sim) * not_self
        log_prob = sim - jnp.log(jnp.sum(exp_sim, axis=-1, keepdims=True))
        # TODO(synk): samples with no same-label positive contribute 0
        # (denominator clamped to 1), matching common SupConLoss implementations.
        denom = jnp.maximum(jnp.sum(pos, axis=-1, keepdims=True), 1.0)
        mlpp = (jnp.sum(pos * log_prob, axis=-1, keepdims=True)
                * pl.reciprocal(denom, approx=True))
        scl = -jnp.sum(mlpp, axis=0, keepdims=True) * (1.0 / B)          # (1, 1)

        loss = (1.0 - LAMBDA) * ce + LAMBDA * scl

        # pack logits rows + [loss, ce, scl] into one dense (8, 128) slab
        lane_o = lax.broadcasted_iota(jnp.int32, (1, OUT_LANES), 1)
        loss_row = jnp.where(lane_o == 0, loss,
                             jnp.zeros((1, OUT_LANES), jnp.float32))
        loss_row = jnp.where(lane_o == 1, ce, loss_row)
        loss_row = jnp.where(lane_o == 2, scl, loss_row)
        slab = jnp.concatenate(
            [logits, loss_row, jnp.zeros((8 - B - 1, OUT_LANES), jnp.float32)],
            axis=0)                                                       # (8, 128)
        out_ref[...] = slab


# ------------------------------- parameters ---------------------------------
def init_params(key):
    keys = jax.random.split(key, 16)
    it = iter(keys)

    def nrm(shape):
        return jax.random.normal(next(it), shape, jnp.float32) * 0.02

    wqkv, wo, wff1, wff2 = [], [], [], []
    for _ in range(NUM_LAYERS):
        wqkv.append(jnp.concatenate([nrm((H, H)), nrm((H, H)), nrm((H, H))], axis=1))
        wo.append(nrm((H, H)))
        wff1.append(nrm((H, FF)))
        wff2.append(nrm((FF, H)))

    zeros = lambda s: jnp.zeros(s, jnp.float32)
    ones = lambda s: jnp.ones(s, jnp.float32)
    # classifier padded to a full 128-lane output tile (cols >= NUM_CLASSES are 0)
    wc = jnp.pad(nrm((H, NUM_CLASSES)), ((0, 0), (0, OUT_LANES - NUM_CLASSES)))

    # matmul weights stored as bf16 (half the DMA bytes, native bf16 MXU);
    # accumulation stays f32 via preferred_element_type.
    return {
        'word_emb': nrm((VOCAB, H)).astype(jnp.bfloat16),
        'pos_emb': nrm((S, H)),
        'emb_ln_g': ones((1, H)), 'emb_ln_b': zeros((1, H)),
        'wqkv': jnp.stack(wqkv).astype(jnp.bfloat16),        # (L, H, 3H)
        'bqkv': zeros((NUM_LAYERS, 1, 3 * H)),
        'wo': jnp.stack(wo).astype(jnp.bfloat16),            # (L, H, H)
        'bo': zeros((NUM_LAYERS, 1, H)),
        'ln1_g': ones((NUM_LAYERS, 1, H)), 'ln1_b': zeros((NUM_LAYERS, 1, H)),
        'wff1': jnp.stack(wff1).astype(jnp.bfloat16),        # (L, H, FF)
        'bff1': zeros((NUM_LAYERS, 1, FF)),
        'wff2': jnp.stack(wff2).astype(jnp.bfloat16),        # (L, FF, H)
        'bff2': zeros((NUM_LAYERS, 1, H)),
        'ln2_g': ones((NUM_LAYERS, 1, H)), 'ln2_b': zeros((NUM_LAYERS, 1, H)),
        'wc': wc.astype(jnp.bfloat16),                       # (H, 128)
        'bc': zeros((1, OUT_LANES)),
    }
# TODO(synk): the projection head (Linear->ReLU->Linear) in __init__ is never
# used in SCSCLModel.forward, so it is intentionally not instantiated here.


# ------------------------------- full forward -------------------------------
def scscl_forward(params, input_ids, attention_mask, labels):
    """Training-mode forward of SCSCLModel: returns (None, logits, [loss, ce, scl])."""
    ids2 = input_ids.reshape(B * S, 1).astype(jnp.int32)
    mask_f = attention_mask.astype(jnp.float32)

    tensor_ins = [
        ids2, mask_f,
        params['word_emb'], params['pos_emb'],
        params['emb_ln_g'], params['emb_ln_b'],
        params['wqkv'], params['bqkv'], params['wo'], params['bo'],
        params['ln1_g'], params['ln1_b'],
        params['wff1'], params['bff1'], params['wff2'], params['bff2'],
        params['ln2_g'], params['ln2_b'],
        params['wc'], params['bc'],
    ]

    def resident(shape):
        n = len(shape)

        def imap(l, lab):
            return (0,) * n
        return pl.BlockSpec(shape, imap)

    def per_layer(shape):
        n = len(shape)

        def imap(l, lab):
            return (l,) + (0,) * n
        return pl.BlockSpec((None,) + shape, imap)

    in_specs = [
        resident((B * S, 1)),            # ids
        resident((B, S)),                # attention mask
        resident((VOCAB, H)),            # word_emb
        resident((S, H)),                # pos_emb
        resident((1, H)), resident((1, H)),              # emb LN
        per_layer((H, 3 * H)), per_layer((1, 3 * H)),    # wqkv, bqkv
        per_layer((H, H)), per_layer((1, H)),            # wo, bo
        per_layer((1, H)), per_layer((1, H)),            # ln1
        per_layer((H, FF)), per_layer((1, FF)),          # wff1, bff1
        per_layer((FF, H)), per_layer((1, H)),           # wff2, bff2
        per_layer((1, H)), per_layer((1, H)),            # ln2
        resident((H, OUT_LANES)), resident((1, OUT_LANES)),  # classifier
    ]

    grid_spec = pltpu.PrefetchScalarGridSpec(
        num_scalar_prefetch=1,           # labels -> SMEM
        grid=(NUM_LAYERS,),
        in_specs=in_specs,
        out_specs=pl.BlockSpec((8, OUT_LANES), lambda l, lab: (0, 0)),
        scratch_shapes=[pltpu.VMEM((B * S, H), jnp.float32)],
    )

    slab = pl.pallas_call(
        fused_forward_kernel,
        out_shape=jax.ShapeDtypeStruct((8, OUT_LANES), jnp.float32),
        grid_spec=grid_spec,
        compiler_params=pltpu.CompilerParams(
            dimension_semantics=("arbitrary",)),
    )(labels.astype(jnp.int32), *tensor_ins)

    logits = slab[:B, :NUM_CLASSES]
    # training path of SCSCLModel.forward
    return None, logits, [slab[B, 0], slab[B, 1], slab[B, 2]]
# TODO(synk): only the training branch (loss, ce, scl) is implemented; the eval
# branch's hidden_states tuple is not materialized (training path returns None).


# --------------------------------- driver -----------------------------------
if __name__ == "__main__":
    key = jax.random.PRNGKey(0)
    pkey, ikey = jax.random.split(key)
    params = init_params(pkey)

    input_ids = jax.random.randint(ikey, (B, S), 0, VOCAB, dtype=jnp.int32)
    attention_mask = jnp.ones((B, S), jnp.float32).at[:, S - 3:].set(0.0)
    labels = jnp.array([0, 1, 0, 1], jnp.int32)

    _, logits, (loss, ce, scl) = scscl_forward(params, input_ids,
                                               attention_mask, labels)
    jax.block_until_ready((logits, loss, ce, scl))

    assert logits.shape == (B, NUM_CLASSES)
    assert bool(jnp.isfinite(logits).all())
    assert bool(jnp.isfinite(loss)) and bool(jnp.isfinite(ce)) and bool(jnp.isfinite(scl))

    print("KERNEL_OK")
</pallas_src>

<mosaic_0001>
module attributes {stable_mosaic.version = 11 : i64} {
  func.func @fused_forward_kernel(%arg0: i32, %arg1: memref<4xi32, #tpu.memory_space<smem>>, %arg2: memref<64x1xi32, #tpu.memory_space<vmem>>, %arg3: memref<4x16xf32, #tpu.memory_space<vmem>>, %arg4: memref<64x128xbf16, #tpu.memory_space<vmem>>, %arg5: memref<16x128xf32, #tpu.memory_space<vmem>>, %arg6: memref<1x128xf32, #tpu.memory_space<vmem>>, %arg7: memref<1x128xf32, #tpu.memory_space<vmem>>, %arg8: memref<1x128x384xbf16, #tpu.memory_space<vmem>>, %arg9: memref<1x1x384xf32, #tpu.memory_space<vmem>>, %arg10: memref<1x128x128xbf16, #tpu.memory_space<vmem>>, %arg11: memref<1x1x128xf32, #tpu.memory_space<vmem>>, %arg12: memref<1x1x128xf32, #tpu.memory_space<vmem>>, %arg13: memref<1x1x128xf32, #tpu.memory_space<vmem>>, %arg14: memref<1x128x512xbf16, #tpu.memory_space<vmem>>, %arg15: memref<1x1x512xf32, #tpu.memory_space<vmem>>, %arg16: memref<1x512x128xbf16, #tpu.memory_space<vmem>>, %arg17: memref<1x1x128xf32, #tpu.memory_space<vmem>>, %arg18: memref<1x1x128xf32, #tpu.memory_space<vmem>>, %arg19: memref<1x1x128xf32, #tpu.memory_space<vmem>>, %arg20: memref<128x128xbf16, #tpu.memory_space<vmem>>, %arg21: memref<1x128xf32, #tpu.memory_space<vmem>>, %arg22: memref<8x128xf32, #tpu.memory_space<vmem>>, %arg23: memref<64x128xf32, #tpu.memory_space<vmem>>) attributes {dimension_semantics = [#tpu.dimension_semantics<arbitrary>], iteration_bounds = array<i64: 2>, scalar_prefetch = 1 : i64, scratch_operands = 1 : i64, tpu.core_type = #tpu.core_type<tc>, window_params = [{pipeline_mode = #tpu.pipeline_mode<synchronous>, transform_indices = @transform_0, window_bounds = array<i64: 64, 1>}, {pipeline_mode = #tpu.pipeline_mode<synchronous>, transform_indices = @transform_1, window_bounds = array<i64: 4, 16>}, {pipeline_mode = #tpu.pipeline_mode<synchronous>, transform_indices = @transform_2, window_bounds = array<i64: 64, 128>}, {pipeline_mode = #tpu.pipeline_mode<synchronous>, transform_indices = @transform_3, window_bounds = array<i64: 16, 128>}, {pipeline_mode = #tpu.pipeline_mode<synchronous>, transform_indices = @transform_4, window_bounds = array<i64: 1, 128>}, {pipeline_mode = #tpu.pipeline_mode<synchronous>, transform_indices = @transform_5, window_bounds = array<i64: 1, 128>}, {transform_indices = @transform_6, window_bounds = array<i64: 1, 128, 384>}, {transform_indices = @transform_7, window_bounds = array<i64: 1, 1, 384>}, {transform_indices = @transform_8, window_bounds = array<i64: 1, 128, 128>}, {transform_indices = @transform_9, window_bounds = array<i64: 1, 1, 128>}, {transform_indices = @transform_10, window_bounds = array<i64: 1, 1, 128>}, {transform_indices = @transform_11, window_bounds = array<i64: 1, 1, 128>}, {transform_indices = @transform_12, window_bounds = array<i64: 1, 128, 512>}, {transform_indices = @transform_13, window_bounds = array<i64: 1, 1, 512>}, {transform_indices = @transform_14, window_bounds = array<i64: 1, 512, 128>}, {transform_indices = @transform_15, window_bounds = array<i64: 1, 1, 128>}, {transform_indices = @transform_16, window_bounds = array<i64: 1, 1, 128>}, {transform_indices = @transform_17, window_bounds = array<i64: 1, 1, 128>}, {pipeline_mode = #tpu.pipeline_mode<synchronous>, transform_indices = @transform_18, window_bounds = array<i64: 128, 128>}, {pipeline_mode = #tpu.pipeline_mode<synchronous>, transform_indices = @transform_19, window_bounds = array<i64: 1, 128>}, {pipeline_mode = #tpu.pipeline_mode<synchronous>, transform_indices = @transform_20, window_bounds = array<i64: 8, 128>}]} {
    %c0_i32 = arith.constant 0 : i32
    %0 = arith.cmpi eq, %arg0, %c0_i32 : i32
    %1 = arith.extui %0 : i1 to i32
    %c0_i32_0 = arith.constant 0 : i32
    %2 = arith.cmpi ne, %1, %c0_i32_0 : i32
    scf.if %2 {
      %172 = tpu.iota {dimensions = array<i32: 1>} : vector<64x64xi32>
      %c0_73 = arith.constant 0 : index
      %c0_74 = arith.constant 0 : index
      %173 = vector.load %arg2[%c0_73, %c0_74] : memref<64x1xi32, #tpu.memory_space<vmem>>, vector<64x1xi32>
      %174 = vector.broadcast %173 : vector<64x1xi32> to vector<64x64xi32>
      %175 = arith.cmpi eq, %174, %172 : vector<64x64xi32>
      %176 = arith.extui %175 : vector<64x64xi1> to vector<64x64xi32>
      %177 = arith.sitofp %176 : vector<64x64xi32> to vector<64x64xf32>
      %178 = arith.truncf %177 : vector<64x64xf32> to vector<64x64xbf16>
      %c0_75 = arith.constant 0 : index
      %c0_76 = arith.constant 0 : index
      %179 = vector.load %arg4[%c0_75, %c0_76] : memref<64x128xbf16, #tpu.memory_space<vmem>>, vector<64x128xbf16>
      %cst_77 = arith.constant dense<0.000000e+00> : vector<64x128xf32>
      %180 = tpu.matmul %178, %179, %cst_77 {dimension_numbers = #tpu.dot_dimension_numbers<[1], [0], [0], [1], [0, 0, 1, 1], [], []>} : vector<64x64xbf16>, vector<64x128xbf16>, vector<64x128xf32> -> vector<64x128xf32>
      %c0_78 = arith.constant 0 : index
      %c0_79 = arith.constant 0 : index
      %181 = vector.load %arg5[%c0_78, %c0_79] : memref<16x128xf32, #tpu.memory_space<vmem>>, vector<16x128xf32>
      %182 = tpu.concatenate %181, %181, %181, %181 in 0 : vector<16x128xf32>, vector<16x128xf32>, vector<16x128xf32>, vector<16x128xf32> -> vector<64x128xf32>
      %183 = arith.addf %180, %182 : vector<64x128xf32>
      %c0_80 = arith.constant 0 : index
      %c0_81 = arith.constant 0 : index
      %184 = vector.load %arg6[%c0_80, %c0_81] : memref<1x128xf32, #tpu.memory_space<vmem>>, vector<1x128xf32>
      %c0_82 = arith.constant 0 : index
      %c0_83 = arith.constant 0 : index
      %185 = vector.load %arg7[%c0_82, %c0_83] : memref<1x128xf32, #tpu.memory_space<vmem>>, vector<1x128xf32>
      %cst_84 = arith.constant dense<0.000000e+00> : vector<64xf32>
      %186 = vector.multi_reduction <add>, %183, %cst_84 [1] : vector<64x128xf32> to vector<64xf32>
      %187 = vector.shape_cast %186 : vector<64xf32> to vector<64x1xf32>
      %cst_85 = arith.constant 1.280000e+02 : f32
      %188 = vector.broadcast %cst_85 : f32 to vector<64x1xf32>
      %189 = arith.divf %187, %188 : vector<64x1xf32>
      %190 = vector.broadcast %189 : vector<64x1xf32> to vector<64x128xf32>
      %191 = arith.subf %183, %190 : vector<64x128xf32>
      %192 = vector.broadcast %189 : vector<64x1xf32> to vector<64x128xf32>
      %193 = arith.subf %183, %192 : vector<64x128xf32>
      %194 = arith.mulf %191, %193 : vector<64x128xf32>
      %cst_86 = arith.constant dense<0.000000e+00> : vector<64xf32>
      %195 = vector.multi_reduction <add>, %194, %cst_86 [1] : vector<64x128xf32> to vector<64xf32>
      %196 = vector.shape_cast %195 : vector<64xf32> to vector<64x1xf32>
      %cst_87 = arith.constant 1.280000e+02 : f32
      %197 = vector.broadcast %cst_87 : f32 to vector<64x1xf32>
      %198 = arith.divf %196, %197 : vector<64x1xf32>
      %199 = vector.broadcast %189 : vector<64x1xf32> to vector<64x128xf32>
      %200 = arith.subf %183, %199 : vector<64x128xf32>
      %cst_88 = arith.constant 9.99999996E-13 : f32
      %201 = vector.broadcast %cst_88 : f32 to vector<64x1xf32>
      %202 = arith.addf %198, %201 : vector<64x1xf32>
      %203 = math.rsqrt %202 : vector<64x1xf32>
      %204 = vector.broadcast %203 : vector<64x1xf32> to vector<64x128xf32>
      %205 = arith.mulf %200, %204 : vector<64x128xf32>
      %206 = vector.broadcast %184 : vector<1x128xf32> to vector<64x128xf32>
      %207 = arith.mulf %205, %206 : vector<64x128xf32>
      %208 = vector.broadcast %185 : vector<1x128xf32> to vector<64x128xf32>
      %209 = arith.addf %207, %208 : vector<64x128xf32>
      %c0_89 = arith.constant 0 : index
      %c0_90 = arith.constant 0 : index
      %210 = vector.load %arg23[%c0_89, %c0_90] : memref<64x128xf32, #tpu.memory_space<vmem>>, vector<64x128xf32>
      tpu.vector_store %arg23[%c0_89, %c0_90], %209 {strides = array<i32>} : memref<64x128xf32, #tpu.memory_space<vmem>>, vector<64x128xf32>,
    } else {
    }
    %c0 = arith.constant 0 : index
    %c0_1 = arith.constant 0 : index
    %3 = vector.load %arg23[%c0, %c0_1] : memref<64x128xf32, #tpu.memory_space<vmem>>, vector<64x128xf32>
    %4 = arith.truncf %3 : vector<64x128xf32> to vector<64x128xbf16>
    %c0_2 = arith.constant 0 : index
    %c0_3 = arith.constant 0 : index
    %c0_4 = arith.constant 0 : index
    %5 = vector.load %arg8[%c0_2, %c0_3, %c0_4] : memref<1x128x384xbf16, #tpu.memory_space<vmem>>, vector<1x128x384xbf16>
    %6 = vector.shape_cast %5 : vector<1x128x384xbf16> to vector<128x384xbf16>
    %cst = arith.constant dense<0.000000e+00> : vector<64x384xf32>
    %7 = tpu.matmul %4, %6, %cst {dimension_numbers = #tpu.dot_dimension_numbers<[1], [0], [0], [1], [0, 0, 1, 1], [], []>} : vector<64x128xbf16>, vector<128x384xbf16>, vector<64x384xf32> -> vector<64x384xf32>
    %c0_5 = arith.constant 0 : index
    %c0_6 = arith.constant 0 : index
    %c0_7 = arith.constant 0 : index
    %8 = vector.load %arg9[%c0_5, %c0_6, %c0_7] : memref<1x1x384xf32, #tpu.memory_space<vmem>>, vector<1x1x384xf32>
    %9 = vector.shape_cast %8 : vector<1x1x384xf32> to vector<1x384xf32>
    %10 = vector.broadcast %9 : vector<1x384xf32> to vector<64x384xf32>
    %11 = arith.addf %7, %10 : vector<64x384xf32>
    %12 = vector.extract_strided_slice %11 {offsets = [0, 0], sizes = [64, 128], strides = [1, 1]} : vector<64x384xf32> to vector<64x128xf32>
    %13 = vector.extract_strided_slice %11 {offsets = [0, 128], sizes = [64, 128], strides = [1, 1]} : vector<64x384xf32> to vector<64x128xf32>
    %14 = vector.extract_strided_slice %11 {offsets = [0, 256], sizes = [64, 128], strides = [1, 1]} : vector<64x384xf32> to vector<64x128xf32>
    %15 = tpu.iota {dimensions = array<i32: 1>} : vector<64x128xi32>
    %c0_i32_8 = arith.constant 0 : i32
    %16 = vector.broadcast %c0_i32_8 : i32 to vector<64x128xi32>
    %17 = arith.cmpi sge, %15, %16 : vector<64x128xi32>
    %c64_i32 = arith.constant 64 : i32
    %18 = vector.broadcast %c64_i32 : i32 to vector<64x128xi32>
    %19 = arith.cmpi slt, %15, %18 : vector<64x128xi32>
    %20 = arith.andi %17, %19 : vector<64x128xi1>
    %cst_9 = arith.constant 0.000000e+00 : f32
    %21 = vector.broadcast %cst_9 : f32 to vector<64x128xf32>
    %22 = arith.select %20, %12, %21 : vector<64x128xi1>, vector<64x128xf32>
    %23 = vector.shape_cast %22 : vector<64x128xf32> to vector<4x16x128xf32>
    %cst_10 = arith.constant 0.000000e+00 : f32
    %24 = vector.broadcast %cst_10 : f32 to vector<64x128xf32>
    %25 = arith.select %20, %14, %24 : vector<64x128xi1>, vector<64x128xf32>
    %26 = vector.shape_cast %25 : vector<64x128xf32> to vector<4x16x128xf32>
    %c64_i32_11 = arith.constant 64 : i32
    %27 = vector.broadcast %c64_i32_11 : i32 to vector<64x128xi32>
    %28 = arith.cmpi sge, %15, %27 : vector<64x128xi32>
    %c128_i32 = arith.constant 128 : i32
    %29 = vector.broadcast %c128_i32 : i32 to vector<64x128xi32>
    %30 = arith.cmpi slt, %15, %29 : vector<64x128xi32>
    %31 = arith.andi %28, %30 : vector<64x128xi1>
    %cst_12 = arith.constant 0.000000e+00 : f32
    %32 = vector.broadcast %cst_12 : f32 to vector<64x128xf32>
    %33 = arith.select %31, %12, %32 : vector<64x128xi1>, vector<64x128xf32>
    %34 = vector.shape_cast %33 : vector<64x128xf32> to vector<4x16x128xf32>
    %cst_13 = arith.constant 0.000000e+00 : f32
    %35 = vector.broadcast %cst_13 : f32 to vector<64x128xf32>
    %36 = arith.select %31, %14, %35 : vector<64x128xi1>, vector<64x128xf32>
    %37 = vector.shape_cast %36 : vector<64x128xf32> to vector<4x16x128xf32>
    %38 = tpu.concatenate %23, %34 in 0 : vector<4x16x128xf32>, vector<4x16x128xf32> -> vector<8x16x128xf32>
    %39 = arith.truncf %38 : vector<8x16x128xf32> to vector<8x16x128xbf16>
    %40 = tpu.concatenate %26, %37 in 0 : vector<4x16x128xf32>, vector<4x16x128xf32> -> vector<8x16x128xf32>
    %41 = arith.truncf %40 : vector<8x16x128xf32> to vector<8x16x128xbf16>
    %42 = vector.shape_cast %13 : vector<64x128xf32> to vector<4x16x128xf32>
    %43 = tpu.concatenate %42, %42 in 0 : vector<4x16x128xf32>, vector<4x16x128xf32> -> vector<8x16x128xf32>
    %44 = arith.truncf %43 : vector<8x16x128xf32> to vector<8x16x128xbf16>
    %c0_14 = arith.constant 0 : index
    %c0_15 = arith.constant 0 : index
    %45 = vector.load %arg3[%c0_14, %c0_15] : memref<4x16xf32, #tpu.memory_space<vmem>>, vector<4x16xf32>
    %cst_16 = arith.constant 1.000000e+00 : f32
    %46 = vector.broadcast %cst_16 : f32 to vector<4x16xf32>
    %47 = arith.subf %46, %45 : vector<4x16xf32>
    %cst_17 = arith.constant -1.000000e+09 : f32
    %48 = vector.broadcast %cst_17 : f32 to vector<4x16xf32>
    %49 = arith.mulf %47, %48 : vector<4x16xf32>
    %50 = vector.shape_cast %49 : vector<4x16xf32> to vector<4x1x16xf32>
    %51 = tpu.concatenate %50, %50 in 0 : vector<4x1x16xf32>, vector<4x1x16xf32> -> vector<8x1x16xf32>
    "tpu.trace_start"() <{level = 10 : i32, message = "bqd,bkd->bqk"}> : () -> ()
    %cst_18 = arith.constant dense<0.000000e+00> : vector<8x16x16xf32>
    %52 = tpu.matmul %39, %44, %cst_18 {dimension_numbers = #tpu.dot_dimension_numbers<[2], [2], [1], [1], [0, 0, 0, 1, 1, 1], [0], [0]>} : vector<8x16x128xbf16>, vector<8x16x128xbf16>, vector<8x16x16xf32> -> vector<8x16x16xf32>
    "tpu.trace_stop"() : () -> ()
    %cst_19 = arith.constant 1.250000e-01 : f32
    %53 = vector.broadcast %cst_19 : f32 to vector<8x16x16xf32>
    %54 = arith.mulf %52, %53 : vector<8x16x16xf32>
    %55 = vector.broadcast %51 : vector<8x1x16xf32> to vector<8x16x16xf32>
    %56 = arith.addf %54, %55 : vector<8x16x16xf32>
    %cst_20 = arith.constant dense<0xFF800000> : vector<8x16xf32>
    %57 = vector.multi_reduction <maximumf>, %56, %cst_20 [2] : vector<8x16x16xf32> to vector<8x16xf32>
    %58 = vector.shape_cast %57 : vector<8x16xf32> to vector<8x16x1xf32>
    %59 = vector.broadcast %58 : vector<8x16x1xf32> to vector<8x16x16xf32>
    %60 = arith.subf %56, %59 : vector<8x16x16xf32>
    %61 = math.exp %60 : vector<8x16x16xf32>
    %cst_21 = arith.constant dense<0.000000e+00> : vector<8x16xf32>
    %62 = vector.multi_reduction <add>, %61, %cst_21 [2] : vector<8x16x16xf32> to vector<8x16xf32>
    %63 = vector.shape_cast %62 : vector<8x16xf32> to vector<8x16x1xf32>
    %64 = tpu.reciprocal %63 {approx = true} : vector<8x16x1xf32> -> vector<8x16x1xf32>
    %65 = vector.broadcast %64 : vector<8x16x1xf32> to vector<8x16x16xf32>
    %66 = arith.mulf %61, %65 : vector<8x16x16xf32>
    %67 = arith.truncf %66 : vector<8x16x16xf32> to vector<8x16x16xbf16>
    "tpu.trace_start"() <{level = 10 : i32, message = "bqk,bkd->bqd"}> : () -> ()
    %cst_22 = arith.constant dense<0.000000e+00> : vector<8x16x128xf32>
    %68 = tpu.matmul %67, %41, %cst_22 {dimension_numbers = #tpu.dot_dimension_numbers<[2], [1], [1], [2], [0, 0, 0, 1, 1, 2], [0], [0]>} : vector<8x16x16xbf16>, vector<8x16x128xbf16>, vector<8x16x128xf32> -> vector<8x16x128xf32>
    "tpu.trace_stop"() : () -> ()
    %69 = vector.extract_strided_slice %68 {offsets = [0, 0, 0], sizes = [4, 16, 128], strides = [1, 1, 1]} : vector<8x16x128xf32> to vector<4x16x128xf32>
    %70 = vector.extract_strided_slice %68 {offsets = [4, 0, 0], sizes = [4, 16, 128], strides = [1, 1, 1]} : vector<8x16x128xf32> to vector<4x16x128xf32>
    %71 = arith.addf %69, %70 : vector<4x16x128xf32>
    %72 = vector.shape_cast %71 : vector<4x16x128xf32> to vector<64x128xf32>
    %73 = arith.truncf %72 : vector<64x128xf32> to vector<64x128xbf16>
    %c0_23 = arith.constant 0 : index
    %c0_24 = arith.constant 0 : index
    %c0_25 = arith.constant 0 : index
    %74 = vector.load %arg10[%c0_23, %c0_24, %c0_25] : memref<1x128x128xbf16, #tpu.memory_space<vmem>>, vector<1x128x128xbf16>
    %75 = vector.shape_cast %74 : vector<1x128x128xbf16> to vector<128x128xbf16>
    %cst_26 = arith.constant dense<0.000000e+00> : vector<64x128xf32>
    %76 = tpu.matmul %73, %75, %cst_26 {dimension_numbers = #tpu.dot_dimension_numbers<[1], [0], [0], [1], [0, 0, 1, 1], [], []>} : vector<64x128xbf16>, vector<128x128xbf16>, vector<64x128xf32> -> vector<64x128xf32>
    %c0_27 = arith.constant 0 : index
    %c0_28 = arith.constant 0 : index
    %c0_29 = arith.constant 0 : index
    %77 = vector.load %arg11[%c0_27, %c0_28, %c0_29] : memref<1x1x128xf32, #tpu.memory_space<vmem>>, vector<1x1x128xf32>
    %78 = vector.shape_cast %77 : vector<1x1x128xf32> to vector<1x128xf32>
    %79 = vector.broadcast %78 : vector<1x128xf32> to vector<64x128xf32>
    %80 = arith.addf %76, %79 : vector<64x128xf32>
    %81 = arith.addf %3, %80 : vector<64x128xf32>
    %c0_30 = arith.constant 0 : index
    %c0_31 = arith.constant 0 : index
    %c0_32 = arith.constant 0 : index
    %82 = vector.load %arg12[%c0_30, %c0_31, %c0_32] : memref<1x1x128xf32, #tpu.memory_space<vmem>>, vector<1x1x128xf32>
    %83 = vector.shape_cast %82 : vector<1x1x128xf32> to vector<1x128xf32>
    %c0_33 = arith.constant 0 : index
    %c0_34 = arith.constant 0 : index
    %c0_35 = arith.constant 0 : index
    %84 = vector.load %arg13[%c0_33, %c0_34, %c0_35] : memref<1x1x128xf32, #tpu.memory_space<vmem>>, vector<1x1x128xf32>
    %85 = vector.shape_cast %84 : vector<1x1x128xf32> to vector<1x128xf32>
    %cst_36 = arith.constant dense<0.000000e+00> : vector<64xf32>
    %86 = vector.multi_reduction <add>, %81, %cst_36 [1] : vector<64x128xf32> to vector<64xf32>
    %87 = vector.shape_cast %86 : vector<64xf32> to vector<64x1xf32>
    %cst_37 = arith.constant 1.280000e+02 : f32
    %88 = vector.broadcast %cst_37 : f32 to vector<64x1xf32>
    %89 = arith.divf %87, %88 : vector<64x1xf32>
    %90 = vector.broadcast %89 : vector<64x1xf32> to vector<64x128xf32>
    %91 = arith.subf %81, %90 : vector<64x128xf32>
    %92 = vector.broadcast %89 : vector<64x1xf32> to vector<64x128xf32>
    %93 = arith.subf %81, %92 : vector<64x128xf32>
    %94 = arith.mulf %91, %93 : vector<64x128xf32>
    %cst_38 = arith.constant dense<0.000000e+00> : vector<64xf32>
    %95 = vector.multi_reduction <add>, %94, %cst_38 [1] : vector<64x128xf32> to vector<64xf32>
    %96 = vector.shape_cast %95 : vector<64xf32> to vector<64x1xf32>
    %cst_39 = arith.constant 1.280000e+02 : f32
    %97 = vector.broadcast %cst_39 : f32 to vector<64x1xf32>
    %98 = arith.divf %96, %97 : vector<64x1xf32>
    %99 = vector.broadcast %89 : vector<64x1xf32> to vector<64x128xf32>
    %100 = arith.subf %81, %99 : vector<64x128xf32>
    %cst_40 = arith.constant 9.99999996E-13 : f32
    %101 = vector.broadcast %cst_40 : f32 to vector<64x1xf32>
    %102 = arith.addf %98, %101 : vector<64x1xf32>
    %103 = math.rsqrt %102 : vector<64x1xf32>
    %104 = vector.broadcast %103 : vector<64x1xf32> to vector<64x128xf32>
    %105 = arith.mulf %100, %104 : vector<64x128xf32>
    %106 = vector.broadcast %83 : vector<1x128xf32> to vector<64x128xf32>
    %107 = arith.mulf %105, %106 : vector<64x128xf32>
    %108 = vector.broadcast %85 : vector<1x128xf32> to vector<64x128xf32>
    %109 = arith.addf %107, %108 : vector<64x128xf32>
    %110 = arith.truncf %109 : vector<64x128xf32> to vector<64x128xbf16>
    %c0_41 = arith.constant 0 : index
    %c0_42 = arith.constant 0 : index
    %c0_43 = arith.constant 0 : index
    %111 = vector.load %arg14[%c0_41, %c0_42, %c0_43] : memref<1x128x512xbf16, #tpu.memory_space<vmem>>, vector<1x128x512xbf16>
    %112 = vector.shape_cast %111 : vector<1x128x512xbf16> to vector<128x512xbf16>
    %cst_44 = arith.constant dense<0.000000e+00> : vector<64x512xf32>
    %113 = tpu.matmul %110, %112, %cst_44 {dimension_numbers = #tpu.dot_dimension_numbers<[1], [0], [0], [1], [0, 0, 1, 1], [], []>} : vector<64x128xbf16>, vector<128x512xbf16>, vector<64x512xf32> -> vector<64x512xf32>
    %c0_45 = arith.constant 0 : index
    %c0_46 = arith.constant 0 : index
    %c0_47 = arith.constant 0 : index
    %114 = vector.load %arg15[%c0_45, %c0_46, %c0_47] : memref<1x1x512xf32, #tpu.memory_space<vmem>>, vector<1x1x512xf32>
    %115 = vector.shape_cast %114 : vector<1x1x512xf32> to vector<1x512xf32>
    %116 = vector.broadcast %115 : vector<1x512xf32> to vector<64x512xf32>
    %117 = arith.addf %113, %116 : vector<64x512xf32>
    %cst_48 = arith.constant 5.000000e-01 : f32
    %118 = vector.broadcast %cst_48 : f32 to vector<64x512xf32>
    %119 = arith.mulf %118, %117 : vector<64x512xf32>
    %cst_49 = arith.constant 4.471500e-02 : f32
    %120 = vector.broadcast %cst_49 : f32 to vector<64x512xf32>
    %121 = arith.mulf %120, %117 : vector<64x512xf32>
    %122 = arith.mulf %121, %117 : vector<64x512xf32>
    %123 = arith.mulf %122, %117 : vector<64x512xf32>
    %124 = arith.addf %117, %123 : vector<64x512xf32>
    %cst_50 = arith.constant 0.797884583 : f32
    %125 = vector.broadcast %cst_50 : f32 to vector<64x512xf32>
    %126 = arith.mulf %125, %124 : vector<64x512xf32>
    %127 = math.tanh %126 : vector<64x512xf32>
    %cst_51 = arith.constant 1.000000e+00 : f32
    %128 = vector.broadcast %cst_51 : f32 to vector<64x512xf32>
    %129 = arith.addf %128, %127 : vector<64x512xf32>
    %130 = arith.mulf %119, %129 : vector<64x512xf32>
    %131 = arith.truncf %130 : vector<64x512xf32> to vector<64x512xbf16>
    %c0_52 = arith.constant 0 : index
    %c0_53 = arith.constant 0 : index
    %c0_54 = arith.constant 0 : index
    %132 = vector.load %arg16[%c0_52, %c0_53, %c0_54] : memref<1x512x128xbf16, #tpu.memory_space<vmem>>, vector<1x512x128xbf16>
    %133 = vector.shape_cast %132 : vector<1x512x128xbf16> to vector<512x128xbf16>
    %cst_55 = arith.constant dense<0.000000e+00> : vector<64x128xf32>
    %134 = tpu.matmul %131, %133, %cst_55 {dimension_numbers = #tpu.dot_dimension_numbers<[1], [0], [0], [1], [0, 0, 1, 1], [], []>} : vector<64x512xbf16>, vector<512x128xbf16>, vector<64x128xf32> -> vector<64x128xf32>
    %c0_56 = arith.constant 0 : index
    %c0_57 = arith.constant 0 : index
    %c0_58 = arith.constant 0 : index
    %135 = vector.load %arg17[%c0_56, %c0_57, %c0_58] : memref<1x1x128xf32, #tpu.memory_space<vmem>>, vector<1x1x128xf32>
    %136 = vector.shape_cast %135 : vector<1x1x128xf32> to vector<1x128xf32>
    %137 = vector.broadcast %136 : vector<1x128xf32> to vector<64x128xf32>
    %138 = arith.addf %134, %137 : vector<64x128xf32>
    %139 = arith.addf %109, %138 : vector<64x128xf32>
    %c0_59 = arith.constant 0 : index
    %c0_60 = arith.constant 0 : index
    %c0_61 = arith.constant 0 : index
    %140 = vector.load %arg18[%c0_59, %c0_60, %c0_61] : memref<1x1x128xf32, #tpu.memory_space<vmem>>, vector<1x1x128xf32>
    %141 = vector.shape_cast %140 : vector<1x1x128xf32> to vector<1x128xf32>
    %c0_62 = arith.constant 0 : index
    %c0_63 = arith.constant 0 : index
    %c0_64 = arith.constant 0 : index
    %142 = vector.load %arg19[%c0_62, %c0_63, %c0_64] : memref<1x1x128xf32, #tpu.memory_space<vmem>>, vector<1x1x128xf32>
    %143 = vector.shape_cast %142 : vector<1x1x128xf32> to vector<1x128xf32>
    %cst_65 = arith.constant dense<0.000000e+00> : vector<64xf32>
    %144 = vector.multi_reduction <add>, %139, %cst_65 [1] : vector<64x128xf32> to vector<64xf32>
    %145 = vector.shape_cast %144 : vector<64xf32> to vector<64x1xf32>
    %cst_66 = arith.constant 1.280000e+02 : f32
    %146 = vector.broadcast %cst_66 : f32 to vector<64x1xf32>
    %147 = arith.divf %145, %146 : vector<64x1xf32>
    %148 = vector.broadcast %147 : vector<64x1xf32> to vector<64x128xf32>
    %149 = arith.subf %139, %148 : vector<64x128xf32>
    %150 = vector.broadcast %147 : vector<64x1xf32> to vector<64x128xf32>
    %151 = arith.subf %139, %150 : vector<64x128xf32>
    %152 = arith.mulf %149, %151 : vector<64x128xf32>
    %cst_67 = arith.constant dense<0.000000e+00> : vector<64xf32>
    %153 = vector.multi_reduction <add>, %152, %cst_67 [1] : vector<64x128xf32> to vector<64xf32>
    %154 = vector.shape_cast %153 : vector<64xf32> to vector<64x1xf32>
    %cst_68 = arith.constant 1.280000e+02 : f32
    %155 = vector.broadcast %cst_68 : f32 to vector<64x1xf32>
    %156 = arith.divf %154, %155 : vector<64x1xf32>
    %157 = vector.broadcast %147 : vector<64x1xf32> to vector<64x128xf32>
    %158 = arith.subf %139, %157 : vector<64x128xf32>
    %cst_69 = arith.constant 9.99999996E-13 : f32
    %159 = vector.broadcast %cst_69 : f32 to vector<64x1xf32>
    %160 = arith.addf %156, %159 : vector<64x1xf32>
    %161 = math.rsqrt %160 : vector<64x1xf32>
    %162 = vector.broadcast %161 : vector<64x1xf32> to vector<64x128xf32>
    %163 = arith.mulf %158, %162 : vector<64x128xf32>
    %164 = vector.broadcast %141 : vector<1x128xf32> to vector<64x128xf32>
    %165 = arith.mulf %163, %164 : vector<64x128xf32>
    %166 = vector.broadcast %143 : vector<1x128xf32> to vector<64x128xf32>
    %167 = arith.addf %165, %166 : vector<64x128xf32>
    %c0_70 = arith.constant 0 : index
    %c0_71 = arith.constant 0 : index
    %168 = vector.load %arg23[%c0_70, %c0_71] : memref<64x128xf32, #tpu.memory_space<vmem>>, vector<64x128xf32>
    tpu.vector_store %arg23[%c0_70, %c0_71], %167 {strides = array<i32>} : memref<64x128xf32, #tpu.memory_space<vmem>>, vector<64x128xf32>,
    %c1_i32 = arith.constant 1 : i32
    %169 = arith.cmpi eq, %arg0, %c1_i32 : i32
    %170 = arith.extui %169 : i1 to i32
    %c0_i32_72 = arith.constant 0 : i32
    %171 = arith.cmpi ne, %170, %c0_i32_72 : i32
    scf.if %171 {
      %c0_73 = arith.constant 0 : index
      %c0_74 = arith.constant 0 : index
      %172 = vector.load %arg23[%c0_73, %c0_74] : memref<64x128xf32, #tpu.memory_space<vmem>>, vector<1x128xf32>
      %c16 = arith.constant 16 : index
      %c0_75 = arith.constant 0 : index
      %173 = vector.load %arg23[%c16, %c0_75] : memref<64x128xf32, #tpu.memory_space<vmem>>, vector<1x128xf32>
      %c32 = arith.constant 32 : index
      %c0_76 = arith.constant 0 : index
      %174 = vector.load %arg23[%c32, %c0_76] : memref<64x128xf32, #tpu.memory_space<vmem>>, vector<1x128xf32>
      %c48 = arith.constant 48 : index
      %c0_77 = arith.constant 0 : index
      %175 = vector.load %arg23[%c48, %c0_77] : memref<64x128xf32, #tpu.memory_space<vmem>>, vector<1x128xf32>
      %176 = tpu.concatenate %172, %173, %174, %175 in 0 : vector<1x128xf32>, vector<1x128xf32>, vector<1x128xf32>, vector<1x128xf32> -> vector<4x128xf32>
      %177 = arith.truncf %176 : vector<4x128xf32> to vector<4x128xbf16>
      %c0_78 = arith.constant 0 : index
      %c0_79 = arith.constant 0 : index
      %178 = vector.load %arg20[%c0_78, %c0_79] : memref<128x128xbf16, #tpu.memory_space<vmem>>, vector<128x128xbf16>
      %cst_80 = arith.constant dense<0.000000e+00> : vector<4x128xf32>
      %179 = tpu.matmul %177, %178, %cst_80 {dimension_numbers = #tpu.dot_dimension_numbers<[1], [0], [0], [1], [0, 0, 1, 1], [], []>} : vector<4x128xbf16>, vector<128x128xbf16>, vector<4x128xf32> -> vector<4x128xf32>
      %c0_81 = arith.constant 0 : index
      %c0_82 = arith.constant 0 : index
      %180 = vector.load %arg21[%c0_81, %c0_82] : memref<1x128xf32, #tpu.memory_space<vmem>>, vector<1x128xf32>
      %181 = vector.broadcast %180 : vector<1x128xf32> to vector<4x128xf32>
      %182 = arith.addf %179, %181 : vector<4x128xf32>
      %183 = tpu.iota {dimensions = array<i32: 0>} : vector<4x1xi32>
      %184 = tpu.iota {dimensions = array<i32: 1>} : vector<1x4xi32>
      %c0_i32_83 = arith.constant 0 : i32
      %185 = vector.broadcast %c0_i32_83 : i32 to vector<4x1xi32>
      %c0_i32_84 = arith.constant 0 : i32
      %186 = vector.broadcast %c0_i32_84 : i32 to vector<1x4xi32>
      %c0_85 = arith.constant 0 : index
      %187 = memref.load %arg1[%c0_85] : memref<4xi32, #tpu.memory_space<smem>>
      %c0_i32_86 = arith.constant 0 : i32
      %188 = vector.broadcast %c0_i32_86 : i32 to vector<4x1xi32>
      %189 = arith.cmpi eq, %183, %188 : vector<4x1xi32>
      %190 = vector.broadcast %187 : i32 to vector<4x1xi32>
      %191 = arith.select %189, %190, %185 : vector<4x1xi1>, vector<4x1xi32>
      %c0_i32_87 = arith.constant 0 : i32
      %192 = vector.broadcast %c0_i32_87 : i32 to vector<1x4xi32>
      %193 = arith.cmpi eq, %184, %192 : vector<1x4xi32>
      %194 = vector.broadcast %187 : i32 to vector<1x4xi32>
      %195 = arith.select %193, %194, %186 : vector<1x4xi1>, vector<1x4xi32>
      %c1 = arith.constant 1 : index
      %196 = memref.load %arg1[%c1] : memref<4xi32, #tpu.memory_space<smem>>
      %c1_i32_88 = arith.constant 1 : i32
      %197 = vector.broadcast %c1_i32_88 : i32 to vector<4x1xi32>
      %198 = arith.cmpi eq, %183, %197 : vector<4x1xi32>
      %199 = vector.broadcast %196 : i32 to vector<4x1xi32>
      %200 = arith.select %198, %199, %191 : vector<4x1xi1>, vector<4x1xi32>
      %c1_i32_89 = arith.constant 1 : i32
      %201 = vector.broadcast %c1_i32_89 : i32 to vector<1x4xi32>
      %202 = arith.cmpi eq, %184, %201 : vector<1x4xi32>
      %203 = vector.broadcast %196 : i32 to vector<1x4xi32>
      %204 = arith.select %202, %203, %195 : vector<1x4xi1>, vector<1x4xi32>
      %c2 = arith.constant 2 : index
      %205 = memref.load %arg1[%c2] : memref<4xi32, #tpu.memory_space<smem>>
      %c2_i32 = arith.constant 2 : i32
      %206 = vector.broadcast %c2_i32 : i32 to vector<4x1xi32>
      %207 = arith.cmpi eq, %183, %206 : vector<4x1xi32>
      %208 = vector.broadcast %205 : i32 to vector<4x1xi32>
      %209 = arith.select %207, %208, %200 : vector<4x1xi1>, vector<4x1xi32>
      %c2_i32_90 = arith.constant 2 : i32
      %210 = vector.broadcast %c2_i32_90 : i32 to vector<1x4xi32>
      %211 = arith.cmpi eq, %184, %210 : vector<1x4xi32>
      %212 = vector.broadcast %205 : i32 to vector<1x4xi32>
      %213 = arith.select %211, %212, %204 : vector<1x4xi1>, vector<1x4xi32>
      %c3 = arith.constant 3 : index
      %214 = memref.load %arg1[%c3] : memref<4xi32, #tpu.memory_space<smem>>
      %c3_i32 = arith.constant 3 : i32
      %215 = vector.broadcast %c3_i32 : i32 to vector<4x1xi32>
      %216 = arith.cmpi eq, %183, %215 : vector<4x1xi32>
      %217 = vector.broadcast %214 : i32 to vector<4x1xi32>
      %218 = arith.select %216, %217, %209 : vector<4x1xi1>, vector<4x1xi32>
      %c3_i32_91 = arith.constant 3 : i32
      %219 = vector.broadcast %c3_i32_91 : i32 to vector<1x4xi32>
      %220 = arith.cmpi eq, %184, %219 : vector<1x4xi32>
      %221 = vector.broadcast %214 : i32 to vector<1x4xi32>
      %222 = arith.select %220, %221, %213 : vector<1x4xi1>, vector<1x4xi32>
      %223 = tpu.iota {dimensions = array<i32: 1>} : vector<4x128xi32>
      %c4_i32 = arith.constant 4 : i32
      %224 = vector.broadcast %c4_i32 : i32 to vector<4x128xi32>
      %225 = arith.cmpi slt, %223, %224 : vector<4x128xi32>
      %cst_92 = arith.constant -1.000000e+09 : f32
      %226 = vector.broadcast %cst_92 : f32 to vector<4x128xf32>
      %227 = arith.select %225, %182, %226 : vector<4x128xi1>, vector<4x128xf32>
      %cst_93 = arith.constant dense<0xFF800000> : vector<4xf32>
      %228 = vector.multi_reduction <maximumf>, %227, %cst_93 [1] : vector<4x128xf32> to vector<4xf32>
      %229 = vector.shape_cast %228 : vector<4xf32> to vector<4x1xf32>
      %230 = vector.broadcast %229 : vector<4x1xf32> to vector<4x128xf32>
      %231 = arith.subf %227, %230 : vector<4x128xf32>
      %232 = math.exp %231 : vector<4x128xf32>
      %cst_94 = arith.constant 0.000000e+00 : f32
      %233 = vector.broadcast %cst_94 : f32 to vector<4x128xf32>
      %234 = arith.select %225, %232, %233 : vector<4x128xi1>, vector<4x128xf32>
      %cst_95 = arith.constant dense<0.000000e+00> : vector<4xf32>
      %235 = vector.multi_reduction <add>, %234, %cst_95 [1] : vector<4x128xf32> to vector<4xf32>
      %236 = vector.shape_cast %235 : vector<4xf32> to vector<4x1xf32>
      %237 = math.log %236 : vector<4x1xf32>
      %238 = vector.broadcast %218 : vector<4x1xi32> to vector<4x128xi32>
      %239 = arith.cmpi eq, %223, %238 : vector<4x128xi32>
      %240 = arith.extui %239 : vector<4x128xi1> to vector<4x128xi32>
      %241 = arith.sitofp %240 : vector<4x128xi32> to vector<4x128xf32>
      %242 = arith.mulf %241, %231 : vector<4x128xf32>
      %cst_96 = arith.constant dense<0.000000e+00> : vector<4xf32>
      %243 = vector.multi_reduction <add>, %242, %cst_96 [1] : vector<4x128xf32> to vector<4xf32>
      %244 = vector.shape_cast %243 : vector<4xf32> to vector<4x1xf32>
      %245 = arith.subf %237, %244 : vector<4x1xf32>
      %cst_97 = arith.constant dense<0.000000e+00> : vector<1xf32>
      %246 = vector.multi_reduction <add>, %245, %cst_97 [0] : vector<4x1xf32> to vector<1xf32>
      %247 = vector.shape_cast %246 : vector<1xf32> to vector<1x1xf32>
      %cst_98 = arith.constant 2.500000e-01 : f32
      %248 = vector.broadcast %cst_98 : f32 to vector<1x1xf32>
      %249 = arith.mulf %247, %248 : vector<1x1xf32>
      %250 = arith.mulf %176, %176 : vector<4x128xf32>
      %cst_99 = arith.constant dense<0.000000e+00> : vector<4xf32>
      %251 = vector.multi_reduction <add>, %250, %cst_99 [1] : vector<4x128xf32> to vector<4xf32>
      %252 = vector.shape_cast %251 : vector<4xf32> to vector<4x1xf32>
      %cst_100 = arith.constant 9.99999996E-13 : f32
      %253 = vector.broadcast %cst_100 : f32 to vector<4x1xf32>
      %254 = arith.addf %252, %253 : vector<4x1xf32>
      %255 = math.rsqrt %254 : vector<4x1xf32>
      %256 = vector.broadcast %255 : vector<4x1xf32> to vector<4x128xf32>
      %257 = arith.mulf %176, %256 : vector<4x128xf32>
      "tpu.trace_start"() <{level = 10 : i32, message = "ih,jh->ij"}> : () -> ()
      %cst_101 = arith.constant dense<0.000000e+00> : vector<4x4xf32>
      %258 = tpu.matmul %257, %257, %cst_101 {dimension_numbers = #tpu.dot_dimension_numbers<[1], [1], [0], [0], [0, 0, 1, 0], [], []>} : vector<4x128xf32>, vector<4x128xf32>, vector<4x4xf32> -> vector<4x4xf32>
      "tpu.trace_stop"() : () -> ()
      %cst_102 = arith.constant 3.33333325 : f32
      %259 = vector.broadcast %cst_102 : f32 to vector<4x4xf32>
      %260 = arith.mulf %258, %259 : vector<4x4xf32>
      %cst_103 = arith.constant dense<0xFF800000> : vector<4xf32>
      %261 = vector.multi_reduction <maximumf>, %260, %cst_103 [1] : vector<4x4xf32> to vector<4xf32>
      %262 = vector.shape_cast %261 : vector<4xf32> to vector<4x1xf32>
      %263 = vector.broadcast %262 : vector<4x1xf32> to vector<4x4xf32>
      %264 = arith.subf %260, %263 : vector<4x4xf32>
      %265 = tpu.iota {dimensions = array<i32: 0>} : vector<4x4xi32>
      %266 = tpu.iota {dimensions = array<i32: 1>} : vector<4x4xi32>
      %267 = arith.cmpi ne, %265, %266 : vector<4x4xi32>
      %268 = arith.extui %267 : vector<4x4xi1> to vector<4x4xi32>
      %269 = arith.sitofp %268 : vector<4x4xi32> to vector<4x4xf32>
      %270 = vector.broadcast %218 : vector<4x1xi32> to vector<4x4xi32>
      %271 = vector.broadcast %222 : vector<1x4xi32> to vector<4x4xi32>
      %272 = arith.cmpi eq, %270, %271 : vector<4x4xi32>
      %273 = arith.extui %272 : vector<4x4xi1> to vector<4x4xi32>
      %274 = arith.sitofp %273 : vector<4x4xi32> to vector<4x4xf32>
      %275 = arith.mulf %274, %269 : vector<4x4xf32>
      %276 = math.exp %264 : vector<4x4xf32>
      %277 = arith.mulf %276, %269 : vector<4x4xf32>
      %cst_104 = arith.constant dense<0.000000e+00> : vector<4xf32>
      %278 = vector.multi_reduction <add>, %277, %cst_104 [1] : vector<4x4xf32> to vector<4xf32>
      %279 = vector.shape_cast %278 : vector<4xf32> to vector<4x1xf32>
      %280 = math.log %279 : vector<4x1xf32>
      %281 = vector.broadcast %280 : vector<4x1xf32> to vector<4x4xf32>
      %282 = arith.subf %264, %281 : vector<4x4xf32>
      %cst_105 = arith.constant dense<0.000000e+00> : vector<4xf32>
      %283 = vector.multi_reduction <add>, %275, %cst_105 [1] : vector<4x4xf32> to vector<4xf32>
      %284 = vector.shape_cast %283 : vector<4xf32> to vector<4x1xf32>
      %cst_106 = arith.constant 1.000000e+00 : f32
      %285 = vector.broadcast %cst_106 : f32 to vector<4x1xf32>
      %286 = arith.maximumf %284, %285 : vector<4x1xf32>
      %287 = arith.mulf %275, %282 : vector<4x4xf32>
      %cst_107 = arith.constant dense<0.000000e+00> : vector<4xf32>
      %288 = vector.multi_reduction <add>, %287, %cst_107 [1] : vector<4x4xf32> to vector<4xf32>
      %289 = vector.shape_cast %288 : vector<4xf32> to vector<4x1xf32>
      %290 = tpu.reciprocal %286 {approx = true} : vector<4x1xf32> -> vector<4x1xf32>
      %291 = arith.mulf %289, %290 : vector<4x1xf32>
      %cst_108 = arith.constant dense<0.000000e+00> : vector<1xf32>
      %292 = vector.multi_reduction <add>, %291, %cst_108 [0] : vector<4x1xf32> to vector<1xf32>
      %293 = vector.shape_cast %292 : vector<1xf32> to vector<1x1xf32>
      %cst_109 = arith.constant 0.000000e+00 : f32
      %294 = vector.broadcast %cst_109 : f32 to vector<1x1xf32>
      %295 = arith.subf %294, %293 : vector<1x1xf32>
      %cst_110 = arith.constant 2.500000e-01 : f32
      %296 = vector.broadcast %cst_110 : f32 to vector<1x1xf32>
      %297 = arith.mulf %295, %296 : vector<1x1xf32>
      %cst_111 = arith.constant 1.000000e-01 : f32
      %298 = vector.broadcast %cst_111 : f32 to vector<1x1xf32>
      %299 = arith.mulf %298, %249 : vector<1x1xf32>
      %cst_112 = arith.constant 0.899999976 : f32
      %300 = vector.broadcast %cst_112 : f32 to vector<1x1xf32>
      %301 = arith.mulf %300, %297 : vector<1x1xf32>
      %302 = arith.addf %299, %301 : vector<1x1xf32>
      %303 = tpu.iota {dimensions = array<i32: 1>} : vector<1x128xi32>
      %c0_i32_113 = arith.constant 0 : i32
      %304 = vector.broadcast %c0_i32_113 : i32 to vector<1x128xi32>
      %305 = arith.cmpi eq, %303, %304 : vector<1x128xi32>
      %cst_114 = arith.constant 0.000000e+00 : f32
      %306 = vector.broadcast %cst_114 : f32 to vector<1x128xf32>
      %307 = vector.shape_cast %302 : vector<1x1xf32> to vector<1x1xf32>
      %308 = vector.broadcast %307 : vector<1x1xf32> to vector<1x128xf32>
      %309 = arith.select %305, %308, %306 : vector<1x128xi1>, vector<1x128xf32>
      %c1_i32_115 = arith.constant 1 : i32
      %310 = vector.broadcast %c1_i32_115 : i32 to vector<1x128xi32>
      %311 = arith.cmpi eq, %303, %310 : vector<1x128xi32>
      %312 = vector.shape_cast %249 : vector<1x1xf32> to vector<1x1xf32>
      %313 = vector.broadcast %312 : vector<1x1xf32> to vector<1x128xf32>
      %314 = arith.select %311, %313, %309 : vector<1x128xi1>, vector<1x128xf32>
      %c2_i32_116 = arith.constant 2 : i32
      %315 = vector.broadcast %c2_i32_116 : i32 to vector<1x128xi32>
      %316 = arith.cmpi eq, %303, %315 : vector<1x128xi32>
      %317 = vector.shape_cast %297 : vector<1x1xf32> to vector<1x1xf32>
      %318 = vector.broadcast %317 : vector<1x1xf32> to vector<1x128xf32>
      %319 = arith.select %316, %318, %314 : vector<1x128xi1>, vector<1x128xf32>
      %cst_117 = arith.constant 0.000000e+00 : f32
      %320 = vector.broadcast %cst_117 : f32 to vector<3x128xf32>
      %321 = tpu.concatenate %182, %319, %320 in 0 : vector<4x128xf32>, vector<1x128xf32>, vector<3x128xf32> -> vector<8x128xf32>
      %c0_118 = arith.constant 0 : index
      %c0_119 = arith.constant 0 : index
      %322 = vector.load %arg22[%c0_118, %c0_119] : memref<8x128xf32, #tpu.memory_space<vmem>>, vector<8x128xf32>
      tpu.vector_store %arg22[%c0_118, %c0_119], %321 {strides = array<i32>} : memref<8x128xf32, #tpu.memory_space<vmem>>, vector<8x128xf32>,
    } else {
    }
    return
  }
  func.func @transform_0(%arg0: i32, %arg1: memref<4xi32, #tpu.memory_space<smem>>) -> (i32, i32) {
    %c0_i32 = arith.constant 0 : i32
    %c0_i32_0 = arith.constant 0 : i32
    %c0_i32_1 = arith.constant 0 : i32
    return %c0_i32, %c0_i32_0 : i32, i32
  }
  func.func @transform_1(%arg0: i32, %arg1: memref<4xi32, #tpu.memory_space<smem>>) -> (i32, i32) {
    %c0_i32 = arith.constant 0 : i32
    %c0_i32_0 = arith.constant 0 : i32
    %c0_i32_1 = arith.constant 0 : i32
    return %c0_i32, %c0_i32_0 : i32, i32
  }
  func.func @transform_2(%arg0: i32, %arg1: memref<4xi32, #tpu.memory_space<smem>>) -> (i32, i32) {
    %c0_i32 = arith.constant 0 : i32
    %c0_i32_0 = arith.constant 0 : i32
    %c0_i32_1 = arith.constant 0 : i32
    return %c0_i32, %c0_i32_0 : i32, i32
  }
  func.func @transform_3(%arg0: i32, %arg1: memref<4xi32, #tpu.memory_space<smem>>) -> (i32, i32) {
    %c0_i32 = arith.constant 0 : i32
    %c0_i32_0 = arith.constant 0 : i32
    %c0_i32_1 = arith.constant 0 : i32
    return %c0_i32, %c0_i32_0 : i32, i32
  }
  func.func @transform_4(%arg0: i32, %arg1: memref<4xi32, #tpu.memory_space<smem>>) -> (i32, i32) {
    %c0_i32 = arith.constant 0 : i32
    %c0_i32_0 = arith.constant 0 : i32
    %c0_i32_1 = arith.constant 0 : i32
    return %c0_i32, %c0_i32_0 : i32, i32
  }
  func.func @transform_5(%arg0: i32, %arg1: memref<4xi32, #tpu.memory_space<smem>>) -> (i32, i32) {
    %c0_i32 = arith.constant 0 : i32
    %c0_i32_0 = arith.constant 0 : i32
    %c0_i32_1 = arith.constant 0 : i32
    return %c0_i32, %c0_i32_0 : i32, i32
  }
  func.func @transform_6(%arg0: i32, %arg1: memref<4xi32, #tpu.memory_space<smem>>) -> (i32, i32, i32) {
    %c0_i32 = arith.constant 0 : i32
    %c0_i32_0 = arith.constant 0 : i32
    %c0_i32_1 = arith.constant 0 : i32
    return %arg0, %c0_i32, %c0_i32_0 : i32, i32, i32
  }
  func.func @transform_7(%arg0: i32, %arg1: memref<4xi32, #tpu.memory_space<smem>>) -> (i32, i32, i32) {
    %c0_i32 = arith.constant 0 : i32
    %c0_i32_0 = arith.constant 0 : i32
    %c0_i32_1 = arith.constant 0 : i32
    return %arg0, %c0_i32, %c0_i32_0 : i32, i32, i32
  }
  func.func @transform_8(%arg0: i32, %arg1: memref<4xi32, #tpu.memory_space<smem>>) -> (i32, i32, i32) {
    %c0_i32 = arith.constant 0 : i32
    %c0_i32_0 = arith.constant 0 : i32
    %c0_i32_1 = arith.constant 0 : i32
    return %arg0, %c0_i32, %c0_i32_0 : i32, i32, i32
  }
  func.func @transform_9(%arg0: i32, %arg1: memref<4xi32, #tpu.memory_space<smem>>) -> (i32, i32, i32) {
    %c0_i32 = arith.constant 0 : i32
    %c0_i32_0 = arith.constant 0 : i32
    %c0_i32_1 = arith.constant 0 : i32
    return %arg0, %c0_i32, %c0_i32_0 : i32, i32, i32
  }
  func.func @transform_10(%arg0: i32, %arg1: memref<4xi32, #tpu.memory_space<smem>>) -> (i32, i32, i32) {
    %c0_i32 = arith.constant 0 : i32
    %c0_i32_0 = arith.constant 0 : i32
    %c0_i32_1 = arith.constant 0 : i32
    return %arg0, %c0_i32, %c0_i32_0 : i32, i32, i32
  }
  func.func @transform_11(%arg0: i32, %arg1: memref<4xi32, #tpu.memory_space<smem>>) -> (i32, i32, i32) {
    %c0_i32 = arith.constant 0 : i32
    %c0_i32_0 = arith.constant 0 : i32
    %c0_i32_1 = arith.constant 0 : i32
    return %arg0, %c0_i32, %c0_i32_0 : i32, i32, i32
  }
  func.func @transform_12(%arg0: i32, %arg1: memref<4xi32, #tpu.memory_space<smem>>) -> (i32, i32, i32) {
    %c0_i32 = arith.constant 0 : i32
    %c0_i32_0 = arith.constant 0 : i32
    %c0_i32_1 = arith.constant 0 : i32
    return %arg0, %c0_i32, %c0_i32_0 : i32, i32, i32
  }
  func.func @transform_13(%arg0: i32, %arg1: memref<4xi32, #tpu.memory_space<smem>>) -> (i32, i32, i32) {
    %c0_i32 = arith.constant 0 : i32
    %c0_i32_0 = arith.constant 0 : i32
    %c0_i32_1 = arith.constant 0 : i32
    return %arg0, %c0_i32, %c0_i32_0 : i32, i32, i32
  }
  func.func @transform_14(%arg0: i32, %arg1: memref<4xi32, #tpu.memory_space<smem>>) -> (i32, i32, i32) {
    %c0_i32 = arith.constant 0 : i32
    %c0_i32_0 = arith.constant 0 : i32
    %c0_i32_1 = arith.constant 0 : i32
    return %arg0, %c0_i32, %c0_i32_0 : i32, i32, i32
  }
  func.func @transform_15(%arg0: i32, %arg1: memref<4xi32, #tpu.memory_space<smem>>) -> (i32, i32, i32) {
    %c0_i32 = arith.constant 0 : i32
    %c0_i32_0 = arith.constant 0 : i32
    %c0_i32_1 = arith.constant 0 : i32
    return %arg0, %c0_i32, %c0_i32_0 : i32, i32, i32
  }
  func.func @transform_16(%arg0: i32, %arg1: memref<4xi32, #tpu.memory_space<smem>>) -> (i32, i32, i32) {
    %c0_i32 = arith.constant 0 : i32
    %c0_i32_0 = arith.constant 0 : i32
    %c0_i32_1 = arith.constant 0 : i32
    return %arg0, %c0_i32, %c0_i32_0 : i32, i32, i32
  }
  func.func @transform_17(%arg0: i32, %arg1: memref<4xi32, #tpu.memory_space<smem>>) -> (i32, i32, i32) {
    %c0_i32 = arith.constant 0 : i32
    %c0_i32_0 = arith.constant 0 : i32
    %c0_i32_1 = arith.constant 0 : i32
    return %arg0, %c0_i32, %c0_i32_0 : i32, i32, i32
  }
  func.func @transform_18(%arg0: i32, %arg1: memref<4xi32, #tpu.memory_space<smem>>) -> (i32, i32) {
    %c0_i32 = arith.constant 0 : i32
    %c0_i32_0 = arith.constant 0 : i32
    %c0_i32_1 = arith.constant 0 : i32
    return %c0_i32, %c0_i32_0 : i32, i32
  }
  func.func @transform_19(%arg0: i32, %arg1: memref<4xi32, #tpu.memory_space<smem>>) -> (i32, i32) {
    %c0_i32 = arith.constant 0 : i32
    %c0_i32_0 = arith.constant 0 : i32
    %c0_i32_1 = arith.constant 0 : i32
    return %c0_i32, %c0_i32_0 : i32, i32
  }
  func.func @transform_20(%arg0: i32, %arg1: memref<4xi32, #tpu.memory_space<smem>>) -> (i32, i32) {
    %c0_i32 = arith.constant 0 : i32
    %c0_i32_0 = arith.constant 0 : i32
    %c0_i32_1 = arith.constant 0 : i32
    return %c0_i32, %c0_i32_0 : i32, i32
  }
}

</mosaic_0001>

<bundles_post_ra>
// kernel: tpu_custom_call.1
= control target key start
LH: loop header
LB: loop body
LE: loop exit
PB: predicated region body
PF: predicated region fallthrough
CT: control target
= control target key end

     0   :  { %s8021_s0 = inlined_call_operand.vmem [shape: s32[4], index: 0, kind: input, shape index: {}]   ;;  %s8022_s1 = inlined_call_operand.vmem [shape: s32[64,1], index: 1, kind: input, shape index: {}]   ;;  %s8023_s2 = inlined_call_operand.hbm [shape: f32[4,16], index: 2, kind: input, shape index: {}]   ;;  %s8024_s3 = inlined_call_operand.vmem [shape: bf16[64,128], index: 3, kind: input, shape index: {}]   ;;  %s8025_s4 = inlined_call_operand.vmem [shape: f32[16,128], index: 4, kind: input, shape index: {}]   ;;  %s8026_s5 = inlined_call_operand.hbm [shape: f32[1,128], index: 5, kind: input, shape index: {}]   ;;  %s8027_s6 = inlined_call_operand.hbm [shape: f32[1,128], index: 6, kind: input, shape index: {}]   ;;  %s8028_s7 = inlined_call_operand.hbm [shape: bf16[2,128,384], index: 7, kind: input, shape index: {}]   ;;  %s8029_s8 = inlined_call_operand.vmem [shape: f32[2,1,384], index: 8, kind: input, shape index: {}]   ;;  %s8030_s9 = inlined_call_operand.hbm [shape: bf16[2,128,128], index: 9, kind: input, shape index: {}]   ;;  %s8031_s10 = inlined_call_operand.vmem [shape: f32[2,1,128], index: 10, kind: input, shape index: {}]   ;;  %s8032_s11 = inlined_call_operand.hbm [shape: f32[2,1,128], index: 11, kind: input, shape index: {}]   ;;  %s8033_s12 = inlined_call_operand.hbm [shape: f32[2,1,128], index: 12, kind: input, shape index: {}]   ;;  %s8034_s13 = inlined_call_operand.hbm [shape: bf16[2,128,512], index: 13, kind: input, shape index: {}]   ;;  %s8035_s14 = inlined_call_operand.vmem [shape: f32[2,1,512], index: 14, kind: input, shape index: {}]   ;;  %s8036_s15 = inlined_call_operand.hbm [shape: bf16[2,512,128], index: 15, kind: input, shape index: {}]   ;;  %s8037_s16 = inlined_call_operand.hbm [shape: f32[2,1,128], index: 16, kind: input, shape index: {}]   ;;  %s8038_s17 = inlined_call_operand.hbm [shape: f32[2,1,128], index: 17, kind: input, shape index: {}]   ;;  %s8039_s18 = inlined_call_operand.vmem [shape: f32[2,1,128], index: 18, kind: input, shape index: {}]   ;;  %s8040_s19 = inlined_call_operand.vmem [shape: bf16[128,128], index: 19, kind: input, shape index: {}]   ;;  %s8041_s20 = inlined_call_operand.vmem [shape: f32[1,128], index: 20, kind: input, shape index: {}]   ;;  %s8042_s21 = inlined_call_operand.hbm [shape: f32[8,128], index: 21, kind: output, shape index: {}]  }
   0x1   :  { %8107 = sst [smem:[#allocation71_spill]] %s8021_s0 }
   0x2   :  { %8108 = sst [smem:[#allocation72_spill]] %s8022_s1  ;;  %s8125_s26 = sld [smem:[#allocation71_spill]] }
   0x3   :  { %8109 = sst [smem:[#allocation73_spill]] %s8023_s2 }
   0x4   :  { %8110 = sst [smem:[#allocation74_spill]] %s8024_s3 }
   0x5   :  { %8111 = sst [smem:[#allocation75_spill]] %s8025_s4 }
   0x6   :  { %8112 = sst [smem:[#allocation76_spill]] %s8026_s5 }
   0x7   :  { %8113 = sst [smem:[#allocation77_spill]] %s8027_s6 }
   0x8   :  { %8114 = sst [smem:[#allocation78_spill]] %s8028_s7 }
   0x9   :  { %8115 = sst [smem:[#allocation79_spill]] %s8029_s8 }
   0xa   :  { %8116 = sst [smem:[#allocation80_spill]] %s8030_s9 }
   0xb   :  { %8117 = sst [smem:[#allocation81_spill]] %s8031_s10 }
   0xc   :  { %8118 = sst [smem:[#allocation82_spill]] %s8032_s11 }
   0xd   :  { %8119 = sst [smem:[#allocation83_spill]] %s8034_s13 }
   0xe   :  { %8120 = sst [smem:[#allocation84_spill]] %s8035_s14  ;;  %s26_s14 = sshll.u32 %s8125_s26, 4  ;;  %s27_s14 = int_to_ptr.vmem [resolvable:$true] %s26_s14 }
   0xf   :  { %8121 = sst [smem:[#allocation85_spill]] %s8039_s18  ;;  %s5751_s27 = scalar_lea.vmem %s27_s14, 16 }
  0x10   :  { %8122 = sst [smem:[#allocation86_spill]] %s8040_s19  ;;  %p5752_p0 = scmp.ne.s32.totalorder %s27_s14, %s5751_s27 }
  0x11   :  { %8123 = sst [smem:[#allocation87_spill]] %s8041_s20  ;;  %p5756_p1 = scmp.lt.s32.totalorder %s27_s14, %s27_s14 }
  0x12   :  { %8124 = sst [smem:[#allocation88_spill]] %s8042_s21  ;;  %p5757_p2 = scmp.lt.s32.totalorder %s5751_s27, %s5751_s27 }
  0x14   :  { %p5758_p3 = por %p5757_p2, %p5756_p1 }
  0x16   :  { %p5759_p4 = pnand %p5758_p3, %p5752_p0 }
  0x18   :  { %5762 = shalt.err (!%p5759_p4)  }
  0x19   :  { %s6175_s3 = smov [#allocation4]  }
  0x1a   :  { %29 = dma.vmem_to_smem %s27_s14, 16, %s6175_s3, [#allocation3] }
  0x1b   :  { %6129 = dma.done.wait [#allocation3], 16 }
  0x1c   :  { %6130 = vsyncadd [#allocation3], 4294967280 }
  0x1d   :  { %31 = sfence }
  0x1e   :  { %32 = vsyncpa [#allocation6], 0 }
  0x1f   :  { %33 = vsyncpa [#allocation9], 0 }
  0x20   :  { %34 = vsyncpa [#allocation12], 0 }
  0x21   :  { %36 = vsyncpa [#allocation12 + $0x1], 0 }
  0x22   :  { %37 = vsyncpa [#allocation15], 0 }
  0x23   :  { %39 = vsyncpa [#allocation15 + $0x1], 0 }
  0x24   :  { %40 = vsyncpa [#allocation18], 0 }
  0x25   :  { %42 = vsyncpa [#allocation18 + $0x1], 0 }
  0x26   :  { %43 = vsyncpa [#allocation21], 0 }
  0x27   :  { %45 = vsyncpa [#allocation21 + $0x1], 0 }
  0x28   :  { %46 = vsyncpa [#allocation7], 0  ;;  %s6315_s28 = smov 0   ;;  %s6317_s29 = smov 0  }
  0x29   :  { %s6319_s0 = smov 0   ;;  %s6321_s14 = smov 0  }
  0x2a LB: > { %8126 = sst [smem:[#allocation32_spill]] %s6165_s29  ;;  %s6334_s4 = sadd.s32 4294967295, %s6173_s14   ;;  %s6173_s14 = sphi %s6321_s14, %s8254_s14   ;;  %s6169_s0 = sphi %s6319_s0, %s8257_s0   ;;  %s6165_s29 = sphi %s6317_s29, %s8256_s29   ;;  %s6161_s28 = sphi %s6315_s28, %s8255_s28  }
  0x2b   : > { %8127 = sst [smem:[#allocation33_spill]] %s6169_s0  ;;  %s6337_s30 = sadd.s32 1, %s6173_s14  }
  0x2c   : > { %8128 = sst [smem:[#allocation34_spill]] %s6337_s30  ;;  %s182_s5 = ssub.s32 %s6173_s14, %s6337_s30 }
  0x2d   : > { %s185_s22 = sadd.s32 1, %s6169_s0  ;;  %p183_p5 = scmp.eq.s32.totalorder %s182_s5, 0 }
  0x2e   : > { %p192_p6 = scmp.ne.s32.totalorder %s6169_s0, %s6165_s29  ;;  %p193_p7 = scmp.eq.s32.totalorder %s6173_s14, 0 }
  0x2f   : > { %p198_p8 = scmp.ne.s32.totalorder %s6165_s29, %s6161_s28  ;;  %p8053_p10 = scmp.eq.s32.totalorder %s6334_s4, 0 }
  0x30   : > { %s6347_s23 = scalar_select %p183_p5, %s6169_s0, %s185_s22  }
  0x31   : > { %p6349_p9 = por %p193_p7, %p192_p6  ;;  %p4683_p11 = scmp.ge.s32.totalorder %s6173_s14, 1 }
  0x32   : > { %8129 = sst [smem:[#allocation35_spill]] %s6347_s23  ;;  %p558_p12 = scmp.lt.s32.totalorder %s6173_s14, 3 }
  0x33   : > { %p6358_p13 = por %p8053_p10, %p198_p8  ;;  %s6176_s25 = smov [#allocation8]  }
  0x34   : > { %p6363_p1 = pnand %p4683_p11, %p558_p12  ;;  %s591_s26 = sshll.u32 %s6176_s25, 4  ;;  %s592_s26 = int_to_ptr.vmem [resolvable:$true] %s591_s26 }
  0x35   : > { %s8131_s24 = scalar_select %p6358_p13, 1, 0 }
  0x36   : > { %s8133_s2 = scalar_select %p6363_p1, 1, 0 }
  0x37   : > { %8132 = sst [smem:[#allocation36_spill]] %s8131_s24  ;;  %p5326_p2 = pneg %p6363_p1 }
  0x38   : > { %p5364_p3 = scmp.lt.s32.totalorder %s6173_s14, 2  ;;  %s6371_s27 = sand.u32 1, %s6173_s14  }
  0x39   : > { %p6375_p4 = pnand %p5326_p2, %p8053_p10  ;;  %s6386_s5 = sand.u32 1, %s6169_s0  }
  0x3a   : > { %p6381_p5 = pnand %p5364_p3, %p6349_p9  ;;  %s5290_s22 = smul.u32 192, %s6386_s5 }
  0x3b   : > { %s8134_s3 = scalar_select %p6375_p4, 1, 0 }
  0x3c   : > { %s8135_s28 = scalar_select %p6381_p5, 1, 0 }
  0x3d   : > { %s8136_s30 = sld [smem:[#allocation76_spill]]  ;;  %p6397_p7 = pneg %p6375_p4 }
  0x3f   : > { %s8137_s1 = scalar_select %p6397_p7, 1, 0 }
  0x43   : > { %s5763_s21 = scalar_lea.hbm %s8136_s30, 16 }
  0x44   : > { %p5764_p6 = scmp.ne.s32.totalorder %s8136_s30, %s5763_s21  ;;  %p5770_p11 = scmp.lt.u32.totalorder %s5763_s21, %s8136_s30 }
  0x46   : > { %p5766_p8 = pnand %p6397_p7, %p5764_p6 }
  0x48   : > { %p5767_p9 = pneg %p5766_p8 }
  0x4a   : > { %p5772_p12 = pnand %p5770_p11, %p5767_p9 }
  0x4c   : > { %5775 = shalt.err (!%p5772_p12)
}
  0x4d   : > { %s5776_s23 = scalar_lea.vmem %s592_s26, 16  ;;  %s5783_s19 = scalar_lea.vmem %s592_s26, 32 }
  0x4e   : > { %p5777_p2 = scmp.ne.s32.totalorder %s592_s26, %s5776_s23  ;;  %p5784_p10 = scmp.lt.s32.totalorder %s592_s26, %s592_s26 }
  0x4f   : > { %p5785_p13 = scmp.lt.s32.totalorder %s5783_s19, %s5776_s23 }
  0x50   : > { %p5779_p3 = pnand %p5777_p2, %p6397_p7 }
  0x51   : > { %p5786_p1 = por %p5785_p13, %p5784_p10 }
  0x52   : > { %p5780_p0 = pneg %p5779_p3 }
  0x54   : > { %p5787_p5 = pnand %p5786_p1, %p5780_p0 }
  0x56   : > { %5790 = shalt.err (!%p5787_p5)
}
  0x57   : > { %5332 = dma.hbm_to_vmem [thread:$0]  (!%p6375_p4), %s8136_s30, 16, %s592_s26, [#allocation9]  }
  0x58   : > { %s5291_s8 = smul.u32 3072, %s6173_s14  ;;  %s623_s21 = scalar_lea.vmem [#allocation11], %s5290_s22 }
  0x59   : > { %s630_s0 = sshll.u32 %s623_s21, 4  ;;  %s8138_s7 = sld [smem:[#allocation78_spill]]  ;;  %s6414_s0 = int_to_ptr.vmem [resolvable:$true] %s630_s0 }
  0x5a   : > { %s8064_s19 = scalar_lea.sflag [#allocation12], %s6371_s27  ;;  %p8139_p13 = scmp.ne.s32.totalorder %s8135_s28, 0 }
  0x5c   : > { %p6426_p0 = pneg %p8139_p13 }
  0x5e   : > { %s8140_s26 = scalar_select %p6426_p0, 1, 0 }
  0x5f   : > { %s6419_s23 = scalar_lea.hbm %s8138_s7, %s5291_s8  ;;  %s5796_s18 = scalar_lea.hbm %s8138_s7, 6144 }
  0x60   : > { %s5791_s20 = scalar_lea.hbm %s6419_s23, 3072  ;;  %p5797_p6 = scmp.lt.u32.totalorder %s6419_s23, %s8138_s7 }
  0x61   : > { %p5792_p10 = scmp.ne.s32.totalorder %s6419_s23, %s5791_s20  ;;  %p5798_p8 = scmp.lt.u32.totalorder %s5796_s18, %s5791_s20 }
  0x62   : > { %p5800_p11 = scmp.lt.u32.totalorder %s5791_s20, %s6419_s23 }
  0x63   : > { %p5794_p1 = pnand %p6426_p0, %p5792_p10  ;;  %p5799_p9 = por %p5798_p8, %p5797_p6 }
  0x65   : > { %p5795_p5 = pneg %p5794_p1  ;;  %p5801_p12 = por %p5800_p11, %p5799_p9 }
  0x67   : > { %p5802_p2 = pnand %p5801_p12, %p5795_p5 }
  0x69   : > { %5805 = shalt.err (!%p5802_p2)
}
  0x6a   : > { %s5806_s21 = scalar_lea.vmem %s6414_s0, 3072  ;;  %s6177_s22 = smov [#allocation11]  }
  0x6b   : > { %p5807_p3 = scmp.ne.s32.totalorder %s6414_s0, %s5806_s21  ;;  %s5811_s10 = sshll.u32 %s6177_s22, 4  ;;  %s5812_s10 = int_to_ptr.vmem [resolvable:$false] %s5811_s10 }
  0x6c   : > { %s5813_s25 = scalar_lea.vmem %s5812_s10, 6144  ;;  %p5814_p4 = scmp.lt.s32.totalorder %s6414_s0, %s5812_s10 }
  0x6d   : > { %p5809_p10 = pnand %p5807_p3, %p6426_p0  ;;  %p5815_p7 = scmp.lt.s32.totalorder %s5813_s25, %s5806_s21 }
  0x6f   : > { %p5810_p1 = pneg %p5809_p10  ;;  %p5816_p6 = por %p5815_p7, %p5814_p4 }
  0x71   : > { %p5817_p8 = pnand %p5816_p6, %p5810_p1 }
  0x73   : > { %5820 = shalt.err (!%p5817_p8)
}
  0x74   : > { %s6178_s20 = smov 192   ;;  %s6179_s18 = smov 12  }
  0x75   : > { %5339 = dma.hbm_to_vmem [thread:$0]  (!%p8139_p13), %s6419_s23, 3072, %s6414_s0, %s8064_s19, %s6178_s20, %s6178_s20, %s6179_s18  }
  0x76   : > { %s6452_s8 = sshll.u32 %s6173_s14, 4  ;;  %s677_s21 = scalar_lea.vmem [#allocation14], %s6386_s5 }
  0x77   : > { %s684_s22 = sshll.u32 %s677_s21, 4  ;;  %s8141_s11 = sld [smem:[#allocation82_spill]]  ;;  %s685_s22 = int_to_ptr.vmem [resolvable:$true] %s684_s22 }
  0x78   : > { %s8066_s30 = scalar_lea.sflag [#allocation15], %s6371_s27 }
  0x7d   : > { %s6459_s7 = scalar_lea.hbm %s8141_s11, %s6452_s8  ;;  %s5826_s20 = scalar_lea.hbm %s8141_s11, 32 }
  0x7e   : > { %s5821_s24 = scalar_lea.hbm %s6459_s7, 16  ;;  %p5827_p9 = scmp.lt.u32.totalorder %s6459_s7, %s8141_s11 }
  0x7f   : > { %p5822_p4 = scmp.ne.s32.totalorder %s6459_s7, %s5821_s24  ;;  %p5828_p11 = scmp.lt.u32.totalorder %s5826_s20, %s5821_s24 }
  0x80   : > { %p5830_p2 = scmp.lt.u32.totalorder %s5821_s24, %s6459_s7 }
  0x81   : > { %p5824_p7 = pnand %p5822_p4, %p6426_p0  ;;  %p5829_p12 = por %p5828_p11, %p5827_p9 }
  0x83   : > { %p5825_p5 = pneg %p5824_p7  ;;  %p5831_p3 = por %p5830_p2, %p5829_p12 }
  0x85   : > { %p5832_p10 = pnand %p5831_p3, %p5825_p5 }
  0x87   : > { %5835 = shalt.err (!%p5832_p10)
}
  0x88   : > { %s5836_s10 = scalar_lea.vmem %s685_s22, 16  ;;  %s6180_s25 = smov [#allocation14]  }
  0x89   : > { %p5837_p1 = scmp.ne.s32.totalorder %s685_s22, %s5836_s10  ;;  %s5841_s19 = sshll.u32 %s6180_s25, 4  ;;  %s5842_s19 = int_to_ptr.vmem [resolvable:$false] %s5841_s19 }
  0x8a   : > { %s5843_s0 = scalar_lea.vmem %s5842_s19, 32  ;;  %p5844_p4 = scmp.lt.s32.totalorder %s685_s22, %s5842_s19 }
  0x8b   : > { %p5839_p6 = pnand %p5837_p1, %p6426_p0  ;;  %p5845_p7 = scmp.lt.s32.totalorder %s5843_s0, %s5836_s10 }
  0x8d   : > { %p5840_p8 = pneg %p5839_p6  ;;  %p5846_p13 = por %p5845_p7, %p5844_p4 }
  0x8f   : > { %p5847_p9 = pnand %p5846_p13, %p5840_p8 }
  0x91   : > { %5850 = shalt.err (!%p5847_p9)
}
  0x92   : > { %p8142_p11 = scmp.ne.s32.totalorder %s8135_s28, 0  ;;  %s4694_s24 = sshll.u32 %s6386_s5, 8 }
  0x93   : > { %s4908_s23 = sshll.u32 %s6173_s14, 12  ;;  %s8143_s13 = sld [smem:[#allocation83_spill]] }
  0x94   : > { %5345 = dma.hbm_to_vmem [thread:$0]  (!%p8142_p11), %s6459_s7, 16, %s685_s22, %s8066_s30  }
  0x95   : > { %s712_s21 = scalar_lea.vmem [#allocation17], %s4694_s24  ;;  %s8068_s25 = scalar_lea.sflag [#allocation18], %s6371_s27 }
  0x96   : > { %s719_s10 = sshll.u32 %s712_s21, 4  ;;  %s6492_s10 = int_to_ptr.vmem [resolvable:$true] %s719_s10 }
  0x99   : > { %s6488_s18 = scalar_lea.hbm %s8143_s13, %s4908_s23  ;;  %s5856_s19 = scalar_lea.hbm %s8143_s13, 8192 }
  0x9a   : > { %s5851_s0 = scalar_lea.hbm %s6488_s18, 4096  ;;  %p5857_p2 = scmp.lt.u32.totalorder %s6488_s18, %s8143_s13 }
  0x9b   : > { %p5852_p13 = scmp.ne.s32.totalorder %s6488_s18, %s5851_s0  ;;  %p5858_p3 = scmp.lt.u32.totalorder %s5856_s19, %s5851_s0 }
  0x9c   : > { %p5860_p1 = scmp.lt.u32.totalorder %s5851_s0, %s6488_s18 }
  0x9d   : > { %p5854_p5 = pnand %p5852_p13, %p6426_p0  ;;  %p5859_p10 = por %p5858_p3, %p5857_p2 }
  0x9f   : > { %p5855_p12 = pneg %p5854_p5  ;;  %p5861_p6 = por %p5860_p1, %p5859_p10 }
  0xa1   : > { %p5862_p8 = pnand %p5861_p6, %p5855_p12 }
  0xa3   : > { %5865 = shalt.err (!%p5862_p8)
}
  0xa4   : > { %s5866_s21 = scalar_lea.vmem %s6492_s10, 4096  ;;  %s6181_s7 = smov [#allocation17]  }
  0xa5   : > { %p5867_p4 = scmp.ne.s32.totalorder %s6492_s10, %s5866_s21  ;;  %s5871_s22 = sshll.u32 %s6181_s7, 4  ;;  %s5872_s22 = int_to_ptr.vmem [resolvable:$false] %s5871_s22 }
  0xa6   : > { %s5873_s30 = scalar_lea.vmem %s5872_s22, 8192  ;;  %p5874_p13 = scmp.lt.s32.totalorder %s6492_s10, %s5872_s22 }
  0xa7   : > { %p5869_p7 = pnand %p5867_p4, %p6426_p0  ;;  %p5875_p5 = scmp.lt.s32.totalorder %s5873_s30, %s5866_s21 }
  0xa9   : > { %p5870_p9 = pneg %p5869_p7  ;;  %p5876_p2 = por %p5875_p5, %p5874_p13 }
  0xab   : > { %p5877_p3 = pnand %p5876_p2, %p5870_p9 }
  0xad   : > { %5880 = shalt.err (!%p5877_p3)
}
  0xae   : > { %s6182_s0 = smov 256   ;;  %s6183_s19 = smov 16  }
  0xaf   : > { %5351 = dma.hbm_to_vmem [thread:$0]  (!%p8142_p11), %s6488_s18, 4096, %s6492_s10, %s8068_s25, %s6182_s0, %s6182_s0, %s6183_s19  }
  0xb0   : > { %s6523_s7 = scalar_lea.hbm %s8036_s15, %s4908_s23  ;;  %s740_s22 = scalar_lea.vmem [#allocation19], %s4694_s24 }
  0xb1   : > { %s747_s30 = sshll.u32 %s740_s22, 4  ;;  %s6533_s29 = scalar_lea.hbm %s8037_s16, %s6452_s8  ;;  %s6527_s30 = int_to_ptr.vmem [resolvable:$true] %s747_s30 }
  0xb2   : > { %s760_s18 = scalar_lea.vmem [#allocation20], %s6386_s5  ;;  %s6184_s23 = smov [#allocation5]  }
  0xb3   : > { %s767_s10 = sshll.u32 %s760_s18, 4  ;;  %s6538_s0 = sshll.u32 %s6184_s23, 4  ;;  %s6536_s10 = int_to_ptr.vmem [resolvable:$true] %s767_s10  ;;  %s575_s0 = int_to_ptr.vmem [resolvable:$true] %s6538_s0 }
  0xb4   : > { %s8070_s24 = scalar_lea.sflag [#allocation21], %s6371_s27  ;;  %s5881_s19 = scalar_lea.hbm %s6533_s29, 16 }
  0xb5   : > { %p5882_p12 = scmp.ne.s32.totalorder %s6533_s29, %s5881_s19  ;;  %s5886_s20 = scalar_lea.hbm %s8037_s16, 32 }
  0xb6   : > { %p5887_p6 = scmp.lt.u32.totalorder %s6533_s29, %s8037_s16  ;;  %p5888_p8 = scmp.lt.u32.totalorder %s5886_s20, %s5881_s19 }
  0xb7   : > { %p5884_p10 = pnand %p5882_p12, %p6426_p0  ;;  %p5890_p7 = scmp.lt.u32.totalorder %s5881_s19, %s6533_s29 }
  0xb8   : > { %p5889_p4 = por %p5888_p8, %p5887_p6 }
  0xb9   : > { %p5885_p1 = pneg %p5884_p10 }
  0xba   : > { %p5891_p9 = por %p5890_p7, %p5889_p4 }
  0xbc   : > { %p5892_p13 = pnand %p5891_p9, %p5885_p1 }
  0xbe   : > { %5895 = shalt.err (!%p5892_p13)
}
  0xbf   : > { %s5896_s18 = scalar_lea.vmem %s6536_s10, 16  ;;  %s6185_s23 = smov [#allocation20]  }
  0xc0   : > { %p5897_p5 = scmp.ne.s32.totalorder %s6536_s10, %s5896_s18  ;;  %s5901_s11 = sshll.u32 %s6185_s23, 4  ;;  %s5902_s11 = int_to_ptr.vmem [resolvable:$false] %s5901_s11 }
  0xc1   : > { %s5903_s13 = scalar_lea.vmem %s5902_s11, 32  ;;  %p5904_p12 = scmp.lt.s32.totalorder %s6536_s10, %s5902_s11 }
  0xc2   : > { %p5899_p2 = pnand %p5897_p5, %p6426_p0  ;;  %p5905_p10 = scmp.lt.s32.totalorder %s5903_s13, %s5896_s18 }
  0xc4   : > { %p5900_p3 = pneg %p5899_p2  ;;  %p5906_p6 = por %p5905_p10, %p5904_p12 }
  0xc6   : > { %p5907_p8 = pnand %p5906_p6, %p5900_p3 }
  0xc8   : > { %5910 = shalt.err (!%p5907_p8)
}
  0xc9   : > { %5357 = dma.hbm_to_vmem [thread:$0]  (!%p8142_p11), %s6533_s29, 16, %s6536_s10, %s8070_s24  }
  0xca   : > { %s8144_s21 = sld [smem:[#allocation73_spill]]  ;;  %p8145_p4 = scmp.ne.s32.totalorder %s8137_s1, 0 }
  0xd0   : > { %s5911_s22 = scalar_lea.hbm %s8144_s21, 64 }
  0xd1   : > { %p5912_p1 = scmp.ne.s32.totalorder %s8144_s21, %s5911_s22  ;;  %p5918_p13 = scmp.lt.u32.totalorder %s5911_s22, %s8144_s21 }
  0xd3   : > { %p5914_p7 = pnand %p5912_p1, %p8145_p4 }
  0xd5   : > { %p5915_p9 = pneg %p5914_p7 }
  0xd7   : > { %p5920_p5 = pnand %p5918_p13, %p5915_p9 }
  0xd9   : > { %5923 = shalt.err (!%p5920_p5)
}
  0xda   : > { %s5924_s25 = scalar_lea.vmem %s575_s0, 64  ;;  %p5932_p10 = scmp.lt.s32.totalorder %s575_s0, %s575_s0 }
  0xdb   : > { %p5925_p2 = scmp.ne.s32.totalorder %s575_s0, %s5924_s25  ;;  %p5933_p6 = scmp.lt.s32.totalorder %s5924_s25, %s5924_s25 }
  0xdd   : > { %p5927_p3 = pnand %p5925_p2, %p8145_p4  ;;  %p5934_p8 = por %p5933_p6, %p5932_p10 }
  0xdf   : > { %p5928_p12 = pneg %p5927_p3 }
  0xe1   : > { %p5935_p11 = pnand %p5934_p8, %p5928_p12 }
  0xe3   : > { %5938 = shalt.err (!%p5935_p11)
}
  0xe4   : > { %p8146_p1 = scmp.ne.s32.totalorder %s8134_s3, 0  ;;  %s6186_s19 = smov [#allocation10]  }
  0xe5   : > { %s602_s20 = sshll.u32 %s6186_s19, 4  ;;  %s4689_s22 = sshll.u32 %s6386_s5, 6  ;;  %s603_s20 = int_to_ptr.vmem [resolvable:$true] %s602_s20 }
  0xe6   : > { %5329 = dma.hbm_to_vmem [thread:$0]  (!%p8146_p1), %s8144_s21, 64, %s575_s0, [#allocation6]  }
  0xe7   : > { %s8147_s6 = sld [smem:[#allocation77_spill]] }
  0xed   : > { %s5939_s18 = scalar_lea.hbm %s8147_s6, 16 }
  0xee   : > { %p5940_p11 = scmp.ne.s32.totalorder %s8147_s6, %s5939_s18  ;;  %p5946_p13 = scmp.lt.u32.totalorder %s5939_s18, %s8147_s6 }
  0xf0   : > { %p5942_p7 = pnand %p5940_p11, %p8145_p4 }
  0xf2   : > { %p5943_p9 = pneg %p5942_p7 }
  0xf4   : > { %p5948_p5 = pnand %p5946_p13, %p5943_p9 }
  0xf6   : > { %5951 = shalt.err (!%p5948_p5)
}
  0xf7   : > { %s5952_s0 = scalar_lea.vmem %s603_s20, 16  ;;  %s5959_s10 = scalar_lea.vmem %s603_s20, 32 }
  0xf8   : > { %p5953_p2 = scmp.ne.s32.totalorder %s603_s20, %s5952_s0  ;;  %p5960_p10 = scmp.lt.s32.totalorder %s603_s20, %s603_s20 }
  0xf9   : > { %p5961_p6 = scmp.lt.s32.totalorder %s5959_s10, %s5952_s0 }
  0xfa   : > { %p5955_p3 = pnand %p5953_p2, %p8145_p4 }
  0xfb   : > { %p5962_p8 = por %p5961_p6, %p5960_p10 }
  0xfc   : > { %p5956_p12 = pneg %p5955_p3 }
  0xfe   : > { %p5963_p0 = pnand %p5962_p8, %p5956_p12 }
 0x100   : > { %5966 = shalt.err (!%p5963_p0)
}
 0x101   : > { %5335 = dma.hbm_to_vmem [thread:$0]  (!%p8146_p1), %s8147_s6, 16, %s603_s20, [#allocation9]  }
 0x102   : > { %s4907_s24 = sshll.u32 %s6173_s14, 10  ;;  %s651_s11 = scalar_lea.vmem [#allocation13], %s4689_s22 }
 0x103   : > { %s658_s18 = sshll.u32 %s651_s11, 4  ;;  %s8148_s9 = sld [smem:[#allocation80_spill]]  ;;  %s6608_s18 = int_to_ptr.vmem [resolvable:$true] %s658_s18 }
 0x104   : > { %p8149_p4 = scmp.ne.s32.totalorder %s8140_s26, 0 }
 0x109   : > { %s6606_s13 = scalar_lea.hbm %s8148_s9, %s4907_s24  ;;  %s5972_s22 = scalar_lea.hbm %s8148_s9, 2048 }
 0x10a   : > { %s5967_s3 = scalar_lea.hbm %s6606_s13, 1024  ;;  %p5973_p1 = scmp.lt.u32.totalorder %s6606_s13, %s8148_s9 }
 0x10b   : > { %p5968_p0 = scmp.ne.s32.totalorder %s6606_s13, %s5967_s3  ;;  %p5974_p9 = scmp.lt.u32.totalorder %s5972_s22, %s5967_s3 }
 0x10c   : > { %p5976_p5 = scmp.lt.u32.totalorder %s5967_s3, %s6606_s13 }
 0x10d   : > { %p5970_p11 = pnand %p5968_p0, %p8149_p4  ;;  %p5975_p13 = por %p5974_p9, %p5973_p1 }
 0x10f   : > { %p5971_p7 = pneg %p5970_p11  ;;  %p5977_p2 = por %p5976_p5, %p5975_p13 }
 0x111   : > { %p5978_p3 = pnand %p5977_p2, %p5971_p7 }
 0x113   : > { %5981 = shalt.err (!%p5978_p3)
}
 0x114   : > { %s5982_s10 = scalar_lea.vmem %s6608_s18, 1024  ;;  %s6187_s19 = smov [#allocation13]  }
 0x115   : > { %p5983_p12 = scmp.ne.s32.totalorder %s6608_s18, %s5982_s10  ;;  %s5987_s23 = sshll.u32 %s6187_s19, 4  ;;  %s5988_s23 = int_to_ptr.vmem [resolvable:$false] %s5987_s23 }
 0x116   : > { %s5989_s24 = scalar_lea.vmem %s5988_s23, 2048  ;;  %p5990_p8 = scmp.lt.s32.totalorder %s6608_s18, %s5988_s23 }
 0x117   : > { %p5985_p10 = pnand %p5983_p12, %p8149_p4  ;;  %p5991_p0 = scmp.lt.s32.totalorder %s5989_s24, %s5982_s10 }
 0x119   : > { %p5986_p6 = pneg %p5985_p10  ;;  %p5992_p11 = por %p5991_p0, %p5990_p8 }
 0x11b   : > { %p5993_p1 = pnand %p5992_p11, %p5986_p6 }
 0x11d   : > { %5996 = shalt.err (!%p5993_p1)
}
 0x11e   : > { %s6188_s11 = smov 64   ;;  %s6189_s1 = smov 4  }
 0x11f   : > { %p8150_p7 = scmp.ne.s32.totalorder %s8135_s28, 0  ;;  %s8151_s25 = scalar_lea.sflag [#allocation12], %s6371_s27 }
 0x120   : > { %s6640_s14 = scalar_lea.hbm %s8033_s12, %s6452_s8  ;;  %s694_s22 = scalar_lea.vmem [#allocation16], %s6386_s5 }
 0x121   : > { %5342 = dma.hbm_to_vmem [thread:$0]  (!%p8150_p7), %s6606_s13, 1024, %s6608_s18, %s8151_s25, %s6188_s11, %s6188_s11, %s6189_s1  }
 0x122   : > { %s701_s29 = sshll.u32 %s694_s22, 4  ;;  %s6647_s19 = scalar_lea.hbm %s8038_s17, %s6452_s8  ;;  %s702_s29 = int_to_ptr.vmem [resolvable:$true] %s701_s29 }
 0x123   : > { %s5997_s23 = scalar_lea.hbm %s6640_s14, 16  ;;  %s6002_s24 = scalar_lea.hbm %s8033_s12, 32 }
 0x124   : > { %p5998_p9 = scmp.ne.s32.totalorder %s6640_s14, %s5997_s23  ;;  %p6003_p2 = scmp.lt.u32.totalorder %s6640_s14, %s8033_s12 }
 0x125   : > { %p6004_p3 = scmp.lt.u32.totalorder %s6002_s24, %s5997_s23  ;;  %p6006_p10 = scmp.lt.u32.totalorder %s5997_s23, %s6640_s14 }
 0x126   : > { %p6000_p13 = pnand %p5998_p9, %p8149_p4 }
 0x127   : > { %p6005_p12 = por %p6004_p3, %p6003_p2 }
 0x128   : > { %p6001_p5 = pneg %p6000_p13 }
 0x129   : > { %p6007_p6 = por %p6006_p10, %p6005_p12 }
 0x12b   : > { %p6008_p8 = pnand %p6007_p6, %p6001_p5 }
 0x12d   : > { %6011 = shalt.err (!%p6008_p8)
}
 0x12e   : > { %s6012_s8 = scalar_lea.vmem %s702_s29, 16  ;;  %s6190_s20 = smov [#allocation16]  }
 0x12f   : > { %p6013_p0 = scmp.ne.s32.totalorder %s702_s29, %s6012_s8  ;;  %s6017_s22 = sshll.u32 %s6190_s20, 4  ;;  %s6018_s22 = int_to_ptr.vmem [resolvable:$false] %s6017_s22 }
 0x130   : > { %s6019_s0 = scalar_lea.vmem %s6018_s22, 32  ;;  %p6020_p9 = scmp.lt.s32.totalorder %s702_s29, %s6018_s22 }
 0x131   : > { %p6015_p11 = pnand %p6013_p0, %p8149_p4  ;;  %p6021_p13 = scmp.lt.s32.totalorder %s6019_s0, %s6012_s8 }
 0x133   : > { %p6016_p1 = pneg %p6015_p11  ;;  %p6022_p7 = por %p6021_p13, %p6020_p9 }
 0x135   : > { %p6023_p2 = pnand %p6022_p7, %p6016_p1 }
 0x137   : > { %6026 = shalt.err (!%p6023_p2)
}
 0x138   : > { %p8152_p3 = scmp.ne.s32.totalorder %s8135_s28, 0  ;;  %s8153_s10 = scalar_lea.sflag [#allocation15], %s6371_s27 }
 0x139   : > { %s6027_s23 = scalar_lea.hbm %s6523_s7, 4096  ;;  %s6032_s24 = scalar_lea.hbm %s8036_s15, 8192 }
 0x13a   : > { %5348 = dma.hbm_to_vmem [thread:$0]  (!%p8152_p3), %s6640_s14, 16, %s702_s29, %s8153_s10  }
 0x13b   : > { %p6028_p5 = scmp.ne.s32.totalorder %s6523_s7, %s6027_s23  ;;  %p6033_p7 = scmp.lt.u32.totalorder %s6523_s7, %s8036_s15 }
 0x13c   : > { %p6034_p6 = scmp.lt.u32.totalorder %s6032_s24, %s6027_s23  ;;  %p6036_p0 = scmp.lt.u32.totalorder %s6027_s23, %s6523_s7 }
 0x13d   : > { %p6030_p12 = pnand %p6028_p5, %p8149_p4 }
 0x13e   : > { %p6035_p8 = por %p6034_p6, %p6033_p7 }
 0x13f   : > { %p6031_p10 = pneg %p6030_p12 }
 0x140   : > { %p6037_p11 = por %p6036_p0, %p6035_p8 }
 0x142   : > { %p6038_p1 = pnand %p6037_p11, %p6031_p10 }
 0x144   : > { %6041 = shalt.err (!%p6038_p1)
}
 0x145   : > { %s6042_s14 = scalar_lea.vmem %s6527_s30, 4096  ;;  %s6191_s29 = smov [#allocation19]  }
 0x146   : > { %p6043_p9 = scmp.ne.s32.totalorder %s6527_s30, %s6042_s14  ;;  %s6047_s8 = sshll.u32 %s6191_s29, 4  ;;  %s6048_s8 = int_to_ptr.vmem [resolvable:$false] %s6047_s8 }
 0x147   : > { %s6049_s20 = scalar_lea.vmem %s6048_s8, 8192  ;;  %p6050_p5 = scmp.lt.s32.totalorder %s6527_s30, %s6048_s8 }
 0x148   : > { %p6045_p13 = pnand %p6043_p9, %p8149_p4  ;;  %p6051_p12 = scmp.lt.s32.totalorder %s6049_s20, %s6042_s14 }
 0x14a   : > { %p6046_p2 = pneg %p6045_p13  ;;  %p6052_p7 = por %p6051_p12, %p6050_p5 }
 0x14c   : > { %p6053_p6 = pnand %p6052_p7, %p6046_p2 }
 0x14e   : > { %6056 = shalt.err (!%p6053_p6)
}
 0x14f   : > { %s8154_s22 = scalar_lea.sflag [#allocation18], %s6371_s27  ;;  %s777_s0 = scalar_lea.vmem [#allocation22], %s6386_s5 }
 0x150   : > { %5354 = dma.hbm_to_vmem [thread:$0]  (!%p8152_p3), %s6523_s7, 4096, %s6527_s30, %s8154_s22, %s6188_s11, %s6188_s11, %s6189_s1  }
 0x151   : > { %s784_s10 = sshll.u32 %s777_s0, 4  ;;  %s6057_s23 = scalar_lea.hbm %s6647_s19, 16  ;;  %s785_s10 = int_to_ptr.vmem [resolvable:$true] %s784_s10 }
 0x152   : > { %p6058_p10 = scmp.ne.s32.totalorder %s6647_s19, %s6057_s23  ;;  %s6062_s24 = scalar_lea.hbm %s8038_s17, 32 }
 0x153   : > { %p6063_p11 = scmp.lt.u32.totalorder %s6647_s19, %s8038_s17  ;;  %p6064_p1 = scmp.lt.u32.totalorder %s6062_s24, %s6057_s23 }
 0x154   : > { %p6060_p8 = pnand %p6058_p10, %p8149_p4  ;;  %p6066_p13 = scmp.lt.u32.totalorder %s6057_s23, %s6647_s19 }
 0x155   : > { %p6065_p9 = por %p6064_p1, %p6063_p11 }
 0x156   : > { %p6061_p0 = pneg %p6060_p8 }
 0x157   : > { %p6067_p2 = por %p6066_p13, %p6065_p9 }
 0x159   : > { %p6068_p5 = pnand %p6067_p2, %p6061_p0 }
 0x15b   : > { %6071 = shalt.err (!%p6068_p5)
}
 0x15c   : > { %s6072_s5 = scalar_lea.vmem %s785_s10, 16  ;;  %s6192_s7 = smov [#allocation22]  }
 0x15d   : > { %p6073_p12 = scmp.ne.s32.totalorder %s785_s10, %s6072_s5  ;;  %s6077_s30 = sshll.u32 %s6192_s7, 4  ;;  %s6078_s30 = int_to_ptr.vmem [resolvable:$false] %s6077_s30 }
 0x15e   : > { %s6079_s11 = scalar_lea.vmem %s6078_s30, 32  ;;  %p6080_p10 = scmp.lt.s32.totalorder %s785_s10, %s6078_s30 }
 0x15f   : > { %p6075_p7 = pnand %p6073_p12, %p8149_p4  ;;  %p6081_p8 = scmp.lt.s32.totalorder %s6079_s11, %s6072_s5 }
 0x161   : > { %p6076_p6 = pneg %p6075_p7  ;;  %p6082_p3 = por %p6081_p8, %p6080_p10 }
 0x163   : > { %p6083_p1 = pnand %p6082_p3, %p6076_p6 }
 0x165   : > { %6086 = shalt.err (!%p6083_p1)
}
 0x166   : > { %p8155_p11 = scmp.ne.s32.totalorder %s8135_s28, 0  ;;  %s8156_s1 = scalar_lea.sflag [#allocation21], %s6371_s27 }
 0x167   : > { %p8157_p0 = scmp.ne.s32.totalorder %s8133_s2, 0 }
 0x168   : > { %5360 = dma.hbm_to_vmem [thread:$0]  (!%p8155_p11), %s6647_s19, 16, %s785_s10, %s8156_s1  }
 0x169   : > { %799 = sbr.rel (%p8157_p0) target bundleno = 4421 (0x1145), region = 100 }
 0x170   : > { %p8158_p4 = scmp.eq.s32.totalorder %s6334_s4, 0 }
 0x172   : > { %6132 = dma.done.wait (%p8158_p4), [#allocation6], 64   ;;  %p8159_p9 = pmov %p8158_p4 }
 0x173   : > { %p8160_p13 = pmov %p8158_p4 }
 0x174   : > { %6134 = vsyncadd (%p8159_p9), [#allocation6], 4294967232 }
 0x175   : > { %6136 = dma.done.wait (%p8160_p13), [#allocation9], 32   ;;  %p8161_p3 = pmov %p8158_p4 }
 0x176   : > { %s8162_s28 = sld [smem:[#allocation32_spill]]  ;;  %s8163_s27 = sld [smem:[#allocation36_spill]] }
 0x177   : > { %6138 = vsyncadd (%p8161_p3), [#allocation9], 4294967264  ;;  %s813_s26 = sand.u32 1, %s6334_s4  }
 0x178   : > { %s814_s14 = scalar_lea.sflag [#allocation12], %s813_s26 }
 0x17c   : > { %s6726_s19 = sand.u32 1, %s8162_s28   ;;  %p8164_p2 = scmp.ne.s32.totalorder %s8163_s27, 0 }
 0x17d   : > { %s5292_s2 = smul.u32 192, %s6726_s19 }
 0x17f   : > { %s6729_s29 = scalar_lea.vmem [#allocation11], %s5292_s2 }
 0x180   : > { %6140 = dma.done.wait (%p8164_p2), %s814_s14, 4096  }
 0x181   : > { %6142 = vsyncadd (%p8164_p2), %s814_s14, 4294963200  ;;  %s4706_s8 = sshll.u32 %s6726_s19, 6  ;;  %s832_s22 = scalar_lea.sflag [#allocation15], %s813_s26 }
 0x182   : > { %s6736_s20 = scalar_lea.vmem [#allocation13], %s4706_s8 }
 0x183   : > { %6144 = dma.done.wait (%p8164_p2), %s832_s22, 32  }
 0x184   : > { %6146 = vsyncadd (%p8164_p2), %s832_s22, 4294967264  ;;  %s4707_s10 = sshll.u32 %s6726_s19, 8  ;;  %s848_s18 = scalar_lea.sflag [#allocation18], %s813_s26 }
 0x185   : > { %s6745_s13 = scalar_lea.vmem [#allocation17], %s4707_s10 }
 0x186   : > { %6148 = dma.done.wait (%p8164_p2), %s848_s18, 8192  }
 0x187   : > { %6150 = vsyncadd (%p8164_p2), %s848_s18, 4294959104  ;;  %s6751_s24 = scalar_lea.vmem [#allocation19], %s4707_s10  ;;  %s866_s25 = scalar_lea.sflag [#allocation21], %s813_s26 }
 0x188   : > { %6152 = dma.done.wait (%p8164_p2), %s866_s25, 32  }
 0x189   : > { %6154 = vsyncadd (%p8164_p2), %s866_s25, 4294967264  ;;  %p973_p5 = scmp.lt.s32.totalorder %s6334_s4, 1  ;;  %s8165_s1 = sld [smem:[#allocation81_spill]] }
 0x18a   : > { %s8166_s27 = sld [smem:[#allocation85_spill]]  ;;  %s8167_s18 = sld [smem:[#allocation79_spill]] }
 0x18b   : > { %s6760_s5 = scalar_select %p973_p5, %s6334_s4, 1 }
 0x18c   : > { %s8168_s0 = sld [smem:[#allocation84_spill]]  ;;  %s876_s9 = scalar_lea.vmem [#allocation22], %s6726_s19 }
 0x18d   : > { %s5293_s7 = smul.u32 3, %s6760_s5  ;;  %s4709_s26 = sshll.u32 %s6760_s5, 2 }
 0x18e   : > { %p8169_p12 = scmp.ne.s32.totalorder %s6334_s4, 0 }
 0x18f   : > { %s979_s28 = scalar_lea.vmem %s8165_s1, %s6760_s5  ;;  %s8170_s1 = sld [smem:[#allocation72_spill]] (!%p8169_p12)  ;;  %v6193_v2 = vmov (!%p8169_p12), 0   ;;  %v992_v13 = vlaneseq (!%p8169_p12)  ;;  %vm1088_vm4 = vcmask (!%p8169_p12), 523264   ;;  %v6194_v19 = vmov (!%p8169_p12), 0.0  }
 0x190   : > { %s986_s8 = scalar_lea.vmem %s8166_s27, %s6760_s5  ;;  %s6775_s25 = scalar_lea.vmem %s8167_s18, %s5293_s7  ;;  %5422 = vset.pattern.permute.xlu1 (!%p8169_p12), %v6193_v2  ;;  %5421 = vset.pattern.permute.xlu0 (!%p8169_p12), %v6193_v2 }
 0x191   : > { %991 = sbr.rel (%p8169_p12) target bundleno = 1093 (0x445), region = 148  ;;  %s8171_s22 = sld [smem:[#allocation74_spill]] (!%p8169_p12)  ;;  %v993_v14 = vand.u32 (!%p8169_p12), 127, %v992_v13 }
 0x192   : > { %s6780_s6 = scalar_lea.vmem %s8168_s0, %s4709_s26  ;;  %s8172_s2 = sld [smem:[#allocation75_spill]] (!%p8169_p12) }
 0x195   : > { %v998_v0 = vld [vmem:[%s8170_s1 + $0x20] sm:$0xff] (!%p8169_p12)  ;;  %v999_v3 = vld [vmem:[%s8170_s1 + $0x28] sm:$0xff] (!%p8169_p12)  ;;  %v997_v7 = vld [vmem:[%s8170_s1 + $0x18] sm:$0xff] (!%p8169_p12) }
 0x196   : > { %v994_v1 = vld [vmem:[%s8170_s1] sm:$0xff] (!%p8169_p12)  ;;  %1015 = vperm.xlu1 (!%p8169_p12), %5422, %v998_v0   ;;  %v995_v4 = vld [vmem:[%s8170_s1 + $0x8] sm:$0xff] (!%p8169_p12)  ;;  %v996_v8 = vld [vmem:[%s8170_s1 + $0x10] sm:$0xff] (!%p8169_p12) }
 0x197   : > { %1003 = vperm.xlu0 (!%p8169_p12), %5421, %v994_v1   ;;  %v5423_v5 = vld [vmem:[%s8171_s22] sm:$0xff] (!%p8169_p12)   ;;  %v5424_v6 = vld [vmem:[%s8171_s22 + $0x8] sm:$0xff] (!%p8169_p12)   ;;  %v5425_v9 = vld [vmem:[%s8171_s22 + $0x10] sm:$0xff] (!%p8169_p12)  }
 0x198   : > { %5065 = vmatprep.subr.bf16.mxu0 %v5423_v5  ;;  %5250 = vmatprep.subr.bf16.mxu1 %v5423_v5  ;;  %v1001_v10 = vld [vmem:[%s8170_s1 + $0x38] sm:$0xff]  ;;  %v1000_v11 = vld [vmem:[%s8170_s1 + $0x30] sm:$0xff]  ;;  %v1062_v36 = vld [vmem:[%s8172_s2] sm:$0xff] }
 0x199   : > { %5066 = vmatpush3.bf16.msra.mxu0 %v5423_v5  ;;  %5254 = vmatpush3.bf16.msra.mxu1 %v5423_v5  ;;  %v5426_v12 = vld [vmem:[%s8171_s22 + $0x18] sm:$0xff]   ;;  %v1063_v45 = vld [vmem:[%s8172_s2 + $0x8] sm:$0xff] }
 0x19a   : > { %1018 = vperm.xlu1 %5422, %v999_v3   ;;  %5067 = vmatprep.subr.bf16.mxu0 %v5424_v6 }
 0x19b   : > { %1006 = vperm.xlu0 %5421, %v995_v4   ;;  %5251 = vmatprep.subr.bf16.mxu1 %v5424_v6 }
 0x19d   : > { %5068 = vmatpush3.bf16.msra.mxu0 %v5424_v6  ;;  %5255 = vmatpush3.bf16.msra.mxu1 %v5424_v6 }
 0x19e   : > { %1012 = vperm.xlu1 %5422, %v997_v7   ;;  %5069 = vmatprep.subr.bf16.mxu0 %v5425_v9 }
 0x19f   : > { %1009 = vperm.xlu0 %5421, %v996_v8   ;;  %5252 = vmatprep.subr.bf16.mxu1 %v5425_v9 }
 0x1a1   : > { %5070 = vmatpush3.bf16.msra.mxu0 %v5425_v9  ;;  %5256 = vmatpush3.bf16.msra.mxu1 %v5425_v9 }
 0x1a2   : > { %1024 = vperm.xlu1 %5422, %v1001_v10   ;;  %5071 = vmatprep.subr.bf16.mxu0 %v5426_v12 }
 0x1a3   : > { %1021 = vperm.xlu0 %5421, %v1000_v11   ;;  %5253 = vmatprep.subr.bf16.mxu1 %v5426_v12 }
 0x1a5   : > { %5072 = vmatpush3.bf16.msra.mxu0 %v5426_v12  ;;  %5257 = vmatpush3.bf16.msra.mxu1 %v5426_v12 }
 0x215   : > { %v1016_v15 = vpop.permute.xlu1 %1015 }
 0x216   : > { %v1004_v16 = vpop.permute.xlu0 %1003  ;;  %vm1030_vm0 = vcmp.eq.s32.totalorder %v1016_v15, %v993_v14 }
 0x217   : > { %vm1026_vm1 = vcmp.eq.s32.totalorder %v1004_v16, %v993_v14  ;;  %v4715_v20 = vsel %vm1030_vm0, 1.0, %v6194_v19 }
 0x218   : > { %v4711_v21 = vsel %vm1026_vm1, 1.0, %v6194_v19 }
 0x219   : > { %v1019_v17 = vpop.permute.xlu1 %1018 }
 0x21a   : > { %v1007_v18 = vpop.permute.xlu0 %1006  ;;  %vm1031_vm2 = vcmp.eq.s32.totalorder %v1019_v17, %v993_v14 }
 0x21b   : > { %vm1027_vm3 = vcmp.eq.s32.totalorder %v1007_v18, %v993_v14  ;;  %v4716_v22 = vsel %vm1031_vm2, 1.0, %v6194_v19 }
 0x21c   : > { %v4712_v23 = vsel %vm1027_vm3, 1.0, %v6194_v19  ;;  %v1052_v25 = vpack.c.bf16 %v4716_v22, %v4715_v20 }
 0x21d   : > { %v1050_v24 = vpack.c.bf16 %v4712_v23, %v4711_v21  ;;  %v1013_v26 = vpop.permute.xlu1 %1012 }
 0x21e   : > { %v1010_v27 = vpop.permute.xlu0 %1009  ;;  %vm1029_vm5 = vcmp.eq.s32.totalorder %v1013_v26, %v993_v14  ;;  %5077 = vmatprep.mubr.msk.bf16.mxu1 %vm1088_vm4, %v1052_v25 }
 0x21f   : > { %vm1028_vm6 = vcmp.eq.s32.totalorder %v1010_v27, %v993_v14  ;;  %5073 = vmatprep.mubr.msk.bf16.mxu0 %vm1088_vm4, %v1050_v24  ;;  %v4714_v28 = vsel %vm1029_vm5, 1.0, %v6194_v19 }
 0x220   : > { %v4713_v29 = vsel %vm1028_vm6, 1.0, %v6194_v19 }
 0x221   : > { %v1051_v30 = vpack.c.bf16 %v4714_v28, %v4713_v29  ;;  %v1025_v31 = vpop.permute.xlu1 %1024 }
 0x222   : > { %v1022_v32 = vpop.permute.xlu0 %1021  ;;  %vm1033_vm7 = vcmp.eq.s32.totalorder %v1025_v31, %v993_v14 }
 0x223   : > { %vm1032_vm8 = vcmp.eq.s32.totalorder %v1022_v32, %v993_v14  ;;  %5074 = vmatmul.mubr.msk.bf16.vlgmr.msra.gmra.mrb[0].mxu0 %vm1088_vm4, %v1051_v30  ;;  %v4718_v33 = vsel %vm1033_vm7, 1.0, %v6194_v19 }
 0x224   : > { %v4717_v34 = vsel %vm1032_vm8, 1.0, %v6194_v19 }
 0x225   : > { %v1053_v35 = vpack.c.bf16 %v4718_v33, %v4717_v34 }
 0x227   : > { %5078 = vmatmul.mubr.msk.bf16.vlgmr.msra.gmra.mrb[0].mxu1 %vm1088_vm4, %v1053_v35 }
 0x2f6   : > { %v5075_v37 = vpop.f32.mrb[0].mxu0 }
 0x2f7   : > { %v1144_v38 = vadd.f32 %v5075_v37, %v1062_v36  ;;  %v1135_v39 = vpop.f32.mrb[1].mxu0 }
 0x2f8   : > { %v5076_v40 = vpop.f32.mrb[2].mxu0  ;;  %v1136_v43 = vadd.f32 %v1135_v39, %v1062_v36  ;;  %v4727_v39 = vld [vmem:[#allocation8] ss:$0 sm:$0xff] }
 0x2f9   : > { %1172 = vadd.xlane.f32.xlu0 %v1144_v38  ;;  %v1138_v41 = vpop.f32.mrb[3].mxu0  ;;  %v1147_v49 = vadd.f32 %v5076_v40, %v1063_v45 }
 0x2fa   : > { %v5079_v42 = vpop.f32.mrb[0].mxu1  ;;  %v1139_v50 = vadd.f32 %v1138_v41, %v1063_v45 }
 0x2fb   : > { %v1151_v44 = vpop.f32.mrb[1].mxu1  ;;  %v1160_v52 = vadd.f32 %v5079_v42, %v1062_v36 }
 0x2fc   : > { %v1152_v46 = vadd.f32 %v1151_v44, %v1062_v36  ;;  %v5080_v47 = vpop.f32.mrb[2].mxu1  ;;  %v4728_v44 = vld [vmem:[#allocation10] ss:$0 sm:$0xff] }
 0x2fd   : > { %v1154_v48 = vpop.f32.mrb[3].mxu1  ;;  %1168 = vadd.xlane.f32.xlu0 %v1136_v43  ;;  %v1163_v53 = vadd.f32 %v5080_v47, %v1063_v45 }
 0x2fe   : > { %1176 = vadd.xlane.f32.xlu1 %v1152_v46  ;;  %v1155_v51 = vadd.f32 %v1154_v48, %v1063_v45 }
 0x301   : > { %1174 = vadd.xlane.f32.xlu0 %v1147_v49 }
 0x302   : > { %1170 = vadd.xlane.f32.xlu1 %v1139_v50 }
 0x305   : > { %1178 = vadd.xlane.f32.xlu0 %v1155_v51 }
 0x306   : > { %1180 = vadd.xlane.f32.xlu1 %v1160_v52 }
 0x309   : > { %1182 = vadd.xlane.f32.xlu0 %v1163_v53 }
 0x386   : > { %v1173_v54 = vpop.xlane.xlu0 %1172 }
 0x387   : > { %v1187_v55 = vmul.f32 0.0078125, %v1173_v54 }
 0x389   : > { %v1195_v56 = vsub.f32 %v1144_v38, %v1187_v55 }
 0x38a   : > { %v1169_v57 = vpop.xlane.xlu0 %1168 }
 0x38b   : > { %v1185_v58 = vmul.f32 0.0078125, %v1169_v57  ;;  %v1177_v59 = vpop.xlane.xlu1 %1176  ;;  %v1203_v60 = vmul.f32 %v1195_v56, %v1195_v56 }
 0x38c   : > { %v1189_v61 = vmul.f32 0.0078125, %v1177_v59 }
 0x38d   : > { %v6831_v62 = vsub.f32 %v1136_v43, %v1185_v58  ;;  %1213 = vadd.xlane.f32.xlu1 %v1203_v60 }
 0x38e   : > { %v1175_v63 = vpop.xlane.xlu0 %1174  ;;  %v6833_v0 = vsub.f32 %v1152_v46, %v1189_v61 }
 0x38f   : > { %v1188_v1 = vmul.f32 0.0078125, %v1175_v63  ;;  %v1171_v2 = vpop.xlane.xlu1 %1170  ;;  %v1201_v3 = vmul.f32 %v6831_v62, %v6831_v62 }
 0x390   : > { %v1186_v4 = vmul.f32 0.0078125, %v1171_v2  ;;  %v1205_v10 = vmul.f32 %v6833_v0, %v6833_v0 }
 0x391   : > { %v6837_v5 = vsub.f32 %v1147_v49, %v1188_v1  ;;  %1209 = vadd.xlane.f32.xlu1 %v1201_v3 }
 0x392   : > { %v1179_v6 = vpop.xlane.xlu0 %1178  ;;  %v6839_v7 = vsub.f32 %v1139_v50, %v1186_v4 }
 0x393   : > { %v1190_v8 = vmul.f32 0.0078125, %v1179_v6  ;;  %v1181_v9 = vpop.xlane.xlu1 %1180  ;;  %v1204_v11 = vmul.f32 %v6837_v5, %v6837_v5 }
 0x394   : > { %v1191_v12 = vmul.f32 0.0078125, %v1181_v9  ;;  %v1202_v17 = vmul.f32 %v6839_v7, %v6839_v7 }
 0x395   : > { %1217 = vadd.xlane.f32.xlu1 %v1205_v10  ;;  %1215 = vadd.xlane.f32.xlu0 %v1204_v11  ;;  %v6847_v15 = vsub.f32 %v1155_v51, %v1190_v8 }
 0x396   : > { %v6845_v13 = vsub.f32 %v1160_v52, %v1191_v12  ;;  %v1183_v14 = vpop.xlane.xlu0 %1182 }
 0x397   : > { %v1192_v16 = vmul.f32 0.0078125, %v1183_v14  ;;  %v1206_v20 = vmul.f32 %v6847_v15, %v6847_v15 }
 0x398   : > { %v1207_v18 = vmul.f32 %v6845_v13, %v6845_v13 }
 0x399   : > { %1211 = vadd.xlane.f32.xlu0 %v1202_v17  ;;  %v6853_v19 = vsub.f32 %v1163_v53, %v1192_v16 }
 0x39a   : > { %1221 = vadd.xlane.f32.xlu1 %v1207_v18 }
 0x39b   : > { %v1208_v21 = vmul.f32 %v6853_v19, %v6853_v19 }
 0x39d   : > { %1219 = vadd.xlane.f32.xlu0 %v1206_v20 }
 0x3a1   : > { %1223 = vadd.xlane.f32.xlu0 %v1208_v21 }
 0x41a   : > { %v1214_v22 = vpop.xlane.xlu1 %1213 }
 0x41b   : > { %v1227_v23 = vmul.f32 0.0078125, %v1214_v22 }
 0x41d   : > { %v1235_v24 = vadd.f32 1e-12, %v1227_v23 }
 0x41e   : > { %v1210_v25 = vpop.xlane.xlu1 %1209 }
 0x41f   : > { %5427 = vrsqrt.f32 %v1235_v24  ;;  %v1225_v26 = vmul.f32 0.0078125, %v1210_v25 }
 0x421   : > { %v1233_v27 = vadd.f32 1e-12, %v1225_v26 }
 0x422   : > { %v1218_v28 = vpop.xlane.xlu1 %1217  ;;  %v1216_v29 = vpop.xlane.xlu0 %1215 }
 0x423   : > { %5429 = vrsqrt.f32 %v1233_v27  ;;  %v1229_v30 = vmul.f32 0.0078125, %v1218_v28  ;;  %v1228_v31 = vmul.f32 0.0078125, %v1216_v29 }
 0x425   : > { %v1237_v32 = vadd.f32 1e-12, %v1229_v30  ;;  %v1236_v33 = vadd.f32 1e-12, %v1228_v31 }
 0x426   : > { %v1212_v34 = vpop.xlane.xlu0 %1211 }
 0x427   : > { %5431 = vrsqrt.f32 %v1237_v32  ;;  %v1226_v35 = vmul.f32 0.0078125, %v1212_v34  ;;  %v1222_v36 = vpop.xlane.xlu1 %1221 }
 0x428   : > { %5433 = vrsqrt.f32 %v1236_v33  ;;  %v1231_v37 = vmul.f32 0.0078125, %v1222_v36 }
 0x429   : > { %v5428_v38 = vpop.eup %5427  ;;  %v1234_v40 = vadd.f32 1e-12, %v1226_v35 }
 0x42a   : > { %v1251_v41 = vmul.f32 %v5428_v38, %v1195_v56  ;;  %v1239_v42 = vadd.f32 1e-12, %v1231_v37  ;;  %v1220_v43 = vpop.xlane.xlu0 %1219 }
 0x42b   : > { %5435 = vrsqrt.f32 %v1234_v40  ;;  %v1230_v45 = vmul.f32 0.0078125, %v1220_v43 }
 0x42c   : > { %v1265_v46 = vmul.f32 %v4727_v39, %v1251_v41  ;;  %5437 = vrsqrt.f32 %v1239_v42 }
 0x42d   : > { %v5430_v47 = vpop.eup %5429  ;;  %v1238_v48 = vadd.f32 1e-12, %v1230_v45 }
 0x42e   : > { %v1279_v49 = vadd.f32 %v4728_v44, %v1265_v46  ;;  %v1249_v50 = vmul.f32 %v5430_v47, %v6831_v62  ;;  %v1224_v51 = vpop.xlane.xlu0 %1223 }
 0x42f   : > { %5439 = vrsqrt.f32 %v1238_v48  ;;  %v1232_v52 = vmul.f32 0.0078125, %v1224_v51 }
 0x430   : > { %1287 = vst [vmem:[#allocation2 + $0x10] sm:$0xff] %v1279_v49  ;;  %v1263_v53 = vmul.f32 %v4727_v39, %v1249_v50 }
 0x431   : > { %v5432_v54 = vpop.eup %5431  ;;  %v1240_v55 = vadd.f32 1e-12, %v1232_v52 }
 0x432   : > { %v5434_v56 = vpop.eup %5433  ;;  %v1277_v57 = vadd.f32 %v4728_v44, %v1263_v53  ;;  %v1253_v58 = vmul.f32 %v5432_v54, %v6833_v0 }
 0x433   : > { %v1252_v59 = vmul.f32 %v5434_v56, %v6837_v5  ;;  %5441 = vrsqrt.f32 %v1240_v55 }
 0x434   : > { %1285 = vst [vmem:[#allocation2] sm:$0xff] %v1277_v57  ;;  %v1267_v60 = vmul.f32 %v4727_v39, %v1253_v58 }
 0x435   : > { %v5436_v61 = vpop.eup %5435  ;;  %v1266_v63 = vmul.f32 %v4727_v39, %v1252_v59 }
 0x436   : > { %v5438_v1 = vpop.eup %5437  ;;  %v1281_v62 = vadd.f32 %v4728_v44, %v1267_v60  ;;  %v1250_v2 = vmul.f32 %v5436_v61, %v6839_v7 }
 0x437   : > { %v1280_v3 = vadd.f32 %v4728_v44, %v1266_v63  ;;  %v1255_v4 = vmul.f32 %v5438_v1, %v6845_v13 }
 0x438   : > { %1289 = vst [vmem:[#allocation2 + $0x20] sm:$0xff] %v1281_v62  ;;  %v1264_v6 = vmul.f32 %v4727_v39, %v1250_v2 }
 0x439   : > { %v5440_v8 = vpop.eup %5439  ;;  %1288 = vst [vmem:[#allocation2 + $0x18] sm:$0xff] %v1280_v3  ;;  %v1269_v9 = vmul.f32 %v4727_v39, %v1255_v4 }
 0x43a   : > { %v1278_v0 = vadd.f32 %v4728_v44, %v1264_v6  ;;  %v1254_v5 = vmul.f32 %v5440_v8, %v6847_v15 }
 0x43b   : > { %v1283_v10 = vadd.f32 %v4728_v44, %v1269_v9 }
 0x43c   : > { %1286 = vst [vmem:[#allocation2 + $0x8] sm:$0xff] %v1278_v0  ;;  %v1268_v11 = vmul.f32 %v4727_v39, %v1254_v5 }
 0x43d   : > { %v5442_v12 = vpop.eup %5441  ;;  %1291 = vst [vmem:[#allocation2 + $0x30] sm:$0xff] %v1283_v10 }
 0x43e   : > { %v1282_v14 = vadd.f32 %v4728_v44, %v1268_v11  ;;  %v1256_v16 = vmul.f32 %v5442_v12, %v6853_v19 }
 0x440   : > { %1290 = vst [vmem:[#allocation2 + $0x28] sm:$0xff] %v1282_v14  ;;  %v1270_v7 = vmul.f32 %v4727_v39, %v1256_v16 }
 0x442   : > { %v1284_v17 = vadd.f32 %v4728_v44, %v1270_v7 }
 0x444   : > { %1292 = vst [vmem:[#allocation2 + $0x38] sm:$0xff] %v1284_v17 }
 0x445 PF: > { %v5443_v13 = vld [vmem:[%s6729_s29 + $0x4] ss:$12 sps:$4 sm:$0xff]   ;;  %v5445_v15 = vld [vmem:[%s6729_s29] ss:$12 sps:$4 sm:$0xff]   ;;  %v6195_v18 = vmov 0   ;;  %v1293_v24 = vld [vmem:[#allocation2] sm:$0xff]  ;;  %v1339_v54 = vlaneseq }
 0x446   : > { %1514 = vmatprep.mubr.bf16.mxu0 %v6195_v18  ;;  %1482 = vmatprep.subr.bf16.mxu0 %v5443_v13  ;;  %v5446_v19 = vld [vmem:[%s6729_s29 + $0x1c] ss:$12 sps:$4 sm:$0xff]   ;;  %v5448_v20 = vld [vmem:[%s6729_s29 + $0x18] ss:$12 sps:$4 sm:$0xff]   ;;  %v5449_v21 = vld [vmem:[%s6729_s29 + $0x34] ss:$12 sps:$4 sm:$0xff]  }
 0x447   : > { %1483 = vmatpush1.bf16.msra.mxu0 %v5445_v15  ;;  %v5451_v22 = vld [vmem:[%s6729_s29 + $0x30] ss:$12 sps:$4 sm:$0xff]   ;;  %v5452_v23 = vld [vmem:[%s6729_s29 + $0x4c] ss:$12 sps:$4 sm:$0xff]   ;;  %v5454_v25 = vld [vmem:[%s6729_s29 + $0x48] ss:$12 sps:$4 sm:$0xff]  }
 0x448   : > { %1484 = vmatprep.subr.bf16.mxu0 %v5446_v19  ;;  %v1294_v26 = vld [vmem:[#allocation2 + $0x8] sm:$0xff]  ;;  %v5467_v30 = vld [vmem:[%s6729_s29 + $0x8] ss:$12 sps:$4 sm:$0xff]   ;;  %v5463_v36 = vld [vmem:[%s6729_s29 + $0x90] ss:$12 sps:$4 sm:$0xff]   ;;  %v6196_v53 = vmov 0.0  }
 0x449   : > { %v5455_v27 = vld [vmem:[%s6729_s29 + $0x64] ss:$12 sps:$4 sm:$0xff]   ;;  %v1301_v28 = vpack.c.bf16 %v1294_v26, %v1293_v24  ;;  %v5457_v29 = vld [vmem:[%s6729_s29 + $0x60] ss:$12 sps:$4 sm:$0xff]   ;;  %v5458_v32 = vld [vmem:[%s6729_s29 + $0x7c] ss:$12 sps:$4 sm:$0xff]   ;;  %5081 = vmatprep.subr.bf16.mxu1 %v5467_v30 }
 0x44a   : > { %v5468_v31 = vld [vmem:[%s6729_s29 + $0x20] ss:$12 sps:$4 sm:$0xff]   ;;  %5082 = vmatpush3.bf16.msra.mxu1 %v5467_v30  ;;  %v5469_v33 = vld [vmem:[%s6729_s29 + $0x38] ss:$12 sps:$4 sm:$0xff]   ;;  %v5470_v37 = vld [vmem:[%s6729_s29 + $0x50] ss:$12 sps:$4 sm:$0xff]  }
 0x44b   : > { %1485 = vmatpush1.bf16.msra.mxu0 %v5448_v20  ;;  %5097 = vmatprep.mubr.bf16.mxu1 %v1301_v28  ;;  %v5460_v34 = vld [vmem:[%s6729_s29 + $0x78] ss:$12 sps:$4 sm:$0xff]   ;;  %v5461_v35 = vld [vmem:[%s6729_s29 + $0x94] ss:$12 sps:$4 sm:$0xff]   ;;  %v1295_v43 = vld [vmem:[#allocation2 + $0x10] sm:$0xff]  ;;  %vm6197_vm9 = vmmov 0  }
 0x44c   : > { %1486 = vmatprep.subr.bf16.mxu0 %v5449_v21  ;;  %5083 = vmatprep.subr.bf16.mxu1 %v5468_v31  ;;  %v5464_v38 = vld [vmem:[%s6729_s29 + $0xac] ss:$12 sps:$4 sm:$0xff]   ;;  %v5471_v39 = vld [vmem:[%s6729_s29 + $0x68] ss:$12 sps:$4 sm:$0xff]   ;;  %v5474_v45 = vld [vmem:[%s6729_s29 + $0xb0] ss:$12 sps:$4 sm:$0xff]  }
 0x44d   : > { %v5466_v40 = vld [vmem:[%s6729_s29 + $0xa8] ss:$12 sps:$4 sm:$0xff]   ;;  %v5472_v41 = vld [vmem:[%s6729_s29 + $0x80] ss:$12 sps:$4 sm:$0xff]   ;;  %v5473_v42 = vld [vmem:[%s6729_s29 + $0x98] ss:$12 sps:$4 sm:$0xff]  }
 0x44e   : > { %5084 = vmatpush3.bf16.msra.mxu1 %v5468_v31  ;;  %v1296_v44 = vld [vmem:[#allocation2 + $0x18] sm:$0xff]  ;;  %v1297_v47 = vld [vmem:[#allocation2 + $0x20] sm:$0xff]  ;;  %v1298_v48 = vld [vmem:[#allocation2 + $0x28] sm:$0xff]  ;;  %v6900_v55 = vshrl.u32 %v1339_v54, 7  ;;  %v6920_v9 = vand.u32 127, %v1339_v54  ;;  %vm2088_vm14 = vcmask 130048  }
 0x44f   : > { %1487 = vmatpush1.bf16.msra.mxu0 %v5451_v22  ;;  %5085 = vmatprep.subr.bf16.mxu1 %v5469_v33  ;;  %v1302_v46 = vpack.c.bf16 %v1296_v44, %v1295_v43  ;;  %v1303_v49 = vpack.c.bf16 %v1298_v48, %v1297_v47  ;;  %v1299_v50 = vld [vmem:[#allocation2 + $0x30] sm:$0xff]  ;;  %v1300_v51 = vld [vmem:[#allocation2 + $0x38] sm:$0xff]  ;;  %v1337_v57 = vld [vmem:[%s6775_s25] sm:$0x7]  ;;  %p4887_p7 = scmp.ne.s32.totalorder %s6334_s4, 1 }
 0x450   : > { %1488 = vmatprep.subr.bf16.mxu0 %v5452_v23  ;;  %v1304_v52 = vpack.c.bf16 %v1300_v51, %v1299_v50  ;;  %8173 = vst [vmem:[#allocation37_spill] sm:$0xff] %v6900_v55  ;;  %v6903_v56 = vsub.s32 0, %v6900_v55  ;;  %v1345_v58 = vsub.s32 1, %v6900_v55  ;;  %8174 = vst [vmem:[#allocation38_spill] sm:$0xff] %v6920_v9  ;;  %v1349_v5 = vsub.s32 2, %v6900_v55  ;;  %s8249_s5 = sld [smem:[#allocation86_spill]] (!%p4887_p7) }
 0x451   : > { %vm1623_vm10 = vcmp.lt.s32.totalorder %v6920_v9, 64  ;;  %vm1641_vm12 = vcmp.ge.s32.totalorder %v6920_v9, 64  ;;  %vm4112_vm15 = vcmask (!%p4887_p7), 1040384   ;;  %vm4114_vm0 = vcmask (!%p4887_p7), 1041408   ;;  %s7936_s0 = sld [smem:[#allocation4]] (!%p4887_p7)  ;;  %s7938_s3 = sld [smem:[#allocation4 + $0x1]] (!%p4887_p7) }
 0x452   : > { %5086 = vmatpush3.bf16.msra.mxu1 %v5469_v33  ;;  %v6908_v59 = vrot.slane %v1337_v57, %v6903_v56  ;;  %v6912_v61 = vrot.slane %v1337_v57, %v1345_v58  ;;  %v1350_v17 = vrot.slane %v1337_v57, %v1349_v5  ;;  %vm6934_vm11 = vmpackc.low %vm1623_vm10, %vm1623_vm10  ;;  %vm4116_vm1 = vcmask (!%p4887_p7), 1042432  }
 0x453   : > { %1489 = vmatpush1.bf16.msra.mxu0 %v5454_v25  ;;  %5087 = vmatprep.subr.bf16.mxu1 %v5470_v37  ;;  %vm6976_vm13 = vmpackc.low %vm1641_vm12, %vm1641_vm12  ;;  %vm4258_vm2 = vcmask (!%p4887_p7), 1043456   ;;  %vm6200_vm3 = vmmov (!%p4887_p7), 0   ;;  %vm4365_vm5 = vcmask (!%p4887_p7), 27648  }
 0x454   : > { %1490 = vmatprep.subr.bf16.mxu0 %v5455_v27 }
 0x456   : > { %5088 = vmatpush3.bf16.msra.mxu1 %v5470_v37 }
 0x457   : > { %1491 = vmatpush1.bf16.msra.mxu0 %v5457_v29  ;;  %5089 = vmatprep.subr.bf16.mxu1 %v5471_v39 }
 0x458   : > { %1492 = vmatprep.subr.bf16.mxu0 %v5458_v32 }
 0x45a   : > { %5090 = vmatpush3.bf16.msra.mxu1 %v5471_v39 }
 0x45b   : > { %1493 = vmatpush1.bf16.msra.mxu0 %v5460_v34  ;;  %5091 = vmatprep.subr.bf16.mxu1 %v5472_v41 }
 0x45c   : > { %1494 = vmatprep.subr.bf16.mxu0 %v5461_v35 }
 0x45e   : > { %5092 = vmatpush3.bf16.msra.mxu1 %v5472_v41 }
 0x45f   : > { %1495 = vmatpush1.bf16.msra.mxu0 %v5463_v36  ;;  %5093 = vmatprep.subr.bf16.mxu1 %v5473_v42 }
 0x460   : > { %1496 = vmatprep.subr.bf16.mxu0 %v5464_v38 }
 0x462   : > { %5094 = vmatpush3.bf16.msra.mxu1 %v5473_v42 }
 0x463   : > { %1497 = vmatpush1.bf16.msra.mxu0 %v5466_v40  ;;  %5095 = vmatprep.subr.bf16.mxu1 %v5474_v45 }
 0x464   : > { %5117 = vmatprep.subr.bf16.mxu0 %v6196_v53 }
 0x466   : > { %1515 = vmatmul.mubr.bf16.vlgmr.msra.gmra.mrb[0].mxu0 %v1301_v28  ;;  %5096 = vmatpush3.bf16.msra.mxu1 %v5474_v45 }
 0x467   : > { %1524 = vmatprep.mubr.bf16.mxu0 %v6195_v18  ;;  %5105 = vmatprep.subr.bf16.mxu1 %v6196_v53 }
 0x469   : > { %5098 = vmatmul.mubr.bf16.vlgmr.msra.gmra.mrb[0].mxu1 %v1302_v46 }
 0x46a   : > { %5101 = vmatprep.mubr.bf16.mxu1 %v1303_v49 }
 0x46e   : > { %1525 = vmatmul.mubr.bf16.gmra.mrb[4].mxu0 %v1302_v46 }
 0x46f   : > { %1534 = vmatprep.mubr.bf16.mxu0 %v6195_v18 }
 0x471   : > { %5102 = vmatmul.mubr.bf16.gmra.mrb[4].mxu1 %v1304_v52 }
 0x472   : > { %5107 = vmatprep.mubr.msk.bf16.mxu1 %vm6197_vm9, %v6196_v53 }
 0x476   : > { %1535 = vmatmul.mubr.bf16.gmra.mrb[8].mxu0 %v1303_v49 }
 0x477   : > { %1544 = vmatprep.mubr.bf16.mxu0 %v6195_v18 }
 0x47e   : > { %1545 = vmatmul.mubr.bf16.gmra.mrb[12].mxu0 %v1304_v52 }
 0x47f   : > { %5119 = vmatprep.mubr.msk.bf16.mxu0 %vm6197_vm9, %v6196_v53 }
 0x539   : > { %v1516_v60 = vpop.f32.mrb[0].mxu0 }
 0x53a   : > { %v1518_v63 = vpop.f32.mrb[1].mxu0  ;;  %v1517_v62 = vadd.f32 %v1516_v60, %v6908_v59 }
 0x53b   : > { %v1520_v1 = vpop.f32.mrb[2].mxu0  ;;  %v1519_v4 = vadd.f32 %v1518_v63, %v6912_v61 }
 0x53c   : > { %v1521_v2 = vadd.f32 %v1520_v1, %v6908_v59  ;;  %v1522_v3 = vpop.f32.mrb[3].mxu0  ;;  %v5099_v22 = vpop.f32.mrb[0].mxu1 }
 0x53d   : > { %v1523_v6 = vadd.f32 %v1522_v3, %v6912_v61  ;;  %v1598_v23 = vadd.f32 %v5099_v22, %v1350_v17  ;;  %v1589_v24 = vpop.f32.mrb[1].mxu1 }
 0x53e   : > { %v6918_v8 = vpack.c.bf16 %v1521_v2, %v1517_v62  ;;  %v1590_v26 = vadd.f32 %v1589_v24, %v1350_v17  ;;  %v5100_v27 = vpop.f32.mrb[2].mxu1 }
 0x53f   : > { %v6922_v0 = vpack.c.bf16 %v1523_v6, %v1519_v4  ;;  %v1601_v29 = vadd.f32 %v5100_v27, %v1350_v17  ;;  %v1592_v30 = vpop.f32.mrb[3].mxu1 }
 0x540   : > { %v1593_v32 = vadd.f32 %v1592_v30, %v1350_v17 }
 0x541   : > { %v1526_v10 = vpop.f32.mrb[4].mxu0  ;;  %5106 = vmatpush3.bf16.xpose.msra.mxu1 %v6922_v0  ;;  %v6948_v36 = vpack.c.bf16 %v1601_v29, %v1598_v23 }
 0x542   : > { %v1528_v11 = vpop.f32.mrb[5].mxu0  ;;  %5111 = vmatprep.subr.bf16.mxu1 %v6196_v53  ;;  %v1527_v14 = vadd.f32 %v1526_v10, %v6908_v59  ;;  %v6952_v39 = vpack.c.bf16 %v1593_v32, %v1590_v26 }
 0x543   : > { %v1530_v12 = vpop.f32.mrb[6].mxu0  ;;  %v1529_v13 = vadd.f32 %v1528_v11, %v6912_v61 }
 0x544   : > { %v1531_v16 = vadd.f32 %v1530_v12, %v6908_v59  ;;  %v1532_v7 = vpop.f32.mrb[7].mxu0  ;;  %v5103_v42 = vpop.f32.mrb[4].mxu1 }
 0x545   : > { %v1533_v15 = vadd.f32 %v1532_v7, %v6912_v61  ;;  %v1614_v43 = vadd.f32 %v5103_v42, %v1350_v17  ;;  %v1605_v44 = vpop.f32.mrb[5].mxu1 }
 0x546   : > { %v6938_v20 = vpack.c.bf16 %v1531_v16, %v1527_v14  ;;  %v1606_v46 = vadd.f32 %v1605_v44, %v1350_v17  ;;  %v5104_v47 = vpop.f32.mrb[6].mxu1 }
 0x547   : > { %v1677_v21 = vpack.c.bf16 %v1533_v15, %v1529_v13  ;;  %v1617_v49 = vadd.f32 %v5104_v47, %v1350_v17  ;;  %v1608_v50 = vpop.f32.mrb[7].mxu1 }
 0x548   : > { %5108 = vmatmul.mubr.msk.bf16.vlgmr.msra.gmra.mrb[8].mxu1 %vm6934_vm11, %v6918_v8  ;;  %v1609_v52 = vadd.f32 %v1608_v50, %v1350_v17 }
 0x549   : > { %v1536_v25 = vpop.f32.mrb[8].mxu0  ;;  %5112 = vmatpush3.bf16.xpose.msra.mxu1 %v1677_v21  ;;  %5113 = vmatprep.mubr.msk.bf16.mxu1 %vm6197_vm9, %v6196_v53  ;;  %v6962_v63 = vpack.c.bf16 %v1617_v49, %v1614_v43 }
 0x54a   : > { %v1538_v28 = vpop.f32.mrb[9].mxu0  ;;  %5123 = vmatprep.subr.bf16.mxu1 %v6196_v53  ;;  %v1537_v33 = vadd.f32 %v1536_v25, %v6908_v59  ;;  %v6966_v2 = vpack.c.bf16 %v1609_v52, %v1606_v46 }
 0x54b   : > { %v1540_v31 = vpop.f32.mrb[10].mxu0  ;;  %v1539_v37 = vadd.f32 %v1538_v28, %v6912_v61 }
 0x54c   : > { %v1541_v34 = vadd.f32 %v1540_v31, %v6908_v59  ;;  %v1542_v35 = vpop.f32.mrb[11].mxu0 }
 0x54d   : > { %v1543_v38 = vadd.f32 %v1542_v35, %v6912_v61 }
 0x54e   : > { %v4760_v40 = vpack.c.bf16 %v1541_v34, %v1537_v33 }
 0x54f   : > { %v1678_v41 = vpack.c.bf16 %v1543_v38, %v1539_v37 }
 0x550   : > { %5114 = vmatmul.mubr.msk.bf16.vlgmr.msra.gmra.mrb[12].mxu1 %vm6934_vm11, %v6938_v20 }
 0x551   : > { %v1546_v45 = vpop.f32.mrb[12].mxu0  ;;  %5118 = vmatpush3.bf16.xpose.msra.mxu0 %v1678_v41  ;;  %5125 = vmatprep.mubr.msk.bf16.mxu1 %vm6197_vm9, %v6196_v53 }
 0x552   : > { %v1548_v48 = vpop.f32.mrb[13].mxu0  ;;  %5129 = vmatprep.subr.bf16.mxu0 %v6196_v53  ;;  %v1547_v54 = vadd.f32 %v1546_v45, %v6908_v59 }
 0x553   : > { %v1550_v51 = vpop.f32.mrb[14].mxu0  ;;  %v1549_v1 = vadd.f32 %v1548_v48, %v6912_v61 }
 0x554   : > { %v1551_v57 = vadd.f32 %v1550_v51, %v6908_v59  ;;  %v1552_v60 = vpop.f32.mrb[15].mxu0  ;;  %v5479_v59 = vld [vmem:[%s6736_s20 + $0x20] sm:$0xff]  }
 0x555   : > { %v1553_v62 = vadd.f32 %v1552_v60, %v6912_v61  ;;  %v6198_v61 = vmov 1966171168  }
 0x556   : > { %v4763_v3 = vpack.c.bf16 %v1551_v57, %v1547_v54  ;;  %v1685_v6 = vunpack.c.l.s4 %v6198_v61 }
 0x557   : > { %v1679_v4 = vpack.c.bf16 %v1553_v62, %v1549_v1 }
 0x558   : > { %5120 = vmatmul.mubr.msk.bf16.vlgmr.msra.gmra.mrb[16].mxu0 %vm6934_vm11, %v4760_v40  ;;  %v1686_v10 = vunpack.c.0.s8 %v1685_v6 }
 0x559   : > { %5124 = vmatpush3.bf16.xpose.msra.mxu1 %v1679_v4  ;;  %5130 = vmatpush3.bf16.xpose.msra.mxu0 %v6922_v0 }
 0x55a   : > { %5131 = vmatprep.mubr.msk.bf16.mxu0 %vm6197_vm9, %v6196_v53  ;;  %5135 = vmatprep.subr.bf16.mxu1 %v6196_v53  ;;  %v1689_v12 = vsub.s32 %v1686_v10, %v6900_v55 }
 0x55b   : > { %5141 = vmatprep.subr.bf16.mxu0 %v6196_v53 }
 0x560   : > { %5126 = vmatmul.mubr.msk.bf16.vlgmr.msra.gmra.mrb[16].mxu1 %vm6934_vm11, %v4763_v3  ;;  %5132 = vmatmul.mubr.msk.bf16.vlgmr.msra.gmra.mrb[20].mxu0 %vm6976_vm13, %v6918_v8  ;;  %v1680_v8 = vld [vmem:[#allocation5] sm:$0xf] }
 0x561   : > { %5136 = vmatpush3.bf16.xpose.msra.mxu1 %v1677_v21  ;;  %5142 = vmatpush3.bf16.xpose.msra.mxu0 %v1678_v41  ;;  %v1681_v0 = vsub.f32 1.0, %v1680_v8 }
 0x562   : > { %5137 = vmatprep.mubr.msk.bf16.mxu1 %vm6197_vm9, %v6196_v53  ;;  %5143 = vmatprep.mubr.msk.bf16.mxu0 %vm6197_vm9, %v6196_v53 }
 0x563   : > { %5147 = vmatprep.subr.bf16.mxu1 %v6196_v53  ;;  %5153 = vmatprep.subr.bf16.mxu0 %v6196_v53  ;;  %v1682_v11 = vmul.f32 -1e+09, %v1681_v0 }
 0x565   : > { %v1690_v14 = vrot.slane %v1682_v11, %v1689_v12 }
 0x567   : > { %v1698_v16 = vrot.slane %v1690_v14, %v1689_v12  ;;  %v1691_v17 = vcombine.high %v1690_v14, %v1690_v14 }
 0x568   : > { %5138 = vmatmul.mubr.msk.bf16.vlgmr.msra.gmra.mrb[20].mxu1 %vm6976_vm13, %v6938_v20  ;;  %5144 = vmatmul.mubr.msk.bf16.vlgmr.msra.gmra.mrb[24].mxu0 %vm6976_vm13, %v4760_v40 }
 0x569   : > { %5148 = vmatpush3.bf16.xpose.msra.mxu1 %v1679_v4  ;;  %5149 = vmatprep.mubr.msk.bf16.mxu1 %vm6197_vm9, %v6196_v53  ;;  %v7015_v7 = vrot.slane %v1698_v16, %v6903_v56  ;;  %v1705_v25 = vrot.slane %v1691_v17, %v1689_v12  ;;  %v1706_v38 = vcombine.high %v1698_v16, %v1698_v16 }
 0x56a   : > { %5159 = vmatprep.subr.bf16.mxu1 %v6196_v53  ;;  %5154 = vmatpush3.bf16.msk.msra.mxu0 %vm6934_vm11, %v6952_v39 }
 0x56b   : > { %5155 = vmatprep.mubr.msk.bf16.mxu0 %vm6197_vm9, %v6196_v53  ;;  %5165 = vmatprep.subr.bf16.mxu0 %v6196_v53  ;;  %v7026_v28 = vrot.slane %v1705_v25, %v6903_v56  ;;  %v2063_v42 = vrot.slane %v1706_v38, %v6903_v56  ;;  %v1707_v51 = vcombine.high %v1705_v25, %v1705_v25 }
 0x56d   : > { %v2067_v60 = vrot.slane %v1707_v51, %v6903_v56 }
 0x570   : > { %5150 = vmatmul.mubr.msk.bf16.vlgmr.msra.gmra.mrb[24].mxu1 %vm6976_vm13, %v4763_v3 }
 0x571   : > { %5160 = vmatpush3.bf16.msk.msra.mxu1 %vm6934_vm11, %v6948_v36  ;;  %5161 = vmatprep.mubr.msk.bf16.mxu1 %vm6197_vm9, %v6196_v53 }
 0x572   : > { %5171 = vmatprep.subr.bf16.mxu1 %v6196_v53 }
 0x61b   : > { %v1742_v13 = vpop.f32.mrb[8].mxu1 }
 0x61c   : > { %v2036_v15 = vmul.f32 0.125, %v1742_v13  ;;  %v5109_v20 = vpop.f32.mrb[9].mxu1 }
 0x61d   : > { %v1745_v21 = vpop.f32.mrb[10].mxu1 }
 0x61e   : > { %v2037_v22 = vmul.f32 0.125, %v1745_v21  ;;  %v5110_v23 = vpop.f32.mrb[11].mxu1  ;;  %v7018_v24 = vadd.f32 %v7015_v7, %v2036_v15 }
 0x620   : > { %v2089_v26 = vsel %vm2088_vm14, %v7018_v24, -inf  ;;  %v7023_v27 = vadd.f32 %v7015_v7, %v2037_v22 }
 0x621   : > { %2090 = vmax.xlane.f32.xlu0 %v2089_v26 }
 0x622   : > { %v2092_v32 = vsel %vm2088_vm14, %v7023_v27, -inf }
 0x623   : > { %v1783_v29 = vpop.f32.mrb[12].mxu1 }
 0x624   : > { %v2038_v30 = vmul.f32 0.125, %v1783_v29  ;;  %v5115_v31 = vpop.f32.mrb[13].mxu1 }
 0x625   : > { %2093 = vmax.xlane.f32.xlu0 %v2092_v32  ;;  %v1786_v33 = vpop.f32.mrb[14].mxu1 }
 0x626   : > { %v2039_v34 = vmul.f32 0.125, %v1786_v33  ;;  %v5116_v35 = vpop.f32.mrb[15].mxu1  ;;  %v7031_v37 = vadd.f32 %v7026_v28, %v2038_v30 }
 0x628   : > { %v2095_v40 = vsel %vm2088_vm14, %v7031_v37, -inf  ;;  %v7036_v41 = vadd.f32 %v7026_v28, %v2039_v34 }
 0x629   : > { %2096 = vmax.xlane.f32.xlu1 %v2095_v40 }
 0x62a   : > { %v2098_v46 = vsel %vm2088_vm14, %v7036_v41, -inf }
 0x62b   : > { %v1824_v43 = vpop.f32.mrb[16].mxu0 }
 0x62c   : > { %v2040_v44 = vmul.f32 0.125, %v1824_v43  ;;  %v5121_v45 = vpop.f32.mrb[17].mxu0 }
 0x62d   : > { %v1827_v47 = vpop.f32.mrb[18].mxu0  ;;  %2099 = vmax.xlane.f32.xlu1 %v2098_v46 }
 0x62e   : > { %v2041_v48 = vmul.f32 0.125, %v1827_v47  ;;  %v5122_v49 = vpop.f32.mrb[19].mxu0  ;;  %v7041_v50 = vadd.f32 %v2063_v42, %v2040_v44 }
 0x630   : > { %v2101_v52 = vsel %vm2088_vm14, %v7041_v50, -inf  ;;  %v7045_v54 = vadd.f32 %v2063_v42, %v2041_v48 }
 0x631   : > { %2102 = vmax.xlane.f32.xlu0 %v2101_v52 }
 0x632   : > { %v2104_v57 = vsel %vm2088_vm14, %v7045_v54, -inf }
 0x633   : > { %v1906_v1 = vpop.f32.mrb[20].mxu0  ;;  %2105 = vmax.xlane.f32.xlu1 %v2104_v57  ;;  %v1865_v62 = vpop.f32.mrb[16].mxu1 }
 0x634   : > { %v2044_v3 = vmul.f32 0.125, %v1906_v1  ;;  %v2042_v4 = vmul.f32 0.125, %v1865_v62  ;;  %v5127_v61 = vpop.f32.mrb[17].mxu1  ;;  %v5133_v6 = vpop.f32.mrb[21].mxu0 }
 0x635   : > { %v1868_v8 = vpop.f32.mrb[18].mxu1  ;;  %v1909_v0 = vpop.f32.mrb[22].mxu0 }
 0x636   : > { %v2043_v10 = vmul.f32 0.125, %v1868_v8  ;;  %v2045_v11 = vmul.f32 0.125, %v1909_v0  ;;  %v5134_v12 = vpop.f32.mrb[23].mxu0  ;;  %v7050_v14 = vadd.f32 %v2067_v60, %v2042_v4  ;;  %v5128_v16 = vpop.f32.mrb[19].mxu1  ;;  %v7057_v15 = vadd.f32 %v7015_v7, %v2044_v3 }
 0x638   : > { %v2107_v17 = vsel %vm2088_vm14, %v7050_v14, -inf  ;;  %v7054_v13 = vadd.f32 %v2067_v60, %v2043_v10  ;;  %v7062_v21 = vadd.f32 %v7015_v7, %v2045_v11  ;;  %v2113_v31 = vsel %vm2088_vm14, %v7057_v15, -inf }
 0x639   : > { %2108 = vmax.xlane.f32.xlu0 %v2107_v17 }
 0x63a   : > { %v2110_v20 = vsel %vm2088_vm14, %v7054_v13, -inf  ;;  %v2116_v7 = vsel %vm2088_vm14, %v7062_v21, -inf }
 0x63b   : > { %v1988_v22 = vpop.f32.mrb[24].mxu0  ;;  %2111 = vmax.xlane.f32.xlu1 %v2110_v20  ;;  %v1947_v23 = vpop.f32.mrb[20].mxu1 }
 0x63c   : > { %v2048_v25 = vmul.f32 0.125, %v1988_v22  ;;  %v2046_v26 = vmul.f32 0.125, %v1947_v23  ;;  %v5139_v29 = vpop.f32.mrb[21].mxu1  ;;  %v5145_v30 = vpop.f32.mrb[25].mxu0 }
 0x63d   : > { %v1991_v32 = vpop.f32.mrb[26].mxu0  ;;  %2114 = vmax.xlane.f32.xlu0 %v2113_v31  ;;  %v1950_v33 = vpop.f32.mrb[22].mxu1 }
 0x63e   : > { %v2049_v34 = vmul.f32 0.125, %v1991_v32  ;;  %v2047_v35 = vmul.f32 0.125, %v1950_v33  ;;  %v5140_v38 = vpop.f32.mrb[23].mxu1  ;;  %v5146_v40 = vpop.f32.mrb[27].mxu0  ;;  %v7069_v43 = vadd.f32 %v7026_v28, %v2046_v26  ;;  %v7076_v46 = vadd.f32 %v2063_v42, %v2048_v25 }
 0x63f   : > { %2117 = vmax.xlane.f32.xlu1 %v2116_v7 }
 0x640   : > { %v2119_v44 = vsel %vm2088_vm14, %v7069_v43, -inf  ;;  %v7074_v45 = vadd.f32 %v7026_v28, %v2047_v35  ;;  %v7080_v48 = vadd.f32 %v2063_v42, %v2049_v34  ;;  %v2125_v57 = vsel %vm2088_vm14, %v7076_v46, -inf }
 0x641   : > { %2120 = vmax.xlane.f32.xlu0 %v2119_v44 }
 0x642   : > { %v2122_v47 = vsel %vm2088_vm14, %v7074_v45, -inf  ;;  %v2128_v3 = vsel %vm2088_vm14, %v7080_v48, -inf }
 0x643   : > { %2123 = vmax.xlane.f32.xlu1 %v2122_v47  ;;  %v2029_v49 = vpop.f32.mrb[24].mxu1 }
 0x644   : > { %v2050_v51 = vmul.f32 0.125, %v2029_v49  ;;  %v5151_v52 = vpop.f32.mrb[25].mxu1 }
 0x645   : > { %2126 = vmax.xlane.f32.xlu0 %v2125_v57  ;;  %v2032_v1 = vpop.f32.mrb[26].mxu1 }
 0x646   : > { %v2051_v62 = vmul.f32 0.125, %v2032_v1  ;;  %v5152_v28 = vpop.f32.mrb[27].mxu1  ;;  %v7086_v4 = vadd.f32 %v2067_v60, %v2050_v51 }
 0x647   : > { %2129 = vmax.xlane.f32.xlu1 %v2128_v3 }
 0x648   : > { %v2131_v42 = vsel %vm2088_vm14, %v7086_v4, -inf  ;;  %v7090_v61 = vadd.f32 %v2067_v60, %v2051_v62 }
 0x649   : > { %2132 = vmax.xlane.f32.xlu0 %v2131_v42 }
 0x64a   : > { %v2134_v6 = vsel %vm2088_vm14, %v7090_v61, -inf }
 0x64b   : > { %2135 = vmax.xlane.f32.xlu1 %v2134_v6 }
 0x6ae   : > { %v2091_v8 = vpop.xlane.xlu0 %2090 }
 0x6af   : > { %v2137_v0 = vsub.f32 %v7018_v24, %v2091_v8 }
 0x6b1   : > { %v2153_v10 = vmul.f32 1.442695, %v2137_v0 }
 0x6b2   : > { %v2094_v11 = vpop.xlane.xlu0 %2093 }
 0x6b3   : > { %5563 = vpow2.f32 %v2153_v10  ;;  %v2138_v12 = vsub.f32 %v7023_v27, %v2094_v11 }
 0x6b5   : > { %v2155_v16 = vmul.f32 1.442695, %v2138_v12 }
 0x6b6   : > { %v2097_v17 = vpop.xlane.xlu1 %2096 }
 0x6b7   : > { %5565 = vpow2.f32 %v2155_v16  ;;  %v2139_v20 = vsub.f32 %v7031_v37, %v2097_v17 }
 0x6b9   : > { %v2157_v60 = vmul.f32 1.442695, %v2139_v20 }
 0x6ba   : > { %v2100_v22 = vpop.xlane.xlu1 %2099 }
 0x6bb   : > { %5567 = vpow2.f32 %v2157_v60  ;;  %v2140_v23 = vsub.f32 %v7036_v41, %v2100_v22 }
 0x6bd   : > { %v7098_v25 = vpop.eup %5563  ;;  %v2159_v26 = vmul.f32 1.442695, %v2140_v23 }
 0x6be   : > { %v2103_v29 = vpop.xlane.xlu0 %2102  ;;  %v2185_v24 = vsel %vm2088_vm14, %v7098_v25, 0.0 }
 0x6bf   : > { %5569 = vpow2.f32 %v2159_v26  ;;  %v2141_v27 = vsub.f32 %v7041_v50, %v2103_v29  ;;  %2186 = vadd.xlane.f32.xlu0 %v2185_v24 }
 0x6c0   : > { %v2106_v30 = vpop.xlane.xlu1 %2105 }
 0x6c1   : > { %v7103_v31 = vpop.eup %5565  ;;  %v2161_v37 = vmul.f32 1.442695, %v2141_v27  ;;  %v2142_v32 = vsub.f32 %v7045_v54, %v2106_v30 }
 0x6c2   : > { %v2188_v41 = vsel %vm2088_vm14, %v7103_v31, 0.0 }
 0x6c3   : > { %5571 = vpow2.f32 %v2161_v37  ;;  %v2163_v33 = vmul.f32 1.442695, %v2142_v32  ;;  %2189 = vadd.xlane.f32.xlu1 %v2188_v41 }
 0x6c5   : > { %v7108_v34 = vpop.eup %5567  ;;  %5573 = vpow2.f32 %v2163_v33 }
 0x6c6   : > { %v2109_v35 = vpop.xlane.xlu0 %2108  ;;  %v2191_v50 = vsel %vm2088_vm14, %v7108_v34, 0.0 }
 0x6c7   : > { %v2143_v38 = vsub.f32 %v7050_v14, %v2109_v35  ;;  %2192 = vadd.xlane.f32.xlu0 %v2191_v50 }
 0x6c8   : > { %v2112_v40 = vpop.xlane.xlu1 %2111 }
 0x6c9   : > { %v7113_v7 = vpop.eup %5569  ;;  %v2165_v54 = vmul.f32 1.442695, %v2143_v38  ;;  %v2144_v44 = vsub.f32 %v7054_v13, %v2112_v40 }
 0x6ca   : > { %v2115_v47 = vpop.xlane.xlu0 %2114  ;;  %v2194_v49 = vsel %vm2088_vm14, %v7113_v7, 0.0 }
 0x6cb   : > { %5575 = vpow2.f32 %v2165_v54  ;;  %v2167_v51 = vmul.f32 1.442695, %v2144_v44  ;;  %v2145_v52 = vsub.f32 %v7057_v15, %v2115_v47  ;;  %2195 = vadd.xlane.f32.xlu1 %v2194_v49 }
 0x6cc   : > { %v2118_v57 = vpop.xlane.xlu1 %2117 }
 0x6cd   : > { %v7119_v1 = vpop.eup %5571  ;;  %5577 = vpow2.f32 %v2167_v51  ;;  %v2169_v14 = vmul.f32 1.442695, %v2145_v52  ;;  %v2146_v62 = vsub.f32 %v7062_v21, %v2118_v57 }
 0x6ce   : > { %v2121_v28 = vpop.xlane.xlu0 %2120  ;;  %v2197_v13 = vsel %vm2088_vm14, %v7119_v1, 0.0 }
 0x6cf   : > { %v7124_v3 = vpop.eup %5573  ;;  %5579 = vpow2.f32 %v2169_v14  ;;  %v2171_v42 = vmul.f32 1.442695, %v2146_v62  ;;  %v2147_v6 = vsub.f32 %v7069_v43, %v2121_v28  ;;  %2198 = vadd.xlane.f32.xlu0 %v2197_v13 }
 0x6d0   : > { %v2124_v15 = vpop.xlane.xlu1 %2123  ;;  %v2200_v8 = vsel %vm2088_vm14, %v7124_v3, 0.0 }
 0x6d1   : > { %5581 = vpow2.f32 %v2171_v42  ;;  %v2173_v0 = vmul.f32 1.442695, %v2147_v6  ;;  %v2148_v10 = vsub.f32 %v7074_v45, %v2124_v15  ;;  %2201 = vadd.xlane.f32.xlu1 %v2200_v8 }
 0x6d2   : > { %v2127_v21 = vpop.xlane.xlu0 %2126 }
 0x6d3   : > { %5583 = vpow2.f32 %v2173_v0  ;;  %v2175_v11 = vmul.f32 1.442695, %v2148_v10  ;;  %v2149_v12 = vsub.f32 %v7076_v46, %v2127_v21 }
 0x6d4   : > { %v2130_v16 = vpop.xlane.xlu1 %2129 }
 0x6d5   : > { %v7131_v17 = vpop.eup %5575  ;;  %5585 = vpow2.f32 %v2175_v11  ;;  %v2177_v43 = vmul.f32 1.442695, %v2149_v12  ;;  %v2150_v20 = vsub.f32 %v7080_v48, %v2130_v16 }
 0x6d6   : > { %v2133_v60 = vpop.xlane.xlu0 %2132  ;;  %v2203_v22 = vsel %vm2088_vm14, %v7131_v17, 0.0 }
 0x6d7   : > { %v7136_v23 = vpop.eup %5577  ;;  %5587 = vpow2.f32 %v2177_v43  ;;  %v2179_v45 = vmul.f32 1.442695, %v2150_v20  ;;  %v2151_v26 = vsub.f32 %v7086_v4, %v2133_v60  ;;  %2204 = vadd.xlane.f32.xlu0 %v2203_v22 }
 0x6d8   : > { %v2136_v29 = vpop.xlane.xlu1 %2135  ;;  %v2206_v46 = vsel %vm2088_vm14, %v7136_v23, 0.0 }
 0x6d9   : > { %v7141_v24 = vpop.eup %5579  ;;  %5589 = vpow2.f32 %v2179_v45  ;;  %v2181_v27 = vmul.f32 1.442695, %v2151_v26  ;;  %v2152_v48 = vsub.f32 %v7090_v61, %v2136_v29  ;;  %2207 = vadd.xlane.f32.xlu1 %v2206_v46 }
 0x6da   : > { %v2209_v30 = vsel %vm2088_vm14, %v7141_v24, 0.0 }
 0x6db   : > { %v7146_v37 = vpop.eup %5581  ;;  %5591 = vpow2.f32 %v2181_v27  ;;  %v2183_v32 = vmul.f32 1.442695, %v2152_v48  ;;  %2210 = vadd.xlane.f32.xlu0 %v2209_v30 }
 0x6dc   : > { %v2212_v4 = vsel %vm2088_vm14, %v7146_v37, 0.0 }
 0x6dd   : > { %v7150_v41 = vpop.eup %5583  ;;  %5593 = vpow2.f32 %v2183_v32  ;;  %2213 = vadd.xlane.f32.xlu1 %v2212_v4 }
 0x6de   : > { %v2215_v33 = vsel %vm2088_vm14, %v7150_v41, 0.0 }
 0x6df   : > { %v7154_v61 = vpop.eup %5585  ;;  %2216 = vadd.xlane.f32.xlu0 %v2215_v33 }
 0x6e0   : > { %v2218_v35 = vsel %vm2088_vm14, %v7154_v61, 0.0 }
 0x6e1   : > { %v7158_v50 = vpop.eup %5587  ;;  %2219 = vadd.xlane.f32.xlu1 %v2218_v35 }
 0x6e2   : > { %v2221_v38 = vsel %vm2088_vm14, %v7158_v50, 0.0 }
 0x6e3   : > { %v7162_v40 = vpop.eup %5589  ;;  %2222 = vadd.xlane.f32.xlu0 %v2221_v38 }
 0x6e4   : > { %v2224_v54 = vsel %vm2088_vm14, %v7162_v40, 0.0 }
 0x6e5   : > { %v7166_v44 = vpop.eup %5591  ;;  %2225 = vadd.xlane.f32.xlu1 %v2224_v54 }
 0x6e6   : > { %v2227_v47 = vsel %vm2088_vm14, %v7166_v44, 0.0 }
 0x6e7   : > { %v7170_v49 = vpop.eup %5593  ;;  %2228 = vadd.xlane.f32.xlu0 %v2227_v47 }
 0x6e8   : > { %v2230_v51 = vsel %vm2088_vm14, %v7170_v49, 0.0 }
 0x6e9   : > { %2231 = vadd.xlane.f32.xlu1 %v2230_v51 }
 0x74c   : > { %v2187_v52 = vpop.xlane.xlu0 %2186 }
 0x74d   : > { %5595 = vrcp.f32 %v2187_v52 }
 0x750   : > { %v2190_v57 = vpop.xlane.xlu1 %2189 }
 0x751   : > { %5597 = vrcp.f32 %v2190_v57 }
 0x754   : > { %v2193_v14 = vpop.xlane.xlu0 %2192 }
 0x755   : > { %5599 = vrcp.f32 %v2193_v14  ;;  %v5476_v14 = vld [vmem:[%s6736_s20 + $0x8] sm:$0xff]  }
 0x757   : > { %v5596_v28 = vpop.eup %5595 }
 0x758   : > { %v2196_v62 = vpop.xlane.xlu1 %2195  ;;  %v2249_v42 = vmul.f32 %v5596_v28, %v7098_v25 }
 0x759   : > { %5601 = vrcp.f32 %v2196_v62 }
 0x75b   : > { %v5598_v13 = vpop.eup %5597 }
 0x75c   : > { %v2250_v6 = vmul.f32 %v5598_v13, %v7103_v31  ;;  %v2199_v15 = vpop.xlane.xlu0 %2198  ;;  %v5482_v13 = vld [vmem:[%s6736_s20 + $0x38] sm:$0xff]  }
 0x75d   : > { %5603 = vrcp.f32 %v2199_v15 }
 0x75e   : > { %v2202_v8 = vpop.xlane.xlu1 %2201  ;;  %v2265_v0 = vpack.c.bf16 %v2250_v6, %v2249_v42 }
 0x75f   : > { %5605 = vrcp.f32 %v2202_v8  ;;  %v5600_v10 = vpop.eup %5599 }
 0x760   : > { %5156 = vmatmul.mubr.msk.bf16.vlgmr.msra.gmra.mrb[28].mxu0 %vm2088_vm14, %v2265_v0  ;;  %v2251_v31 = vmul.f32 %v5600_v10, %v7108_v34 }
 0x761   : > { %5166 = vmatpush3.bf16.msk.msra.mxu0 %vm6934_vm11, %v6966_v2  ;;  %5167 = vmatprep.mubr.msk.bf16.mxu0 %vm6197_vm9, %v6196_v53 }
 0x762   : > { %5177 = vmatprep.subr.bf16.mxu0 %v6196_v53 }
 0x763   : > { %v5602_v25 = vpop.eup %5601 }
 0x764   : > { %v2252_v21 = vmul.f32 %v5602_v25, %v7113_v7  ;;  %v2205_v11 = vpop.xlane.xlu0 %2204 }
 0x765   : > { %5607 = vrcp.f32 %v2205_v11 }
 0x766   : > { %v2208_v12 = vpop.xlane.xlu1 %2207  ;;  %v2266_v16 = vpack.c.bf16 %v2252_v21, %v2251_v31 }
 0x767   : > { %v5604_v43 = vpop.eup %5603  ;;  %5609 = vrcp.f32 %v2208_v12 }
 0x768   : > { %v2211_v20 = vpop.xlane.xlu0 %2210  ;;  %5162 = vmatmul.mubr.msk.bf16.vlgmr.msra.gmra.mrb[28].mxu1 %vm2088_vm14, %v2266_v16  ;;  %v2253_v34 = vmul.f32 %v5604_v43, %v7119_v1 }
 0x769   : > { %v5606_v60 = vpop.eup %5605  ;;  %5611 = vrcp.f32 %v2211_v20  ;;  %5172 = vmatpush3.bf16.msk.msra.mxu1 %vm6934_vm11, %v6962_v63  ;;  %5173 = vmatprep.mubr.msk.bf16.mxu1 %vm6197_vm9, %v6196_v53 }
 0x76a   : > { %v2254_v7 = vmul.f32 %v5606_v60, %v7124_v3  ;;  %v2214_v22 = vpop.xlane.xlu1 %2213  ;;  %5183 = vmatprep.subr.bf16.mxu1 %v6196_v53 }
 0x76b   : > { %5613 = vrcp.f32 %v2214_v22 }
 0x76c   : > { %v2217_v45 = vpop.xlane.xlu0 %2216  ;;  %v2267_v26 = vpack.c.bf16 %v2254_v7, %v2253_v34 }
 0x76d   : > { %5615 = vrcp.f32 %v2217_v45 }
 0x76e   : > { %5168 = vmatmul.mubr.msk.bf16.vlgmr.msra.gmra.mrb[32].mxu0 %vm2088_vm14, %v2267_v26  ;;  %v2220_v29 = vpop.xlane.xlu1 %2219 }
 0x76f   : > { %v5608_v46 = vpop.eup %5607  ;;  %5178 = vmatpush3.bf16.msk.msra.mxu0 %vm6976_vm13, %v6952_v39  ;;  %5617 = vrcp.f32 %v2220_v29  ;;  %5179 = vmatprep.mubr.msk.bf16.mxu0 %vm6197_vm9, %v6196_v53  ;;  %v4809_v29 = vld [vmem:[%s979_s28] ss:$0 sm:$0xff]  ;;  %s8181_s28 = scalar_lea.vmem [#allocation16], %s6726_s19 }
 0x770   : > { %v2223_v19 = vpop.xlane.xlu0 %2222  ;;  %5189 = vmatprep.subr.bf16.mxu0 %v6196_v53  ;;  %v2255_v3 = vmul.f32 %v5608_v46, %v7131_v17 }
 0x771   : > { %v5610_v1 = vpop.eup %5609  ;;  %5619 = vrcp.f32 %v2223_v19 }
 0x772   : > { %v2256_v27 = vmul.f32 %v5610_v1, %v7136_v23  ;;  %v2226_v48 = vpop.xlane.xlu1 %2225  ;;  %v5475_v23 = vld [vmem:[%s6736_s20] sm:$0xff]  }
 0x773   : > { %v5612_v30 = vpop.eup %5611  ;;  %5621 = vrcp.f32 %v2226_v48 }
 0x774   : > { %v2229_v32 = vpop.xlane.xlu0 %2228  ;;  %v2268_v4 = vpack.c.bf16 %v2256_v27, %v2255_v3  ;;  %v2257_v33 = vmul.f32 %v5612_v30, %v7141_v24 }
 0x775   : > { %v5614_v39 = vpop.eup %5613  ;;  %5623 = vrcp.f32 %v2229_v32  ;;  %v5723_v32 = vld [vmem:[#allocation2] sm:$0xff] }
 0x776   : > { %v2258_v35 = vmul.f32 %v5614_v39, %v7146_v37  ;;  %5174 = vmatmul.mubr.msk.bf16.vlgmr.msra.gmra.mrb[32].mxu1 %vm2088_vm14, %v2268_v4  ;;  %v2232_v38 = vpop.xlane.xlu1 %2231 }
 0x777   : > { %v5616_v54 = vpop.eup %5615  ;;  %5184 = vmatpush3.bf16.msk.msra.mxu1 %vm6976_vm13, %v6948_v36  ;;  %5625 = vrcp.f32 %v2232_v38  ;;  %5185 = vmatprep.mubr.msk.bf16.mxu1 %vm6197_vm9, %v6196_v53 }
 0x778   : > { %v2269_v17 = vpack.c.bf16 %v2258_v35, %v2257_v33  ;;  %5195 = vmatprep.subr.bf16.mxu1 %v6196_v53  ;;  %v2259_v24 = vmul.f32 %v5616_v54, %v7150_v41  ;;  %v5724_v33 = vld [vmem:[#allocation2 + $0x8] sm:$0xff]  ;;  %v5725_v54 = vld [vmem:[#allocation2 + $0x10] sm:$0xff] }
 0x779   : > { %v5618_v47 = vpop.eup %5617 }
 0x77a   : > { %v2260_v37 = vmul.f32 %v5618_v47, %v7154_v61  ;;  %5180 = vmatmul.mubr.msk.bf16.vlgmr.msra.gmra.mrb[28].mxu0 %vm2088_vm14, %v2269_v17 }
 0x77b   : > { %v5620_v51 = vpop.eup %5619  ;;  %5190 = vmatpush3.bf16.msk.msra.mxu0 %vm6976_vm13, %v6966_v2  ;;  %5191 = vmatprep.mubr.msk.bf16.mxu0 %vm6197_vm9, %v6196_v53 }
 0x77c   : > { %v2270_v36 = vpack.c.bf16 %v2260_v37, %v2259_v24  ;;  %5201 = vmatprep.subr.bf16.mxu0 %v5475_v23  ;;  %v2261_v57 = vmul.f32 %v5620_v51, %v7158_v50  ;;  %v5726_v37 = vld [vmem:[#allocation2 + $0x18] sm:$0xff] }
 0x77d   : > { %v5622_v52 = vpop.eup %5621 }
 0x77e   : > { %v2262_v41 = vmul.f32 %v5622_v52, %v7162_v40  ;;  %5186 = vmatmul.mubr.msk.bf16.vlgmr.msra.gmra.mrb[28].mxu1 %vm2088_vm14, %v2270_v36 }
 0x77f   : > { %v5624_v61 = vpop.eup %5623  ;;  %5196 = vmatpush3.bf16.msk.msra.mxu1 %vm6976_vm13, %v6962_v63  ;;  %5197 = vmatprep.mubr.msk.bf16.mxu1 %vm6197_vm9, %v6196_v53  ;;  %v5477_v63 = vld [vmem:[%s6736_s20 + $0x10] sm:$0xff]   ;;  %v5478_v53 = vld [vmem:[%s6736_s20 + $0x18] sm:$0xff]  }
 0x780   : > { %v2271_v2 = vpack.c.bf16 %v2262_v41, %v2261_v57  ;;  %v2263_v28 = vmul.f32 %v5624_v61, %v7166_v44  ;;  %v5480_v44 = vld [vmem:[%s6736_s20 + $0x28] sm:$0xff]   ;;  %v5727_v41 = vld [vmem:[#allocation2 + $0x20] sm:$0xff] }
 0x781   : > { %v5626_v62 = vpop.eup %5625 }
 0x782   : > { %v2264_v50 = vmul.f32 %v5626_v62, %v7170_v49  ;;  %5192 = vmatmul.mubr.msk.bf16.vlgmr.msra.gmra.mrb[32].mxu0 %vm2088_vm14, %v2271_v2  ;;  %v5481_v49 = vld [vmem:[%s6736_s20 + $0x30] sm:$0xff]  }
 0x783   : > { %5202 = vmatpush3.bf16.msra.mxu0 %v5475_v23 }
 0x784   : > { %v2272_v40 = vpack.c.bf16 %v2264_v50, %v2263_v28  ;;  %5203 = vmatprep.subr.bf16.mxu0 %v5476_v14  ;;  %v5729_v28 = vld [vmem:[#allocation2 + $0x30] sm:$0xff] }
 0x786   : > { %5198 = vmatmul.mubr.msk.bf16.vlgmr.msra.gmra.mrb[32].mxu1 %vm2088_vm14, %v2272_v40  ;;  %v5730_v40 = vld [vmem:[#allocation2 + $0x38] sm:$0xff] }
 0x787   : > { %5204 = vmatpush3.bf16.msra.mxu0 %v5476_v14  ;;  %3150 = vmatprep.mubr.bf16.mxu1 %v6195_v18  ;;  %v5728_v14 = vld [vmem:[#allocation2 + $0x28] sm:$0xff] }
 0x788   : > { %5205 = vmatprep.subr.bf16.mxu0 %v5477_v63 }
 0x78b   : > { %5206 = vmatpush3.bf16.msra.mxu0 %v5477_v63 }
 0x78c   : > { %5207 = vmatprep.subr.bf16.mxu0 %v5478_v53 }
 0x78f   : > { %5208 = vmatpush3.bf16.msra.mxu0 %v5478_v53  ;;  %v5483_v53 = vld [vmem:[%s6745_s13] ss:$16 sps:$4 sm:$0xff]  }
 0x790   : > { %5209 = vmatprep.subr.bf16.mxu0 %v5479_v59 }
 0x793   : > { %5210 = vmatpush3.bf16.msra.mxu0 %v5479_v59  ;;  %v5485_v59 = vld [vmem:[%s6745_s13 + $0x4] ss:$16 sps:$4 sm:$0xff]  }
 0x794   : > { %5211 = vmatprep.subr.bf16.mxu0 %v5480_v44  ;;  %3118 = vmatprep.subr.bf16.mxu1 %v5485_v59  ;;  %v5522_v59 = vld [vmem:[%s6745_s13 + $0xc8] ss:$16 sps:$4 sm:$0xff]  }
 0x795   : > { %3119 = vmatpush1.bf16.msra.mxu1 %v5483_v53  ;;  %v5519_v53 = vld [vmem:[%s6745_s13 + $0xc0] ss:$16 sps:$4 sm:$0xff]  }
 0x797   : > { %5212 = vmatpush3.bf16.msra.mxu0 %v5480_v44  ;;  %v5486_v44 = vld [vmem:[%s6745_s13 + $0x8] ss:$16 sps:$4 sm:$0xff]  }
 0x798   : > { %5213 = vmatprep.subr.bf16.mxu0 %v5481_v49 }
 0x79b   : > { %5214 = vmatpush3.bf16.msra.mxu0 %v5481_v49  ;;  %v5488_v49 = vld [vmem:[%s6745_s13 + $0xc] ss:$16 sps:$4 sm:$0xff]  }
 0x79c   : > { %5215 = vmatprep.subr.bf16.mxu0 %v5482_v13 }
 0x79f   : > { %5216 = vmatpush3.bf16.msra.mxu0 %v5482_v13  ;;  %v5491_v13 = vld [vmem:[%s6745_s13 + $0x24] ss:$16 sps:$4 sm:$0xff]  }
 0x7a0   : > { %3191 = vmatprep.subr.bf16.mxu0 %v5488_v49  ;;  %3120 = vmatprep.subr.bf16.mxu1 %v5491_v13  ;;  %v5525_v49 = vld [vmem:[%s6745_s13 + $0xe0] ss:$16 sps:$4 sm:$0xff]   ;;  %v5528_v13 = vld [vmem:[%s6745_s13 + $0xe8] ss:$16 sps:$4 sm:$0xff]  }
 0x84d   : > { %v2486_v42 = vpop.f32.mrb[28].mxu0 }
 0x84e   : > { %v5181_v6 = vpop.f32.mrb[29].mxu0 }
 0x84f   : > { %v2489_v15 = vpop.f32.mrb[30].mxu0  ;;  %v5489_v6 = vld [vmem:[%s6745_s13 + $0x20] ss:$16 sps:$4 sm:$0xff]  }
 0x850   : > { %v2633_v8 = vpack.c.bf16 %v2489_v15, %v2486_v42  ;;  %v5182_v0 = vpop.f32.mrb[31].mxu0  ;;  %v5494_v42 = vld [vmem:[%s6745_s13 + $0x2c] ss:$16 sps:$4 sm:$0xff]   ;;  %v5492_v15 = vld [vmem:[%s6745_s13 + $0x28] ss:$16 sps:$4 sm:$0xff]   ;;  %3121 = vmatpush1.bf16.msra.mxu1 %v5489_v6 }
 0x851   : > { %v2530_v10 = vpop.f32.mrb[28].mxu1 }
 0x852   : > { %v5187_v25 = vpop.f32.mrb[29].mxu1  ;;  %5217 = vmatprep.mubr.bf16.mxu0 %v2633_v8 }
 0x853   : > { %v2533_v31 = vpop.f32.mrb[30].mxu1 }
 0x854   : > { %v2634_v21 = vpack.c.bf16 %v2533_v31, %v2530_v10  ;;  %v5188_v11 = vpop.f32.mrb[31].mxu1 }
 0x855   : > { %v2574_v12 = vpop.f32.mrb[32].mxu0 }
 0x856   : > { %v5193_v16 = vpop.f32.mrb[33].mxu0  ;;  %5218 = vmatmul.mubr.bf16.vlgmr.msra.gmra.mrb[36].mxu0 %v2634_v21 }
 0x857   : > { %v2577_v43 = vpop.f32.mrb[34].mxu0  ;;  %3192 = vmatpush1.bf16.msra.mxu0 %v5486_v44  ;;  %v5527_v44 = vld [vmem:[%s6745_s13 + $0xe4] ss:$16 sps:$4 sm:$0xff]  }
 0x858   : > { %v2635_v20 = vpack.c.bf16 %v2577_v43, %v2574_v12  ;;  %v5194_v60 = vpop.f32.mrb[35].mxu0  ;;  %3193 = vmatprep.subr.bf16.mxu0 %v5494_v42  ;;  %v5530_v42 = vld [vmem:[%s6745_s13 + $0xec] ss:$16 sps:$4 sm:$0xff]  }
 0x859   : > { %v2618_v34 = vpop.f32.mrb[32].mxu1 }
 0x85a   : > { %v5199_v7 = vpop.f32.mrb[33].mxu1  ;;  %5221 = vmatprep.mubr.bf16.mxu0 %v2635_v20 }
 0x85b   : > { %v2621_v22 = vpop.f32.mrb[34].mxu1  ;;  %3194 = vmatpush1.bf16.msra.mxu0 %v5492_v15 }
 0x85c   : > { %v2636_v45 = vpack.c.bf16 %v2621_v22, %v2618_v34  ;;  %v5200_v26 = vpop.f32.mrb[35].mxu1 }
 0x85e   : > { %5222 = vmatmul.mubr.bf16.gmra.mrb[40].mxu0 %v2636_v45 }
 0x85f   : > { %3223 = vmatprep.mubr.bf16.mxu0 %v6195_v18 }
 0x929   : > { %v5219_v46 = vpop.f32.mrb[36].mxu0 }
 0x92a   : > { %v2742_v19 = vpop.f32.mrb[37].mxu0  ;;  %v2751_v48 = vadd.f32 %v5219_v46, %v4809_v29 }
 0x92b   : > { %v2743_v1 = vadd.f32 %v4809_v29, %v2742_v19  ;;  %v5220_v3 = vpop.f32.mrb[38].mxu0 }
 0x92c   : > { %v2745_v27 = vpop.f32.mrb[39].mxu0  ;;  %v2754_v39 = vadd.f32 %v5220_v3, %v4809_v29  ;;  %v2775_v17 = vadd.f32 %v5725_v54, %v2751_v48 }
 0x92d   : > { %v2746_v30 = vadd.f32 %v4809_v29, %v2745_v27  ;;  %v2773_v4 = vadd.f32 %v5723_v32, %v2743_v1 }
 0x92e   : > { %v2776_v51 = vadd.f32 %v5726_v37, %v2754_v39  ;;  %v5503_v37 = vld [vmem:[%s6745_s13 + $0x64] ss:$16 sps:$4 sm:$0xff]  }
 0x92f   : > { %2783 = vadd.xlane.f32.xlu0 %v2773_v4  ;;  %v2774_v35 = vadd.f32 %v5724_v33, %v2746_v30 }
 0x931   : > { %2785 = vadd.xlane.f32.xlu1 %v2774_v35  ;;  %v5223_v38 = vpop.f32.mrb[40].mxu0 }
 0x932   : > { %v2758_v23 = vpop.f32.mrb[41].mxu0  ;;  %v2767_v52 = vadd.f32 %v5223_v38, %v4809_v29 }
 0x933   : > { %v2759_v47 = vadd.f32 %v4809_v29, %v2758_v23  ;;  %2787 = vadd.xlane.f32.xlu0 %v2775_v17  ;;  %v5224_v24 = vpop.f32.mrb[42].mxu0  ;;  %v5500_v23 = vld [vmem:[%s6745_s13 + $0x4c] ss:$16 sps:$4 sm:$0xff]  }
 0x934   : > { %v2761_v36 = vpop.f32.mrb[43].mxu0  ;;  %v2770_v2 = vadd.f32 %v5224_v24, %v4809_v29  ;;  %v2779_v50 = vadd.f32 %v5729_v28, %v2767_v52  ;;  %v5498_v24 = vld [vmem:[%s6745_s13 + $0x48] ss:$16 sps:$4 sm:$0xff]   ;;  %3195 = vmatprep.subr.bf16.mxu0 %v5500_v23  ;;  %v5513_v28 = vld [vmem:[%s6745_s13 + $0xa0] ss:$16 sps:$4 sm:$0xff]  }
 0x935   : > { %v2762_v57 = vadd.f32 %v4809_v29, %v2761_v36  ;;  %2789 = vadd.xlane.f32.xlu1 %v2776_v51  ;;  %v2777_v61 = vadd.f32 %v5727_v41, %v2759_v47  ;;  %v5495_v47 = vld [vmem:[%s6745_s13 + $0x40] ss:$16 sps:$4 sm:$0xff]   ;;  %3196 = vmatpush1.bf16.msra.mxu0 %v5498_v24  ;;  %v5504_v52 = vld [vmem:[%s6745_s13 + $0x68] ss:$16 sps:$4 sm:$0xff]   ;;  %v5512_v41 = vld [vmem:[%s6745_s13 + $0x8c] ss:$16 sps:$4 sm:$0xff]  }
 0x936   : > { %v2780_v63 = vadd.f32 %v5730_v40, %v2770_v2  ;;  %v5501_v36 = vld [vmem:[%s6745_s13 + $0x60] ss:$16 sps:$4 sm:$0xff]   ;;  %v5510_v2 = vld [vmem:[%s6745_s13 + $0x88] ss:$16 sps:$4 sm:$0xff]   ;;  %v5521_v40 = vld [vmem:[%s6745_s13 + $0xc4] ss:$16 sps:$4 sm:$0xff]  }
 0x937   : > { %2791 = vadd.xlane.f32.xlu0 %v2777_v61  ;;  %v2778_v62 = vadd.f32 %v5728_v14, %v2762_v57  ;;  %v5509_v57 = vld [vmem:[%s6745_s13 + $0x84] ss:$16 sps:$4 sm:$0xff]  }
 0x938   : > { %v5515_v14 = vld [vmem:[%s6745_s13 + $0xa4] ss:$16 sps:$4 sm:$0xff]  }
 0x939   : > { %2793 = vadd.xlane.f32.xlu1 %v2778_v62 }
 0x93b   : > { %2795 = vadd.xlane.f32.xlu0 %v2779_v50 }
 0x93d   : > { %2797 = vadd.xlane.f32.xlu1 %v2780_v63 }
 0x9bc   : > { %v2784_v8 = vpop.xlane.xlu0 %2783 }
 0x9bd   : > { %v2800_v0 = vmul.f32 0.0078125, %v2784_v8 }
 0x9be   : > { %v2786_v10 = vpop.xlane.xlu1 %2785 }
 0x9bf   : > { %v7255_v25 = vsub.f32 %v2773_v4, %v2800_v0  ;;  %v2801_v31 = vmul.f32 0.0078125, %v2786_v10 }
 0x9c0   : > { %v2788_v21 = vpop.xlane.xlu0 %2787 }
 0x9c1   : > { %v7257_v11 = vsub.f32 %v2774_v35, %v2801_v31  ;;  %v2802_v12 = vmul.f32 0.0078125, %v2788_v21  ;;  %v2816_v16 = vmul.f32 %v7255_v25, %v7255_v25 }
 0x9c2   : > { %v2790_v43 = vpop.xlane.xlu1 %2789 }
 0x9c3   : > { %v7261_v20 = vsub.f32 %v2775_v17, %v2802_v12  ;;  %v2803_v60 = vmul.f32 0.0078125, %v2790_v43  ;;  %2824 = vadd.xlane.f32.xlu0 %v2816_v16  ;;  %v2817_v34 = vmul.f32 %v7257_v11, %v7257_v11  ;;  %v5497_v17 = vld [vmem:[%s6745_s13 + $0x44] ss:$16 sps:$4 sm:$0xff]  }
 0x9c4   : > { %v2792_v7 = vpop.xlane.xlu0 %2791  ;;  %3122 = vmatprep.subr.bf16.mxu1 %v5497_v17 }
 0x9c5   : > { %v7265_v22 = vsub.f32 %v2776_v51, %v2803_v60  ;;  %v2804_v45 = vmul.f32 0.0078125, %v2792_v7  ;;  %2826 = vadd.xlane.f32.xlu1 %v2817_v34  ;;  %v2818_v26 = vmul.f32 %v7261_v20, %v7261_v20  ;;  %3123 = vmatpush1.bf16.msra.mxu1 %v5495_v47  ;;  %v5506_v51 = vld [vmem:[%s6745_s13 + $0x6c] ss:$16 sps:$4 sm:$0xff]  }
 0x9c6   : > { %v2794_v29 = vpop.xlane.xlu1 %2793  ;;  %3124 = vmatprep.subr.bf16.mxu1 %v5503_v37  ;;  %3197 = vmatprep.subr.bf16.mxu0 %v5506_v51  ;;  %v4819_v37 = vld [vmem:[%s8181_s28] ss:$0 sm:$0xff] }
 0x9c7   : > { %v7269_v46 = vsub.f32 %v2777_v61, %v2804_v45  ;;  %v2805_v19 = vmul.f32 0.0078125, %v2794_v29  ;;  %2828 = vadd.xlane.f32.xlu0 %v2818_v26  ;;  %v2819_v1 = vmul.f32 %v7265_v22, %v7265_v22  ;;  %3198 = vmatpush1.bf16.msra.mxu0 %v5504_v52  ;;  %v5507_v61 = vld [vmem:[%s6745_s13 + $0x80] ss:$16 sps:$4 sm:$0xff]  }
 0x9c8   : > { %v2796_v3 = vpop.xlane.xlu0 %2795  ;;  %3199 = vmatprep.subr.bf16.mxu0 %v5512_v41 }
 0x9c9   : > { %v7273_v27 = vsub.f32 %v2778_v62, %v2805_v19  ;;  %v2806_v48 = vmul.f32 0.0078125, %v2796_v3  ;;  %2830 = vadd.xlane.f32.xlu1 %v2819_v1  ;;  %v2820_v30 = vmul.f32 %v7269_v46, %v7269_v46  ;;  %3125 = vmatpush1.bf16.msra.mxu1 %v5501_v36  ;;  %v5518_v62 = vld [vmem:[%s6745_s13 + $0xac] ss:$16 sps:$4 sm:$0xff]  }
 0x9ca   : > { %v2798_v32 = vpop.xlane.xlu1 %2797  ;;  %3126 = vmatprep.subr.bf16.mxu1 %v5509_v57 }
 0x9cb   : > { %v7277_v4 = vsub.f32 %v2779_v50, %v2806_v48  ;;  %v2807_v39 = vmul.f32 0.0078125, %v2798_v32  ;;  %2832 = vadd.xlane.f32.xlu0 %v2820_v30  ;;  %v2821_v33 = vmul.f32 %v7273_v27, %v7273_v27  ;;  %3200 = vmatpush1.bf16.msra.mxu0 %v5510_v2  ;;  %v5516_v50 = vld [vmem:[%s6745_s13 + $0xa8] ss:$16 sps:$4 sm:$0xff]  }
 0x9cc   : > { %3201 = vmatprep.subr.bf16.mxu0 %v5518_v62 }
 0x9cd   : > { %v7281_v35 = vsub.f32 %v2780_v63, %v2807_v39  ;;  %2834 = vadd.xlane.f32.xlu1 %v2821_v33  ;;  %v2822_v38 = vmul.f32 %v7277_v4, %v7277_v4  ;;  %3127 = vmatpush1.bf16.msra.mxu1 %v5507_v61  ;;  %v5524_v63 = vld [vmem:[%s6745_s13 + $0xcc] ss:$16 sps:$4 sm:$0xff]   ;;  %s8180_s13 = scalar_lea.vmem [#allocation14], %s6726_s19 }
 0x9ce   : > { %3128 = vmatprep.subr.bf16.mxu1 %v5515_v14  ;;  %v4818_v39 = vld [vmem:[%s8180_s13] ss:$0 sm:$0xff] }
 0x9cf   : > { %2836 = vadd.xlane.f32.xlu0 %v2822_v38  ;;  %v2823_v54 = vmul.f32 %v7281_v35, %v7281_v35  ;;  %3202 = vmatpush1.bf16.msra.mxu0 %v5516_v50 }
 0x9d0   : > { %3203 = vmatprep.subr.bf16.mxu0 %v5524_v63 }
 0x9d1   : > { %2838 = vadd.xlane.f32.xlu1 %v2823_v54  ;;  %3129 = vmatpush1.bf16.msra.mxu1 %v5513_v28 }
 0x9d2   : > { %3130 = vmatprep.subr.bf16.mxu1 %v5521_v40 }
 0x9d3   : > { %3204 = vmatpush1.bf16.msra.mxu0 %v5522_v59 }
 0x9d4   : > { %3205 = vmatprep.subr.bf16.mxu0 %v5530_v42 }
 0x9d5   : > { %3131 = vmatpush1.bf16.msra.mxu1 %v5519_v53 }
 0x9d6   : > { %3132 = vmatprep.subr.bf16.mxu1 %v5527_v44 }
 0x9d7   : > { %3206 = vmatpush1.bf16.msra.mxu0 %v5528_v13 }
 0x9d9   : > { %3133 = vmatpush1.bf16.msra.mxu1 %v5525_v49 }
 0xa50   : > { %v2825_v6 = vpop.xlane.xlu0 %2824 }
 0xa51   : > { %v2840_v15 = vmul.f32 0.0078125, %v2825_v6 }
 0xa52   : > { %v2827_v8 = vpop.xlane.xlu1 %2826 }
 0xa53   : > { %v2848_v0 = vadd.f32 1e-12, %v2840_v15  ;;  %v2841_v10 = vmul.f32 0.0078125, %v2827_v8 }
 0xa54   : > { %v2829_v31 = vpop.xlane.xlu0 %2828 }
 0xa55   : > { %5627 = vrsqrt.f32 %v2848_v0  ;;  %v2849_v21 = vadd.f32 1e-12, %v2841_v10  ;;  %v2842_v12 = vmul.f32 0.0078125, %v2829_v31  ;;  %v5531_v10 = vld [vmem:[%s6751_s24 + $0x40] sm:$0xff]  }
 0xa56   : > { %v2831_v16 = vpop.xlane.xlu1 %2830  ;;  %v5532_v31 = vld [vmem:[%s6751_s24 + $0xc0] sm:$0xff]   ;;  %4974 = vmatprep.subr.bf16.mxu1 %v5531_v10 }
 0xa57   : > { %5629 = vrsqrt.f32 %v2849_v21  ;;  %v2850_v43 = vadd.f32 1e-12, %v2842_v12  ;;  %v2843_v60 = vmul.f32 0.0078125, %v2831_v16  ;;  %5014 = vmatprep.subr.bf16.mxu0 %v5532_v31  ;;  %v5533_v21 = vld [vmem:[%s6751_s24] sm:$0xff]   ;;  %v5535_v12 = vld [vmem:[%s6751_s24 + $0x48] sm:$0xff]  }
 0xa58   : > { %v2833_v34 = vpop.xlane.xlu0 %2832  ;;  %v7362_v16 = vld [vmem:[%s6751_s24 + $0xc8] sm:$0xff]  }
 0xa59   : > { %5631 = vrsqrt.f32 %v2850_v43  ;;  %v2851_v7 = vadd.f32 1e-12, %v2843_v60  ;;  %v2844_v45 = vmul.f32 0.0078125, %v2833_v34  ;;  %8191 = vst [vmem:[#allocation48_spill] sm:$0xff] %v7362_v16  ;;  %v5537_v43 = vld [vmem:[%s6751_s24 + $0x8] sm:$0xff]   ;;  %v5539_v34 = vld [vmem:[%s6751_s24 + $0x50] sm:$0xff]  }
 0xa5a   : > { %v2835_v26 = vpop.xlane.xlu1 %2834  ;;  %v7366_v60 = vld [vmem:[%s6751_s24 + $0x88] sm:$0xff]  }
 0xa5b   : > { %5633 = vrsqrt.f32 %v2851_v7  ;;  %v2845_v29 = vmul.f32 0.0078125, %v2835_v26  ;;  %v2852_v19 = vadd.f32 1e-12, %v2844_v45  ;;  %8192 = vst [vmem:[#allocation49_spill] sm:$0xff] %v7366_v60  ;;  %v7372_v7 = vld [vmem:[%s6751_s24 + $0xd0] sm:$0xff]  }
 0xa5c   : > { %v2837_v3 = vpop.xlane.xlu0 %2836  ;;  %8193 = vst [vmem:[#allocation50_spill] sm:$0xff] %v7372_v7  ;;  %v5541_v45 = vld [vmem:[%s6751_s24 + $0x10] sm:$0xff]  }
 0xa5d   : > { %v2853_v1 = vadd.f32 1e-12, %v2845_v29  ;;  %v2846_v54 = vmul.f32 0.0078125, %v2837_v3  ;;  %v7377_v26 = vld [vmem:[%s6751_s24 + $0x90] sm:$0xff]   ;;  %v5543_v29 = vld [vmem:[%s6751_s24 + $0x58] sm:$0xff]  }
 0xa5e   : > { %v2839_v48 = vpop.xlane.xlu1 %2838  ;;  %8194 = vst [vmem:[#allocation51_spill] sm:$0xff] %v7377_v26  ;;  %v7386_v3 = vld [vmem:[%s6751_s24 + $0x98] sm:$0xff]  }
 0xa5f   : > { %v5628_v30 = vpop.eup %5627  ;;  %5635 = vrsqrt.f32 %v2853_v1  ;;  %v2847_v32 = vmul.f32 0.0078125, %v2839_v48  ;;  %v2854_v52 = vadd.f32 1e-12, %v2846_v54  ;;  %v5545_v1 = vld [vmem:[%s6751_s24 + $0x18] sm:$0xff]   ;;  %8196 = vst [vmem:[#allocation53_spill] sm:$0xff] %v7386_v3  ;;  %v5547_v48 = vld [vmem:[%s6751_s24 + $0x60] sm:$0xff]  }
 0xa60   : > { %v2864_v33 = vmul.f32 %v5628_v30, %v7255_v25  ;;  %5637 = vrsqrt.f32 %v2852_v19  ;;  %v7382_v19 = vld [vmem:[%s6751_s24 + $0xd8] sm:$0xff]   ;;  %v7392_v30 = vld [vmem:[%s6751_s24 + $0xe0] sm:$0xff]   ;;  %v5553_v54 = vld [vmem:[%s6751_s24 + $0x28] sm:$0xff]  }
 0xa61   : > { %v5630_v38 = vpop.eup %5629  ;;  %v2855_v24 = vadd.f32 1e-12, %v2847_v32  ;;  %8195 = vst [vmem:[#allocation52_spill] sm:$0xff] %v7382_v19  ;;  %8197 = vst [vmem:[#allocation54_spill] sm:$0xff] %v7392_v30  ;;  %v5549_v32 = vld [vmem:[%s6751_s24 + $0x20] sm:$0xff]  }
 0xa62   : > { %v2865_v17 = vmul.f32 %v5630_v38, %v7257_v11  ;;  %v2878_v23 = vmul.f32 %v4818_v39, %v2864_v33  ;;  %v5551_v33 = vld [vmem:[%s6751_s24 + $0x68] sm:$0xff]  }
 0xa63   : > { %v5632_v47 = vpop.eup %5631  ;;  %5639 = vrsqrt.f32 %v2855_v24  ;;  %v7402_v38 = vld [vmem:[%s6751_s24 + $0xe8] sm:$0xff]   ;;  %v5557_v24 = vld [vmem:[%s6751_s24 + $0x30] sm:$0xff]  }
 0xa64   : > { %v2879_v51 = vmul.f32 %v4818_v39, %v2865_v17  ;;  %v7317_v57 = vadd.f32 %v4819_v37, %v2878_v23  ;;  %v2866_v61 = vmul.f32 %v5632_v47, %v7261_v20  ;;  %5641 = vrsqrt.f32 %v2854_v52  ;;  %8199 = vst [vmem:[#allocation56_spill] sm:$0xff] %v7402_v38  ;;  %v7406_v17 = vld [vmem:[%s6751_s24 + $0xa8] sm:$0xff]   ;;  %v5555_v23 = vld [vmem:[%s6751_s24 + $0x70] sm:$0xff]   ;;  %v5561_v52 = vld [vmem:[%s6751_s24 + $0x38] sm:$0xff]  }
 0xa65   : > { %v5634_v36 = vpop.eup %5633  ;;  %8200 = vst [vmem:[#allocation57_spill] sm:$0xff] %v7406_v17  ;;  %v7412_v47 = vld [vmem:[%s6751_s24 + $0xf0] sm:$0xff]  }
 0xa66   : > { %8182 = vst [vmem:[#allocation39_spill] sm:$0xff] %v7317_v57  ;;  %v7319_v41 = vadd.f32 %v4819_v37, %v2879_v51  ;;  %v2867_v25 = vmul.f32 %v5634_v36, %v7265_v22  ;;  %v2880_v62 = vmul.f32 %v4818_v39, %v2866_v61  ;;  %8201 = vst [vmem:[#allocation58_spill] sm:$0xff] %v7412_v47  ;;  %v5559_v51 = vld [vmem:[%s6751_s24 + $0x78] sm:$0xff]  }
 0xa67   : > { %v7422_v36 = vld [vmem:[%s6751_s24 + $0xf8] sm:$0xff]  }
 0xa68   : > { %8183 = vst [vmem:[#allocation40_spill] sm:$0xff] %v7319_v41  ;;  %v2900_v11 = vpack.c.bf16 %v7319_v41, %v7317_v57  ;;  %v2881_v2 = vmul.f32 %v4818_v39, %v2867_v25  ;;  %v7330_v22 = vadd.f32 %v4819_v37, %v2880_v62  ;;  %8203 = vst [vmem:[#allocation60_spill] sm:$0xff] %v7422_v36  ;;  %v7426_v61 = vld [vmem:[%s6751_s24 + $0xb8] sm:$0xff]   ;;  %v2936_v25 = vld [vmem:[%s6780_s6] sm:$0xf]  ;;  %s8239_s6 = scalar_lea.vmem [#allocation20], %s6726_s19 }
 0xa69   : > { %v5636_v14 = vpop.eup %5635  ;;  %8204 = vst [vmem:[#allocation61_spill] sm:$0xff] %v7426_v61  ;;  %v7441_v62 = vrot.slane %v2936_v25, %v1345_v58  ;;  %s7944_s19 = sld [smem:[#allocation4 + $0x3]] (!%p4887_p7) }
 0xa6a   : > { %3151 = vmatmul.mubr.bf16.vlgmr.msra.gmra.mrb[36].mxu1 %v2900_v11  ;;  %3224 = vmatmul.mubr.bf16.vlgmr.msra.gmra.mrb[44].mxu0 %v2900_v11  ;;  %v5638_v28 = vpop.eup %5637  ;;  %v7327_v50 = vadd.f32 %v4819_v37, %v2881_v2  ;;  %v2869_v20 = vmul.f32 %v5636_v14, %v7273_v27  ;;  %8185 = vst [vmem:[#allocation42_spill] sm:$0xff] %v7330_v22  ;;  %v2952_v11 = vsub.s32 3, %v6900_v55 }
 0xa6b   : > { %3160 = vmatprep.mubr.bf16.mxu1 %v6195_v18  ;;  %3233 = vmatprep.mubr.bf16.mxu0 %v6195_v18  ;;  %v2868_v40 = vmul.f32 %v5638_v28, %v7269_v46  ;;  %v7433_v2 = vrot.slane %v2936_v25, %v6903_v56  ;;  %v7437_v14 = vrot.slane %v2936_v25, %v1349_v5 }
 0xa6c   : > { %8184 = vst [vmem:[#allocation41_spill] sm:$0xff] %v7327_v50  ;;  %v2901_v63 = vpack.c.bf16 %v7327_v50, %v7330_v22  ;;  %v2883_v53 = vmul.f32 %v4818_v39, %v2869_v20  ;;  %4975 = vmatpush3.bf16.msra.mxu1 %v5533_v21  ;;  %v7443_v28 = vrot.slane %v2936_v25, %v2952_v11 }
 0xa6d   : > { %v5640_v59 = vpop.eup %5639  ;;  %v2882_v44 = vmul.f32 %v4818_v39, %v2868_v40  ;;  %4976 = vmatprep.subr.bf16.mxu1 %v5535_v12 }
 0xa6e   : > { %v5642_v49 = vpop.eup %5641  ;;  %v7337_v13 = vadd.f32 %v4819_v37, %v2883_v53  ;;  %v2871_v27 = vmul.f32 %v5640_v59, %v7281_v35 }
 0xa6f   : > { %v7340_v46 = vadd.f32 %v4819_v37, %v2882_v44  ;;  %v2870_v42 = vmul.f32 %v5642_v49, %v7277_v4 }
 0xa70   : > { %8186 = vst [vmem:[#allocation43_spill] sm:$0xff] %v7337_v13  ;;  %v2885_v15 = vmul.f32 %v4818_v39, %v2871_v27  ;;  %4977 = vmatpush3.bf16.msra.mxu1 %v5537_v43 }
 0xa71   : > { %8187 = vst [vmem:[#allocation44_spill] sm:$0xff] %v7340_v46  ;;  %v2902_v6 = vpack.c.bf16 %v7337_v13, %v7340_v46  ;;  %v2884_v8 = vmul.f32 %v4818_v39, %v2870_v42  ;;  %4978 = vmatprep.subr.bf16.mxu1 %v5539_v34  ;;  %v7396_v39 = vld [vmem:[%s6751_s24 + $0xa0] sm:$0xff]  }
 0xa72   : > { %3161 = vmatmul.mubr.bf16.gmra.mrb[40].mxu1 %v2901_v63  ;;  %3234 = vmatmul.mubr.bf16.gmra.mrb[48].mxu0 %v2901_v63  ;;  %v7347_v35 = vadd.f32 %v4819_v37, %v2885_v15  ;;  %8198 = vst [vmem:[#allocation55_spill] sm:$0xff] %v7396_v39 }
 0xa73   : > { %3170 = vmatprep.mubr.bf16.mxu1 %v6195_v18  ;;  %3243 = vmatprep.mubr.bf16.mxu0 %v6195_v18  ;;  %v7349_v4 = vadd.f32 %v4819_v37, %v2884_v8  ;;  %v7417_v37 = vld [vmem:[%s6751_s24 + $0xb0] sm:$0xff]  }
 0xa74   : > { %8188 = vst [vmem:[#allocation45_spill] sm:$0xff] %v7347_v35  ;;  %4979 = vmatpush3.bf16.msra.mxu1 %v5541_v45  ;;  %8202 = vst [vmem:[#allocation59_spill] sm:$0xff] %v7417_v37 }
 0xa75   : > { %8189 = vst [vmem:[#allocation46_spill] sm:$0xff] %v7349_v4  ;;  %v2903_v0 = vpack.c.bf16 %v7347_v35, %v7349_v4  ;;  %4980 = vmatprep.subr.bf16.mxu1 %v5543_v29 }
 0xa78   : > { %4981 = vmatpush3.bf16.msra.mxu1 %v5545_v1 }
 0xa79   : > { %4982 = vmatprep.subr.bf16.mxu1 %v5547_v48 }
 0xa7a   : > { %3171 = vmatmul.mubr.bf16.gmra.mrb[44].mxu1 %v2902_v6  ;;  %3244 = vmatmul.mubr.bf16.gmra.mrb[52].mxu0 %v2902_v6 }
 0xa7b   : > { %3180 = vmatprep.mubr.bf16.mxu1 %v6195_v18  ;;  %3253 = vmatprep.mubr.bf16.mxu0 %v6195_v18  ;;  %v7357_v18 = vld [vmem:[%s6751_s24 + $0x80] sm:$0xff]   ;;  %s8250_s24 = sld [smem:[#allocation87_spill]] (!%p4887_p7) }
 0xa7c   : > { %8190 = vst [vmem:[#allocation47_spill] sm:$0xff] %v7357_v18  ;;  %5015 = vmatpush3.bf16.msra.mxu0 %v7357_v18  ;;  %4983 = vmatpush3.bf16.msra.mxu1 %v5549_v32 }
 0xa7d   : > { %5016 = vmatprep.subr.bf16.mxu0 %v7362_v16  ;;  %4984 = vmatprep.subr.bf16.mxu1 %v5551_v33 }
 0xa80   : > { %5017 = vmatpush3.bf16.msra.mxu0 %v7366_v60  ;;  %4985 = vmatpush3.bf16.msra.mxu1 %v5553_v54 }
 0xa81   : > { %5018 = vmatprep.subr.bf16.mxu0 %v7372_v7  ;;  %4986 = vmatprep.subr.bf16.mxu1 %v5555_v23 }
 0xa82   : > { %3181 = vmatmul.mubr.bf16.gmra.mrb[48].mxu1 %v2903_v0  ;;  %3254 = vmatmul.mubr.bf16.gmra.mrb[56].mxu0 %v2903_v0 }
 0xa84   : > { %5019 = vmatpush3.bf16.msra.mxu0 %v7377_v26  ;;  %4987 = vmatpush3.bf16.msra.mxu1 %v5557_v24 }
 0xa85   : > { %5020 = vmatprep.subr.bf16.mxu0 %v7382_v19  ;;  %4988 = vmatprep.subr.bf16.mxu1 %v5559_v51 }
 0xa88   : > { %5021 = vmatpush3.bf16.msra.mxu0 %v7386_v3  ;;  %4989 = vmatpush3.bf16.msra.mxu1 %v5561_v52 }
 0xa89   : > { %5022 = vmatprep.subr.bf16.mxu0 %v7392_v30  ;;  %5258 = vmatprep.subr.bf16.mxu1 %v5532_v31 }
 0xa8c   : > { %5023 = vmatpush3.bf16.msra.mxu0 %v7396_v39 }
 0xa8d   : > { %5024 = vmatprep.subr.bf16.mxu0 %v7402_v38 }
 0xa90   : > { %5025 = vmatpush3.bf16.msra.mxu0 %v7406_v17 }
 0xa91   : > { %5026 = vmatprep.subr.bf16.mxu0 %v7412_v47 }
 0xa94   : > { %5027 = vmatpush3.bf16.msra.mxu0 %v7417_v37 }
 0xa95   : > { %5028 = vmatprep.subr.bf16.mxu0 %v7422_v36 }
 0xa98   : > { %5029 = vmatpush3.bf16.msra.mxu0 %v7426_v61 }
 0xb3d   : > { %v3152_v20 = vpop.f32.mrb[36].mxu1  ;;  %v3225_v40 = vpop.f32.mrb[44].mxu0 }
 0xb3e   : > { %v3153_v63 = vadd.f32 %v3152_v20, %v7433_v2  ;;  %v3226_v53 = vadd.f32 %v3225_v40, %v7437_v14  ;;  %v3154_v59 = vpop.f32.mrb[37].mxu1  ;;  %v3227_v44 = vpop.f32.mrb[45].mxu0 }
 0xb3f   : > { %v7448_v56 = vadd.f32 %v3154_v59, %v7441_v62  ;;  %v7451_v5 = vadd.f32 %v3227_v44, %v7443_v28  ;;  %v3156_v49 = vpop.f32.mrb[38].mxu1  ;;  %v3229_v27 = vpop.f32.mrb[46].mxu0 }
 0xb40   : > { %v3296_v58 = vmul.f32 0.044715, %v3153_v63  ;;  %v3298_v42 = vmul.f32 0.044715, %v3226_v53  ;;  %v3157_v8 = vadd.f32 %v3156_v49, %v7433_v2  ;;  %v3230_v0 = vadd.f32 %v3229_v27, %v7437_v14  ;;  %v3158_v10 = vpop.f32.mrb[39].mxu1  ;;  %v3231_v31 = vpop.f32.mrb[47].mxu0 }
 0xb41   : > { %v3297_v6 = vmul.f32 0.044715, %v7448_v56  ;;  %v3299_v15 = vmul.f32 0.044715, %v7451_v5  ;;  %v7458_v43 = vadd.f32 %v3158_v10, %v7441_v62  ;;  %v7461_v34 = vadd.f32 %v3231_v31, %v7443_v28 }
 0xb42   : > { %v3328_v21 = vmul.f32 %v3296_v58, %v3153_v63  ;;  %v3330_v12 = vmul.f32 %v3298_v42, %v3226_v53  ;;  %v3300_v45 = vmul.f32 0.044715, %v3157_v8  ;;  %v3302_v48 = vmul.f32 0.044715, %v3230_v0 }
 0xb43   : > { %v3329_v32 = vmul.f32 %v3297_v6, %v7448_v56  ;;  %v3331_v33 = vmul.f32 %v3299_v15, %v7451_v5  ;;  %v3301_v23 = vmul.f32 0.044715, %v7458_v43  ;;  %v3303_v20 = vmul.f32 0.044715, %v7461_v34 }
 0xb44   : > { %v3360_v29 = vmul.f32 %v3328_v21, %v3153_v63  ;;  %v3362_v1 = vmul.f32 %v3330_v12, %v3226_v53  ;;  %v3332_v54 = vmul.f32 %v3300_v45, %v3157_v8  ;;  %v3334_v11 = vmul.f32 %v3302_v48, %v3230_v0 }
 0xb45   : > { %v3162_v24 = vpop.f32.mrb[40].mxu1  ;;  %v3235_v51 = vpop.f32.mrb[48].mxu0  ;;  %v3333_v49 = vmul.f32 %v3301_v23, %v7458_v43  ;;  %v7474_v15 = vmul.f32 0.5, %v3153_v63  ;;  %v7476_v31 = vmul.f32 0.5, %v3226_v53  ;;  %v7480_v48 = vmul.f32 0.5, %v3230_v0 }
 0xb46   : > { %v3392_v52 = vadd.f32 %v3360_v29, %v3153_v63  ;;  %v3394_v25 = vadd.f32 %v3362_v1, %v3226_v53  ;;  %v3164_v40 = vpop.f32.mrb[41].mxu1  ;;  %v3237_v59 = vpop.f32.mrb[49].mxu0  ;;  %v3364_v44 = vmul.f32 %v3332_v54, %v3157_v8  ;;  %v7469_v27 = vadd.f32 %v3162_v24, %v7433_v2 }
 0xb47   : > { %v7472_v58 = vadd.f32 %v3235_v51, %v7437_v14  ;;  %v3166_v42 = vpop.f32.mrb[42].mxu1  ;;  %v3239_v6 = vpop.f32.mrb[50].mxu0  ;;  %v3366_v21 = vmul.f32 %v3334_v11, %v3230_v0  ;;  %v7478_v29 = vmul.f32 0.5, %v3157_v8  ;;  %v7484_v23 = vmul.f32 %v3329_v32, %v7448_v56 }
 0xb48   : > { %v3424_v10 = vmul.f32 0.7978846, %v3392_v52  ;;  %v3168_v12 = vpop.f32.mrb[43].mxu1  ;;  %v3241_v45 = vpop.f32.mrb[51].mxu0  ;;  %v3396_v1 = vadd.f32 %v3364_v44, %v3157_v8  ;;  %v3304_v54 = vmul.f32 0.044715, %v7469_v27  ;;  %v7488_v51 = vadd.f32 %v3164_v40, %v7441_v62 }
 0xb49   : > { %8205 = vst [vmem:[#allocation62_spill] sm:$0xff] %v7472_v58  ;;  %v3398_v24 = vadd.f32 %v3366_v21, %v3230_v0  ;;  %v3306_v63 = vmul.f32 0.044715, %v7472_v58  ;;  %v3426_v53 = vmul.f32 0.7978846, %v3394_v25  ;;  %v7491_v52 = vmul.f32 %v3331_v33, %v7451_v5 }
 0xb4a   : > { %v7494_v11 = vmul.f32 %v3333_v49, %v7458_v43  ;;  %v3335_v8 = vmul.f32 %v3303_v20, %v7461_v34  ;;  %5643 = vtanh.f32 %v3424_v10  ;;  %v3305_v44 = vmul.f32 0.044715, %v7488_v51 }
 0xb4b   : > { %v7499_v32 = vadd.f32 %v3237_v59, %v7443_v28  ;;  %v7502_v0 = vadd.f32 %v3166_v42, %v7433_v2  ;;  %v3428_v40 = vmul.f32 0.7978846, %v3396_v1  ;;  %v3430_v21 = vmul.f32 0.7978846, %v3398_v24 }
 0xb4c   : > { %v3336_v25 = vmul.f32 %v3304_v54, %v7469_v27  ;;  %v7506_v33 = vadd.f32 %v3239_v6, %v7437_v14  ;;  %v3338_v20 = vmul.f32 %v3306_v63, %v7472_v58  ;;  %v3337_v10 = vmul.f32 %v3305_v44, %v7488_v51 }
 0xb4d   : > { %v3172_v49 = vpop.f32.mrb[44].mxu1  ;;  %v3245_v55 = vpop.f32.mrb[52].mxu0  ;;  %v3307_v9 = vmul.f32 0.044715, %v7499_v32  ;;  %v3308_v59 = vmul.f32 0.044715, %v7502_v0  ;;  %v7514_v24 = vadd.f32 %v3168_v12, %v7441_v62  ;;  %v7517_v6 = vadd.f32 %v3241_v45, %v7443_v28 }
 0xb4e   : > { %8206 = vst [vmem:[#allocation63_spill] sm:$0xff] %v7506_v33  ;;  %v3174_v35 = vpop.f32.mrb[45].mxu1  ;;  %v3247_v42 = vpop.f32.mrb[53].mxu0  ;;  %v3310_v1 = vmul.f32 0.044715, %v7506_v33  ;;  %v7520_v54 = vadd.f32 %v3172_v49, %v7433_v2  ;;  %5645 = vtanh.f32 %v3426_v53  ;;  %v7523_v44 = vmul.f32 %v3335_v8, %v7461_v34 }
 0xb4f   : > { %v3176_v63 = vpop.f32.mrb[46].mxu1  ;;  %v3249_v4 = vpop.f32.mrb[54].mxu0  ;;  %v3339_v13 = vmul.f32 %v3307_v9, %v7499_v32  ;;  %v3246_v46 = vadd.f32 %v3245_v55, %v7437_v14  ;;  %5647 = vtanh.f32 %v3428_v40  ;;  %v3340_v12 = vmul.f32 %v3308_v59, %v7502_v0 }
 0xb50   : > { %8207 = vst [vmem:[#allocation64_spill] sm:$0xff] %v7520_v54  ;;  %v3178_v50 = vpop.f32.mrb[47].mxu1  ;;  %v3251_v22 = vpop.f32.mrb[55].mxu0  ;;  %v3309_v45 = vmul.f32 0.044715, %v7514_v24  ;;  %v7531_v41 = vmul.f32 %v3336_v25, %v7469_v27  ;;  %v7534_v53 = vmul.f32 %v3338_v20, %v7472_v58  ;;  %5649 = vtanh.f32 %v3430_v21 }
 0xb51   : > { %v3311_v49 = vmul.f32 0.044715, %v7517_v6  ;;  %v3312_v8 = vmul.f32 0.044715, %v7520_v54  ;;  %v3314_v9 = vmul.f32 0.044715, %v3246_v46  ;;  %v7538_v55 = vmul.f32 %v3337_v10, %v7488_v51 }
 0xb52   : > { %8208 = vst [vmem:[#allocation65_spill] sm:$0xff] %v7534_v53  ;;  %v7541_v40 = vmul.f32 %v3339_v13, %v7499_v32  ;;  %v3342_v59 = vmul.f32 %v3310_v1, %v7506_v33  ;;  %v7545_v61 = vadd.f32 %v3174_v35, %v7441_v62  ;;  %v7548_v25 = vadd.f32 %v3247_v42, %v7443_v28 }
 0xb53   : > { %v3346_v57 = vmul.f32 %v3314_v9, %v3246_v46  ;;  %v7551_v20 = vadd.f32 %v3176_v63, %v7433_v2  ;;  %v7554_v21 = vmul.f32 %v3340_v12, %v7502_v0  ;;  %v3341_v10 = vmul.f32 %v3309_v45, %v7514_v24 }
 0xb54   : > { %v3343_v13 = vmul.f32 %v3311_v49, %v7517_v6  ;;  %v3250_v36 = vadd.f32 %v3249_v4, %v7437_v14  ;;  %v7559_v37 = vpop.eup %5643  ;;  %v3344_v35 = vmul.f32 %v3312_v8, %v7520_v54  ;;  %v3313_v47 = vmul.f32 0.044715, %v7545_v61 }
 0xb55   : > { %v3182_v1 = vpop.f32.mrb[48].mxu1  ;;  %v3255_v9 = vpop.f32.mrb[56].mxu0  ;;  %v3378_v42 = vmul.f32 %v3346_v57, %v3246_v46  ;;  %v3315_v63 = vmul.f32 0.044715, %v7548_v25  ;;  %v3316_v12 = vmul.f32 0.044715, %v7551_v20  ;;  %v7566_v45 = vadd.f32 %v3178_v50, %v7441_v62 }
 0xb56   : > { %v3318_v17 = vmul.f32 0.044715, %v3250_v36  ;;  %v7569_v49 = vadd.f32 %v3251_v22, %v7443_v28  ;;  %v3184_v4 = vpop.f32.mrb[49].mxu1  ;;  %v3257_v38 = vpop.f32.mrb[57].mxu0  ;;  %v7572_v39 = vmul.f32 %v3342_v59, %v7506_v33  ;;  %v7574_v8 = vmul.f32 0.5, %v3246_v46 }
 0xb57   : > { %v3410_v57 = vadd.f32 %v3378_v42, %v3246_v46  ;;  %v3345_v30 = vmul.f32 %v3313_v47, %v7545_v61  ;;  %v3186_v3 = vpop.f32.mrb[50].mxu1  ;;  %v3259_v19 = vpop.f32.mrb[58].mxu0  ;;  %v3317_v7 = vmul.f32 0.044715, %v7566_v45  ;;  %v7580_v22 = vadd.f32 %v3182_v1, %v7433_v2 }
 0xb58   : > { %8209 = vst [vmem:[#allocation66_spill] sm:$0xff] %v7572_v39  ;;  %8210 = vst [vmem:[#allocation67_spill] sm:$0xff] %v7574_v8  ;;  %v3350_v26 = vmul.f32 %v3318_v17, %v3250_v36  ;;  %v3319_v50 = vmul.f32 0.044715, %v7569_v49  ;;  %v3188_v60 = vpop.f32.mrb[51].mxu1  ;;  %v3261_v16 = vpop.f32.mrb[59].mxu0  ;;  %v7583_v59 = vmul.f32 %v3341_v10, %v7514_v24  ;;  %v7586_v46 = vmul.f32 %v3343_v13, %v7517_v6 }
 0xb59   : > { %v5646_v18 = vpop.eup %5645  ;;  %v7589_v47 = vmul.f32 %v3344_v35, %v7520_v54  ;;  %v7591_v17 = vmul.f32 0.5, %v3250_v36  ;;  %v3347_v8 = vmul.f32 %v3315_v63, %v7548_v25  ;;  %v3348_v1 = vmul.f32 %v3316_v12, %v7551_v20 }
 0xb5a   : > { %v5648_v42 = vpop.eup %5647  ;;  %v3382_v39 = vmul.f32 %v3350_v26, %v3250_v36  ;;  %v3320_v33 = vmul.f32 0.044715, %v7580_v22  ;;  %v3442_v53 = vmul.f32 0.7978846, %v3410_v57  ;;  %v7597_v10 = vadd.f32 %v3255_v9, %v7437_v14 }
 0xb5b   : > { %8211 = vst [vmem:[#allocation68_spill] sm:$0xff] %v7589_v47  ;;  %8212 = vst [vmem:[#allocation69_spill] sm:$0xff] %v7591_v17  ;;  %v7600_v13 = vadd.f32 %v3184_v4, %v7441_v62  ;;  %v7603_v35 = vadd.f32 %v3257_v38, %v7443_v28  ;;  %v5650_v47 = vpop.eup %5649  ;;  %v7606_v17 = vmul.f32 %v3345_v30, %v7545_v61 }
 0xb5c   : > { %v3414_v63 = vadd.f32 %v3382_v39, %v3250_v36  ;;  %v3349_v12 = vmul.f32 %v3317_v7, %v7566_v45  ;;  %v3351_v26 = vmul.f32 %v3319_v50, %v7569_v49  ;;  %v3322_v57 = vmul.f32 0.044715, %v7597_v10 }
 0xb5d   : > { %8213 = vst [vmem:[#allocation70_spill] sm:$0xff] %v7606_v17  ;;  %v3321_v9 = vmul.f32 0.044715, %v7600_v13  ;;  %v3323_v54 = vmul.f32 0.044715, %v7603_v35  ;;  %v7614_v4 = vadd.f32 %v3186_v3, %v7433_v2  ;;  %v3352_v58 = vmul.f32 %v3320_v33, %v7580_v22 }
 0xb5e   : > { %v3446_v38 = vmul.f32 0.7978846, %v3414_v63  ;;  %v7618_v30 = vadd.f32 %v3259_v19, %v7437_v14  ;;  %v7621_v39 = vadd.f32 %v3188_v60, %v7441_v62  ;;  %v3354_v7 = vmul.f32 %v3322_v57, %v7597_v10 }
 0xb5f   : > { %v3353_v36 = vmul.f32 %v3321_v9, %v7600_v13  ;;  %v3355_v50 = vmul.f32 %v3323_v54, %v7603_v35  ;;  %v3324_v17 = vmul.f32 0.044715, %v7614_v4  ;;  %v7628_v3 = vmul.f32 %v3347_v8, %v7548_v25 }
 0xb60   : > { %v3326_v2 = vmul.f32 0.044715, %v7618_v30  ;;  %v3325_v33 = vmul.f32 0.044715, %v7621_v39  ;;  %v7633_v19 = vadd.f32 %v3261_v16, %v7443_v28  ;;  %5651 = vtanh.f32 %v3442_v53 }
 0xb61   : > { %v7636_v60 = vmul.f32 %v3348_v1, %v7551_v20  ;;  %v7639_v14 = vmul.f32 %v3349_v12, %v7566_v45  ;;  %v3356_v62 = vmul.f32 %v3324_v17, %v7614_v4  ;;  %5653 = vtanh.f32 %v3446_v38 }
 0xb62   : > { %v7643_v54 = vmul.f32 %v3351_v26, %v7569_v49  ;;  %v7646_v8 = vmul.f32 %v3352_v58, %v7580_v22  ;;  %v7649_v63 = vmul.f32 %v3354_v7, %v7597_v10  ;;  %v7652_v16 = vmul.f32 %v3353_v36, %v7600_v13 }
 0xb63   : > { %v7655_v28 = vmul.f32 %v3355_v50, %v7603_v35  ;;  %v3393_v53 = vadd.f32 %v7484_v23, %v7448_v56  ;;  %v3397_v17 = vadd.f32 %v7494_v11, %v7458_v43  ;;  %v3358_v1 = vmul.f32 %v3326_v2, %v7618_v30 }
 0xb64   : > { %v3357_v58 = vmul.f32 %v3325_v33, %v7621_v39  ;;  %v3327_v12 = vmul.f32 0.044715, %v7633_v19  ;;  %v7665_v26 = vmul.f32 0.5, %v7448_v56  ;;  %v7668_v57 = vmul.f32 %v3356_v62, %v7614_v4 }
 0xb65   : > { %v3425_v9 = vmul.f32 0.7978846, %v3393_v53  ;;  %v3429_v38 = vmul.f32 0.7978846, %v3397_v17  ;;  %v3395_v23 = vadd.f32 %v7491_v52, %v7451_v5  ;;  %v7673_v7 = vmul.f32 0.5, %v7458_v43 }
 0xb66   : > { %v3399_v11 = vadd.f32 %v7523_v44, %v7461_v34  ;;  %v3488_v36 = vadd.f32 1.0, %v7559_v37  ;;  %v3492_v50 = vadd.f32 1.0, %v5648_v42  ;;  %v3490_v2 = vadd.f32 1.0, %v5646_v18 }
 0xb67   : > { %5655 = vtanh.f32 %v3425_v9  ;;  %v3427_v56 = vmul.f32 0.7978846, %v3395_v23  ;;  %v3494_v33 = vadd.f32 1.0, %v5650_v47  ;;  %v3359_v43 = vmul.f32 %v3327_v12, %v7633_v19 }
 0xb68   : > { %5657 = vtanh.f32 %v3429_v38  ;;  %v3431_v62 = vmul.f32 0.7978846, %v3399_v11  ;;  %v7679_v53 = vmul.f32 %v3488_v36, %v7474_v15  ;;  %v7682_v52 = vmul.f32 %v3492_v50, %v7478_v29 }
 0xb69   : > { %5659 = vtanh.f32 %v3427_v56  ;;  %v7686_v44 = vmul.f32 %v3490_v2, %v7476_v31  ;;  %v7689_v37 = vmul.f32 %v3494_v33, %v7480_v48  ;;  %v7692_v18 = vmul.f32 %v3358_v1, %v7618_v30  ;;  %v8215_v2 = vld [vmem:[#allocation65_spill] sm:$0xff] }
 0xb6a   : > { %5661 = vtanh.f32 %v3431_v62  ;;  %v3552_v15 = vpack.c.bf16 %v7682_v52, %v7679_v53  ;;  %v3401_v29 = vadd.f32 %v7538_v55, %v7488_v51  ;;  %v7698_v47 = vpop.eup %5651  ;;  %v7701_v42 = vmul.f32 %v3357_v58, %v7621_v39  ;;  %v8217_v62 = vld [vmem:[#allocation66_spill] sm:$0xff]  ;;  %v8223_v53 = vld [vmem:[#allocation48_spill] sm:$0xff] }
 0xb6b   : > { %v3267_v31 = vmul.f32 0.5, %v7451_v5  ;;  %v3405_v17 = vadd.f32 %v7583_v59, %v7514_v24  ;;  %v7708_v1 = vpop.eup %5653  ;;  %v3271_v12 = vmul.f32 0.5, %v7461_v34  ;;  %v3403_v55 = vadd.f32 %v7541_v40, %v7499_v32 }
 0xb6c   : > { %v3433_v9 = vmul.f32 0.7978846, %v3401_v29  ;;  %v3407_v58 = vadd.f32 %v7586_v46, %v7517_v6  ;;  %v7716_v38 = vmul.f32 %v3359_v43, %v7633_v19  ;;  %v3400_v23 = vadd.f32 %v7531_v41, %v7469_v27  ;;  %v8214_v41 = vld [vmem:[#allocation62_spill] sm:$0xff] }
 0xb6d   : > { %v3437_v5 = vmul.f32 0.7978846, %v3405_v17  ;;  %v3404_v59 = vadd.f32 %v7554_v21, %v7502_v0  ;;  %v7723_v11 = vmul.f32 0.5, %v7488_v51  ;;  %v3435_v34 = vmul.f32 0.7978846, %v3403_v55  ;;  %v8216_v21 = vld [vmem:[#allocation63_spill] sm:$0xff] }
 0xb6e   : > { %5663 = vtanh.f32 %v3433_v9  ;;  %v3439_v36 = vmul.f32 0.7978846, %v3407_v58  ;;  %v7726_v40 = vmul.f32 0.5, %v7514_v24  ;;  %v3432_v46 = vmul.f32 0.7978846, %v3400_v23  ;;  %v8218_v24 = vld [vmem:[#allocation70_spill] sm:$0xff] }
 0xb6f   : > { %5665 = vtanh.f32 %v3437_v5  ;;  %v3436_v50 = vmul.f32 0.7978846, %v3404_v59  ;;  %v7729_v56 = vmul.f32 0.5, %v7499_v32  ;;  %v3402_v33 = vadd.f32 %v8215_v2, %v8214_v41 }
 0xb70   : > { %5667 = vtanh.f32 %v3435_v34  ;;  %v3406_v51 = vadd.f32 %v8217_v62, %v8216_v21  ;;  %v7736_v29 = vmul.f32 0.5, %v7517_v6  ;;  %v3409_v17 = vadd.f32 %v8218_v24, %v7545_v61 }
 0xb71   : > { %v5656_v43 = vpop.eup %5655  ;;  %5669 = vtanh.f32 %v3439_v36  ;;  %v3413_v9 = vadd.f32 %v7639_v14, %v7566_v45  ;;  %v3434_v58 = vmul.f32 0.7978846, %v3402_v33  ;;  %v3272_v36 = vmul.f32 0.5, %v7469_v27 }
 0xb72   : > { %v5658_v32 = vpop.eup %5657  ;;  %v3489_v55 = vadd.f32 1.0, %v5656_v43  ;;  %5671 = vtanh.f32 %v3432_v46  ;;  %v3438_v5 = vmul.f32 0.7978846, %v3406_v51  ;;  %v3441_v34 = vmul.f32 0.7978846, %v3409_v17  ;;  %v8220_v51 = vld [vmem:[#allocation68_spill] sm:$0xff] }
 0xb73   : > { %v5660_v23 = vpop.eup %5659  ;;  %v3493_v59 = vadd.f32 1.0, %v5658_v32  ;;  %5673 = vtanh.f32 %v3436_v50  ;;  %v3445_v2 = vmul.f32 0.7978846, %v3413_v9  ;;  %v7744_v48 = vmul.f32 0.5, %v7502_v0  ;;  %v8219_v50 = vld [vmem:[#allocation64_spill] sm:$0xff] }
 0xb74   : > { %v5662_v62 = vpop.eup %5661  ;;  %v3491_v6 = vadd.f32 1.0, %v5660_v23  ;;  %5675 = vtanh.f32 %v3434_v58  ;;  %v3521_v14 = vmul.f32 %v3489_v55, %v7665_v26  ;;  %v7749_v33 = vmul.f32 0.5, %v8214_v41 }
 0xb75   : > { %v3525_v43 = vmul.f32 %v3493_v59, %v7673_v7  ;;  %v3495_v46 = vadd.f32 1.0, %v5662_v62  ;;  %5677 = vtanh.f32 %v3438_v5  ;;  %v3408_v24 = vadd.f32 %v8220_v51, %v8219_v50 }
 0xb76   : > { %5679 = vtanh.f32 %v3441_v34  ;;  %v3412_v27 = vadd.f32 %v7636_v60, %v7551_v20  ;;  %v3523_v0 = vmul.f32 %v3491_v6, %v3267_v31  ;;  %v3278_v26 = vmul.f32 0.5, %v8216_v21 }
 0xb77   : > { %v3553_v17 = vpack.c.bf16 %v3525_v43, %v3521_v14  ;;  %v3527_v9 = vmul.f32 %v3495_v46, %v3271_v12  ;;  %5681 = vtanh.f32 %v3445_v2  ;;  %v3440_v7 = vmul.f32 0.7978846, %v3408_v24  ;;  %v8221_v2 = vld [vmem:[#allocation47_spill] sm:$0xff] }
 0xb78   : > { %v5664_v32 = vpop.eup %5663  ;;  %v3444_v55 = vmul.f32 0.7978846, %v3412_v27  ;;  %v3417_v41 = vadd.f32 %v7652_v16, %v7600_v13  ;;  %v7759_v59 = vmul.f32 0.5, %v7545_v61  ;;  %v3421_v60 = vadd.f32 %v7701_v42, %v7621_v39 }
 0xb79   : > { %v5666_v58 = vpop.eup %5665  ;;  %3863 = vmatprep.mubr.bf16.mxu1 %v3553_v17  ;;  %v3555_v5 = vpack.c.bf16 %v3527_v9, %v3523_v0  ;;  %v3497_v23 = vadd.f32 1.0, %v5664_v32  ;;  %v3285_v21 = vmul.f32 0.5, %v7566_v45  ;;  %5683 = vtanh.f32 %v3440_v7  ;;  %v8224_v0 = vld [vmem:[#allocation49_spill] sm:$0xff] }
 0xb7a   : > { %v5668_v31 = vpop.eup %5667  ;;  %3864 = vmatmul.mubr.bf16.vlgmr.msra.gmra.mrb[52].mxu1 %v3552_v15  ;;  %v3501_v12 = vadd.f32 1.0, %v5666_v58  ;;  %v3449_v16 = vmul.f32 0.7978846, %v3417_v41  ;;  %5685 = vtanh.f32 %v3444_v55  ;;  %v3453_v6 = vmul.f32 0.7978846, %v3421_v60 }
 0xb7b   : > { %v5670_v34 = vpop.eup %5669  ;;  %3928 = vmatprep.mubr.bf16.mxu0 %v3555_v5  ;;  %5266 = vmatpush3.bf16.msra.mxu1 %v8221_v2  ;;  %v3529_v61 = vmul.f32 %v3497_v23, %v7723_v11  ;;  %v3499_v62 = vadd.f32 1.0, %v5668_v31  ;;  %v8222_v14 = vpack.c.bf16 %v7689_v37, %v7686_v44  ;;  %v3416_v15 = vadd.f32 %v7646_v8, %v7580_v22 }
 0xb7c   : > { %v5672_v42 = vpop.eup %5671  ;;  %5259 = vmatprep.subr.bf16.mxu1 %v8223_v53  ;;  %v3533_v45 = vmul.f32 %v3501_v12, %v7726_v40  ;;  %v3503_v52 = vadd.f32 1.0, %v5670_v34  ;;  %5687 = vtanh.f32 %v3449_v16  ;;  %v3420_v51 = vadd.f32 %v7668_v57, %v7614_v4  ;;  %v8225_v57 = vld [vmem:[#allocation50_spill] sm:$0xff]  ;;  %v8226_v16 = vld [vmem:[#allocation51_spill] sm:$0xff] }
 0xb7d   : > { %3929 = vmatmul.mubr.bf16.vlgmr.msra.gmra.mrb[60].mxu0 %v8222_v14  ;;  %v5674_v43 = vpop.eup %5673  ;;  %v3531_v11 = vmul.f32 %v3499_v62, %v7729_v56  ;;  %v3496_v46 = vadd.f32 1.0, %v5672_v42  ;;  %5689 = vtanh.f32 %v3453_v6  ;;  %v3448_v17 = vmul.f32 0.7978846, %v3416_v15  ;;  %v8227_v62 = vld [vmem:[#allocation52_spill] sm:$0xff] }
 0xb7e   : > { %v5676_v24 = vpop.eup %5675  ;;  %v3557_v44 = vpack.c.bf16 %v3533_v45, %v3529_v61  ;;  %v3535_v37 = vmul.f32 %v3503_v52, %v7736_v29  ;;  %v3500_v27 = vadd.f32 1.0, %v5674_v43  ;;  %v3280_v8 = vmul.f32 0.5, %v8219_v50 }
 0xb7f   : > { %v5678_v40 = vpop.eup %5677  ;;  %5267 = vmatpush3.bf16.msra.mxu1 %v8224_v0  ;;  %v3528_v9 = vmul.f32 %v3496_v46, %v3272_v36  ;;  %v3498_v32 = vadd.f32 1.0, %v5676_v24  ;;  %v3452_v7 = vmul.f32 0.7978846, %v3420_v51  ;;  %5691 = vtanh.f32 %v3448_v17 }
 0xb80   : > { %v5680_v56 = vpop.eup %5679  ;;  %3871 = vmatprep.mubr.bf16.mxu1 %v3557_v44  ;;  %v3559_v55 = vpack.c.bf16 %v3535_v37, %v3531_v11  ;;  %v3532_v41 = vmul.f32 %v3500_v27, %v7744_v48  ;;  %5260 = vmatprep.subr.bf16.mxu1 %v8225_v57  ;;  %v3502_v58 = vadd.f32 1.0, %v5678_v40  ;;  %v3284_v60 = vmul.f32 0.5, %v7551_v20  ;;  %v8231_v44 = vld [vmem:[#allocation54_spill] sm:$0xff] }
 0xb81   : > { %v5682_v29 = vpop.eup %5681  ;;  %v3530_v5 = vmul.f32 %v3498_v32, %v7749_v33  ;;  %v3505_v23 = vadd.f32 1.0, %v5680_v56  ;;  %5693 = vtanh.f32 %v3452_v7  ;;  %v3411_v12 = vadd.f32 %v7628_v3, %v7548_v25 }
 0xb82   : > { %3936 = vmatprep.mubr.bf16.mxu0 %v3559_v55  ;;  %v3556_v36 = vpack.c.bf16 %v3532_v41, %v3528_v9  ;;  %v3534_v50 = vmul.f32 %v3502_v58, %v3278_v26  ;;  %v3509_v31 = vadd.f32 1.0, %v5682_v29  ;;  %v3289_v48 = vmul.f32 0.5, %v7600_v13  ;;  %v8228_v13 = vld [vmem:[#allocation67_spill] sm:$0xff] }
 0xb83   : > { %5268 = vmatpush3.bf16.msra.mxu1 %v8226_v16  ;;  %v3415_v34 = vadd.f32 %v7643_v54, %v7569_v49  ;;  %v3506_v33 = vadd.f32 1.0, %v7698_v47  ;;  %v3510_v2 = vadd.f32 1.0, %v7708_v1  ;;  %v5684_v20 = vpop.eup %5683  ;;  %v3537_v26 = vmul.f32 %v3505_v23, %v7759_v59  ;;  %v8229_v54 = vld [vmem:[#allocation69_spill] sm:$0xff]  ;;  %v8232_v55 = vld [vmem:[#allocation55_spill] sm:$0xff] }
 0xb84   : > { %3872 = vmatmul.mubr.bf16.gmra.mrb[56].mxu1 %v3556_v36  ;;  %v3558_v61 = vpack.c.bf16 %v3534_v50, %v3530_v5  ;;  %5261 = vmatprep.subr.bf16.mxu1 %v8227_v62  ;;  %v3541_v6 = vmul.f32 %v3509_v31, %v3285_v21  ;;  %v3443_v3 = vmul.f32 0.7978846, %v3411_v12  ;;  %v5686_v42 = vpop.eup %5685  ;;  %v3504_v14 = vadd.f32 1.0, %v5684_v20  ;;  %v8230_v59 = vld [vmem:[#allocation53_spill] sm:$0xff]  ;;  %v8235_v31 = vld [vmem:[#allocation58_spill] sm:$0xff] }
 0xb85   : > { %v3447_v53 = vmul.f32 0.7978846, %v3415_v34  ;;  %v7797_v45 = vmul.f32 %v3506_v33, %v8228_v13  ;;  %v7800_v52 = vmul.f32 %v3510_v2, %v8229_v54  ;;  %v3508_v15 = vadd.f32 1.0, %v5686_v42  ;;  %v8236_v33 = vld [vmem:[#allocation59_spill] sm:$0xff] }
 0xb86   : > { %v5688_v47 = vpop.eup %5687  ;;  %3937 = vmatmul.mubr.bf16.gmra.mrb[64].mxu0 %v3558_v61  ;;  %v3561_v1 = vpack.c.bf16 %v3541_v6, %v3537_v26  ;;  %v3293_v43 = vmul.f32 0.5, %v7621_v39  ;;  %5695 = vtanh.f32 %v3443_v3  ;;  %v3536_v21 = vmul.f32 %v3504_v14, %v3280_v8  ;;  %v8237_v61 = vld [vmem:[#allocation60_spill] sm:$0xff]  ;;  %v8238_v3 = vld [vmem:[#allocation61_spill] sm:$0xff] }
 0xb87   : > { %v5690_v11 = vpop.eup %5689  ;;  %5269 = vmatpush3.bf16.msra.mxu1 %v8230_v59  ;;  %v3513_v46 = vadd.f32 1.0, %v5688_v47  ;;  %5697 = vtanh.f32 %v3447_v53  ;;  %v3562_v51 = vpack.c.bf16 %v7800_v52, %v7797_v45  ;;  %v3540_v24 = vmul.f32 %v3508_v15, %v3284_v60 }
 0xb88   : > { %3879 = vmatprep.mubr.bf16.mxu1 %v3561_v1  ;;  %5262 = vmatprep.subr.bf16.mxu1 %v8231_v44  ;;  %v3517_v37 = vadd.f32 1.0, %v5690_v11  ;;  %v3419_v27 = vadd.f32 %v7655_v28, %v7603_v35  ;;  %v3423_v39 = vadd.f32 %v7716_v38, %v7633_v19  ;;  %v3418_v40 = vadd.f32 %v7649_v63, %v7597_v10  ;;  %v8233_v38 = vld [vmem:[#allocation56_spill] sm:$0xff] }
 0xb89   : > { %v3545_v17 = vmul.f32 %v3513_v46, %v3289_v48  ;;  %v5692_v0 = vpop.eup %5691  ;;  %v3560_v9 = vpack.c.bf16 %v3540_v24, %v3536_v21  ;;  %v3288_v41 = vmul.f32 0.5, %v7580_v22  ;;  %v3422_v28 = vadd.f32 %v7692_v18, %v7618_v30  ;;  %v8234_v22 = vld [vmem:[#allocation57_spill] sm:$0xff]  ;;  %v7835_v24 = vld [vmem:[%s8239_s6] ss:$0 sm:$0xff] }
 0xb8a   : > { %v3549_v32 = vmul.f32 %v3517_v37, %v3293_v43  ;;  %v3451_v8 = vmul.f32 0.7978846, %v3419_v27  ;;  %v3455_v7 = vmul.f32 0.7978846, %v3423_v39  ;;  %v3512_v57 = vadd.f32 1.0, %v5692_v0 }
 0xb8b   : > { %v5694_v56 = vpop.eup %5693  ;;  %5270 = vmatpush3.bf16.msra.mxu1 %v8232_v55  ;;  %v3450_v58 = vmul.f32 0.7978846, %v3418_v40  ;;  %v3292_v63 = vmul.f32 0.5, %v7614_v4  ;;  %v3454_v23 = vmul.f32 0.7978846, %v3422_v28  ;;  %v3283_v48 = vmul.f32 0.5, %v7548_v25 }
 0xb8c   : > { %3880 = vmatmul.mubr.bf16.gmra.mrb[60].mxu1 %v3560_v9  ;;  %5263 = vmatprep.subr.bf16.mxu1 %v8233_v38  ;;  %v3565_v29 = vpack.c.bf16 %v3549_v32, %v3545_v17  ;;  %v3516_v5 = vadd.f32 1.0, %v5694_v56  ;;  %5699 = vtanh.f32 %v3451_v8  ;;  %v3544_v60 = vmul.f32 %v3512_v57, %v3288_v41  ;;  %v8241_v41 = vld [vmem:[#allocation40_spill] sm:$0xff] }
 0xb8d   : > { %5701 = vtanh.f32 %v3455_v7  ;;  %v3287_v4 = vmul.f32 0.5, %v7569_v49  ;;  %v3291_v25 = vmul.f32 0.5, %v7603_v35  ;;  %v3295_v49 = vmul.f32 0.5, %v7633_v19  ;;  %v8240_v7 = vld [vmem:[#allocation39_spill] sm:$0xff] }
 0xb8e   : > { %3887 = vmatprep.mubr.bf16.mxu1 %v3565_v29  ;;  %v3548_v36 = vmul.f32 %v3516_v5, %v3292_v63  ;;  %5703 = vtanh.f32 %v3450_v58  ;;  %v3290_v54 = vmul.f32 0.5, %v7597_v10  ;;  %v3294_v43 = vmul.f32 0.5, %v7618_v30 }
 0xb8f   : > { %5271 = vmatpush3.bf16.msra.mxu1 %v8234_v22  ;;  %5705 = vtanh.f32 %v3454_v23 }
 0xb90   : > { %v5696_v50 = vpop.eup %5695  ;;  %v3564_v18 = vpack.c.bf16 %v3548_v36, %v3544_v60  ;;  %5264 = vmatprep.subr.bf16.mxu1 %v8235_v31 }
 0xb91   : > { %v5698_v12 = vpop.eup %5697  ;;  %v3507_v16 = vadd.f32 1.0, %v5696_v50 }
 0xb92   : > { %v3511_v34 = vadd.f32 1.0, %v5698_v12 }
 0xb93   : > { %5272 = vmatpush3.bf16.msra.mxu1 %v8236_v33  ;;  %v3539_v2 = vmul.f32 %v3507_v16, %v3283_v48 }
 0xb94   : > { %3888 = vmatmul.mubr.bf16.gmra.mrb[64].mxu1 %v3564_v18  ;;  %v3543_v20 = vmul.f32 %v3511_v34, %v3287_v4  ;;  %5265 = vmatprep.subr.bf16.mxu1 %v8237_v61  ;;  %v8242_v4 = vld [vmem:[#allocation42_spill] sm:$0xff]  ;;  %v8243_v61 = vld [vmem:[#allocation41_spill] sm:$0xff] }
 0xb96   : > { %v5700_v62 = vpop.eup %5699  ;;  %v3563_v26 = vpack.c.bf16 %v3543_v20, %v3539_v2 }
 0xb97   : > { %v5702_v6 = vpop.eup %5701  ;;  %5273 = vmatpush3.bf16.msra.mxu1 %v8238_v3  ;;  %v3515_v42 = vadd.f32 1.0, %v5700_v62 }
 0xb98   : > { %v5704_v14 = vpop.eup %5703  ;;  %3944 = vmatprep.mubr.bf16.mxu1 %v3563_v26  ;;  %v3519_v53 = vadd.f32 1.0, %v5702_v6 }
 0xb99   : > { %v5706_v13 = vpop.eup %5705  ;;  %v3514_v47 = vadd.f32 1.0, %v5704_v14  ;;  %v3547_v1 = vmul.f32 %v3515_v42, %v3291_v25 }
 0xb9a   : > { %v3551_v15 = vmul.f32 %v3519_v53, %v3295_v49  ;;  %v3518_v11 = vadd.f32 1.0, %v5706_v13 }
 0xb9b   : > { %v3546_v21 = vmul.f32 %v3514_v47, %v3290_v54 }
 0xb9c   : > { %3945 = vmatmul.mubr.bf16.vlgmr.msra.gmra.mrb[68].mxu1 %v3562_v51  ;;  %v3567_v59 = vpack.c.bf16 %v3551_v15, %v3547_v1  ;;  %v3550_v35 = vmul.f32 %v3518_v11, %v3294_v43 }
 0xb9e   : > { %3952 = vmatprep.mubr.bf16.mxu1 %v3567_v59  ;;  %v3566_v19 = vpack.c.bf16 %v3550_v35, %v3546_v21 }
 0xba4   : > { %3953 = vmatmul.mubr.bf16.gmra.mrb[72].mxu1 %v3566_v19  ;;  %v8244_v19 = vld [vmem:[#allocation44_spill] sm:$0xff] }
 0xc4d   : > { %v4990_v46 = vpop.f32.mrb[52].mxu1 }
 0xc4e   : > { %v4991_v10 = vpop.f32.mrb[53].mxu1 }
 0xc4f   : > { %v4992_v37 = vadd.f32 %v4991_v10, %v4990_v46  ;;  %v4993_v27 = vpop.f32.mrb[54].mxu1 }
 0xc50   : > { %v5030_v44 = vpop.f32.mrb[60].mxu0  ;;  %v4994_v39 = vpop.f32.mrb[55].mxu1 }
 0xc51   : > { %v5031_v30 = vpop.f32.mrb[61].mxu0  ;;  %v3866_v17 = vadd.f32 %v4992_v37, %v7835_v24  ;;  %v4995_v51 = vadd.f32 %v4994_v39, %v4993_v27 }
 0xc52   : > { %v5032_v45 = vadd.f32 %v5031_v30, %v5030_v44  ;;  %v5033_v52 = vpop.f32.mrb[62].mxu0  ;;  %v8245_v44 = vld [vmem:[#allocation43_spill] sm:$0xff] }
 0xc53   : > { %v5034_v40 = vpop.f32.mrb[63].mxu0  ;;  %v3869_v9 = vadd.f32 %v4995_v51, %v7835_v24 }
 0xc54   : > { %v3931_v0 = vadd.f32 %v5032_v45, %v3866_v17  ;;  %v5035_v32 = vadd.f32 %v5034_v40, %v5033_v52 }
 0xc56   : > { %v3934_v8 = vadd.f32 %v5035_v32, %v3869_v9  ;;  %v7840_v56 = vadd.f32 %v3931_v0, %v8240_v7  ;;  %v8246_v9 = vld [vmem:[#allocation46_spill] sm:$0xff] }
 0xc57   : > { %v4996_v55 = vpop.f32.mrb[56].mxu1 }
 0xc58   : > { %3971 = vadd.xlane.f32.xlu0 %v7840_v56  ;;  %v7844_v57 = vadd.f32 %v3934_v8, %v8241_v41  ;;  %v4997_v28 = vpop.f32.mrb[57].mxu1  ;;  %v8247_v8 = vld [vmem:[#allocation45_spill] sm:$0xff] }
 0xc59   : > { %v5036_v58 = vpop.f32.mrb[64].mxu0  ;;  %v4998_v38 = vadd.f32 %v4997_v28, %v4996_v55  ;;  %v4999_v29 = vpop.f32.mrb[58].mxu1 }
 0xc5a   : > { %3973 = vadd.xlane.f32.xlu1 %v7844_v57  ;;  %v5037_v63 = vpop.f32.mrb[65].mxu0  ;;  %v5000_v5 = vpop.f32.mrb[59].mxu1 }
 0xc5b   : > { %v3874_v23 = vadd.f32 %v4998_v38, %v7835_v24  ;;  %v5038_v60 = vadd.f32 %v5037_v63, %v5036_v58  ;;  %v5039_v36 = vpop.f32.mrb[66].mxu0  ;;  %v5001_v22 = vadd.f32 %v5000_v5, %v4999_v29 }
 0xc5c   : > { %v5040_v50 = vpop.f32.mrb[67].mxu0 }
 0xc5d   : > { %v3939_v18 = vadd.f32 %v5038_v60, %v3874_v23  ;;  %v3877_v31 = vadd.f32 %v5001_v22, %v7835_v24  ;;  %v5041_v12 = vadd.f32 %v5040_v50, %v5039_v36 }
 0xc5f   : > { %v3942_v16 = vadd.f32 %v5041_v12, %v3877_v31  ;;  %v5002_v48 = vpop.f32.mrb[60].mxu1  ;;  %v3963_v34 = vadd.f32 %v3939_v18, %v8242_v4 }
 0xc60   : > { %v5003_v33 = vpop.f32.mrb[61].mxu1 }
 0xc61   : > { %v5004_v2 = vadd.f32 %v5003_v33, %v5002_v48  ;;  %v5005_v20 = vpop.f32.mrb[62].mxu1  ;;  %3975 = vadd.xlane.f32.xlu0 %v3963_v34  ;;  %v3964_v62 = vadd.f32 %v3942_v16, %v8243_v61 }
 0xc62   : > { %v5006_v26 = vpop.f32.mrb[63].mxu1 }
 0xc63   : > { %v5007_v6 = vadd.f32 %v5006_v26, %v5005_v20  ;;  %3977 = vadd.xlane.f32.xlu1 %v3964_v62  ;;  %v3882_v47 = vadd.f32 %v5004_v2, %v7835_v24 }
 0xc65   : > { %v3885_v11 = vadd.f32 %v5007_v6, %v7835_v24 }
 0xc67   : > { %v5008_v3 = vpop.f32.mrb[64].mxu1 }
 0xc68   : > { %v5009_v42 = vpop.f32.mrb[65].mxu1 }
 0xc69   : > { %v5010_v14 = vadd.f32 %v5009_v42, %v5008_v3  ;;  %v5011_v25 = vpop.f32.mrb[66].mxu1 }
 0xc6a   : > { %v5012_v49 = vpop.f32.mrb[67].mxu1 }
 0xc6b   : > { %v5013_v53 = vadd.f32 %v5012_v49, %v5011_v25  ;;  %v3890_v30 = vadd.f32 %v5010_v14, %v7835_v24 }
 0xc6d   : > { %v3893_v52 = vadd.f32 %v5013_v53, %v7835_v24 }
 0xc6f   : > { %v5042_v13 = vpop.f32.mrb[68].mxu1 }
 0xc70   : > { %v5043_v54 = vpop.f32.mrb[69].mxu1 }
 0xc71   : > { %v5044_v1 = vadd.f32 %v5043_v54, %v5042_v13  ;;  %v5045_v15 = vpop.f32.mrb[70].mxu1 }
 0xc72   : > { %v5046_v43 = vpop.f32.mrb[71].mxu1 }
 0xc73   : > { %v3947_v59 = vadd.f32 %v5044_v1, %v3882_v47  ;;  %v5047_v21 = vadd.f32 %v5046_v43, %v5045_v15 }
 0xc75   : > { %v3950_v35 = vadd.f32 %v5047_v21, %v3885_v11  ;;  %v3965_v46 = vadd.f32 %v3947_v59, %v8244_v19  ;;  %v4885_v21 = vld [vmem:[%s876_s9] ss:$0 sm:$0xff]  ;;  %s7940_s9 = sld [smem:[#allocation4 + $0x2]] (!%p4887_p7) }
 0xc77   : > { %v5048_v10 = vpop.f32.mrb[72].mxu1  ;;  %3979 = vadd.xlane.f32.xlu0 %v3965_v46  ;;  %v3966_v37 = vadd.f32 %v3950_v35, %v8245_v44 }
 0xc78   : > { %v5049_v27 = vpop.f32.mrb[73].mxu1 }
 0xc79   : > { %v5050_v39 = vadd.f32 %v5049_v27, %v5048_v10  ;;  %v5051_v17 = vpop.f32.mrb[74].mxu1  ;;  %3981 = vadd.xlane.f32.xlu1 %v3966_v37  ;;  %v4886_v10 = vld [vmem:[%s986_s8] ss:$0 sm:$0xff] }
 0xc7a   : > { %v5052_v45 = vpop.f32.mrb[75].mxu1 }
 0xc7b   : > { %v3955_v51 = vadd.f32 %v5050_v39, %v3890_v30  ;;  %v5053_v40 = vadd.f32 %v5052_v45, %v5051_v17 }
 0xc7d   : > { %v3958_v0 = vadd.f32 %v5053_v40, %v3893_v52  ;;  %v3967_v32 = vadd.f32 %v3955_v51, %v8246_v9 }
 0xc7f   : > { %3983 = vadd.xlane.f32.xlu0 %v3967_v32  ;;  %v3968_v7 = vadd.f32 %v3958_v0, %v8247_v8 }
 0xc81   : > { %3985 = vadd.xlane.f32.xlu1 %v3968_v7 }
 0xce5   : > { %v3972_v55 = vpop.xlane.xlu0 %3971 }
 0xce6   : > { %v3987_v41 = vmul.f32 0.0078125, %v3972_v55 }
 0xce7   : > { %v3974_v28 = vpop.xlane.xlu1 %3973 }
 0xce8   : > { %v3995_v58 = vsub.f32 %v7840_v56, %v3987_v41  ;;  %v3988_v38 = vmul.f32 0.0078125, %v3974_v28 }
 0xcea   : > { %v3996_v29 = vsub.f32 %v7844_v57, %v3988_v38  ;;  %v4003_v63 = vmul.f32 %v3995_v58, %v3995_v58 }
 0xcec   : > { %4011 = vadd.xlane.f32.xlu0 %v4003_v63  ;;  %v4004_v24 = vmul.f32 %v3996_v29, %v3996_v29 }
 0xcee   : > { %4013 = vadd.xlane.f32.xlu1 %v4004_v24  ;;  %v3976_v5 = vpop.xlane.xlu0 %3975 }
 0xcef   : > { %v3989_v23 = vmul.f32 0.0078125, %v3976_v5 }
 0xcf0   : > { %v3978_v60 = vpop.xlane.xlu1 %3977 }
 0xcf1   : > { %v3997_v36 = vsub.f32 %v3963_v34, %v3989_v23  ;;  %v3990_v22 = vmul.f32 0.0078125, %v3978_v60 }
 0xcf3   : > { %v3998_v50 = vsub.f32 %v3964_v62, %v3990_v22  ;;  %v4005_v18 = vmul.f32 %v3997_v36, %v3997_v36 }
 0xcf5   : > { %4015 = vadd.xlane.f32.xlu0 %v4005_v18  ;;  %v4006_v31 = vmul.f32 %v3998_v50, %v3998_v50 }
 0xcf7   : > { %4017 = vadd.xlane.f32.xlu1 %v4006_v31 }
 0xd04   : > { %v3980_v12 = vpop.xlane.xlu0 %3979 }
 0xd05   : > { %v3991_v16 = vmul.f32 0.0078125, %v3980_v12 }
 0xd06   : > { %v3982_v56 = vpop.xlane.xlu1 %3981 }
 0xd07   : > { %v7861_v48 = vsub.f32 %v3965_v46, %v3991_v16  ;;  %v3992_v57 = vmul.f32 0.0078125, %v3982_v56 }
 0xd09   : > { %v7863_v4 = vsub.f32 %v3966_v37, %v3992_v57  ;;  %v4007_v33 = vmul.f32 %v7861_v48, %v7861_v48 }
 0xd0b   : > { %4019 = vadd.xlane.f32.xlu0 %v4007_v33  ;;  %v4008_v34 = vmul.f32 %v7863_v4, %v7863_v4 }
 0xd0c   : > { %v3984_v2 = vpop.xlane.xlu0 %3983 }
 0xd0d   : > { %v3993_v20 = vmul.f32 0.0078125, %v3984_v2  ;;  %4021 = vadd.xlane.f32.xlu1 %v4008_v34 }
 0xd0e   : > { %v3986_v61 = vpop.xlane.xlu1 %3985 }
 0xd0f   : > { %v7869_v62 = vsub.f32 %v3967_v32, %v3993_v20  ;;  %v3994_v26 = vmul.f32 0.0078125, %v3986_v61 }
 0xd11   : > { %v7871_v6 = vsub.f32 %v3968_v7, %v3994_v26  ;;  %v4009_v3 = vmul.f32 %v7869_v62, %v7869_v62 }
 0xd13   : > { %4023 = vadd.xlane.f32.xlu0 %v4009_v3  ;;  %v4010_v42 = vmul.f32 %v7871_v6, %v7871_v6 }
 0xd15   : > { %4025 = vadd.xlane.f32.xlu1 %v4010_v42 }
 0xd79   : > { %v4012_v14 = vpop.xlane.xlu0 %4011 }
 0xd7a   : > { %v4027_v25 = vmul.f32 0.0078125, %v4012_v14 }
 0xd7b   : > { %v4014_v49 = vpop.xlane.xlu1 %4013 }
 0xd7c   : > { %v4035_v53 = vadd.f32 1e-12, %v4027_v25  ;;  %v4028_v13 = vmul.f32 0.0078125, %v4014_v49 }
 0xd7e   : > { %5707 = vrsqrt.f32 %v4035_v53  ;;  %v4036_v54 = vadd.f32 1e-12, %v4028_v13  ;;  %v5731_v53 = vld [vmem:[%s8249_s5] sm:$0xff] (!%p4887_p7)  }
 0xd80   : > { %5709 = vrsqrt.f32 %v4036_v54 }
 0xd82   : > { %v4016_v47 = vpop.xlane.xlu0 %4015 }
 0xd83   : > { %v4029_v1 = vmul.f32 0.0078125, %v4016_v47  ;;  %v5732_v47 = vld [vmem:[%s8249_s5 + $0x8] sm:$0xff] (!%p4887_p7)  }
 0xd84   : > { %v4018_v15 = vpop.xlane.xlu1 %4017 }
 0xd85   : > { %v4037_v43 = vadd.f32 1e-12, %v4029_v1  ;;  %v4030_v11 = vmul.f32 0.0078125, %v4018_v15 }
 0xd87   : > { %5711 = vrsqrt.f32 %v4037_v43  ;;  %v4038_v35 = vadd.f32 1e-12, %v4030_v11  ;;  %v5733_v43 = vld [vmem:[%s8249_s5 + $0x10] sm:$0xff] (!%p4887_p7)   ;;  %v5734_v11 = vld [vmem:[%s8249_s5 + $0x18] sm:$0xff] (!%p4887_p7)  }
 0xd88   : > { %v5708_v59 = vpop.eup %5707 }
 0xd89   : > { %v4051_v19 = vmul.f32 %v5708_v59, %v3995_v58  ;;  %5713 = vrsqrt.f32 %v4038_v35  ;;  %v5735_v59 = vld [vmem:[%s8249_s5 + $0x20] sm:$0xff] (!%p4887_p7)   ;;  %v5737_v35 = vld [vmem:[%s8249_s5 + $0x30] sm:$0xff] (!%p4887_p7)  }
 0xd8a   : > { %v5710_v46 = vpop.eup %5709 }
 0xd8b   : > { %v4065_v44 = vmul.f32 %v4885_v21, %v4051_v19  ;;  %v4052_v37 = vmul.f32 %v5710_v46, %v3996_v29  ;;  %v5738_v19 = vld [vmem:[%s8249_s5 + $0x38] sm:$0xff] (!%p4887_p7)  }
 0xd8d   : > { %v4079_v27 = vadd.f32 %v4886_v10, %v4065_v44  ;;  %v4066_v30 = vmul.f32 %v4885_v21, %v4052_v37 }
 0xd8f   : > { %4087 = vst [vmem:[#allocation2] sm:$0xff] %v4079_v27  ;;  %v4080_v39 = vadd.f32 %v4886_v10, %v4066_v30  ;;  %v4888_v30 = vld [vmem:[%s8250_s24] ss:$0 sm:$0xff] (!%p4887_p7) }
 0xd91   : > { %4088 = vst [vmem:[#allocation2 + $0x8] sm:$0xff] %v4080_v39  ;;  %v5712_v17 = vpop.eup %5711 }
 0xd92   : > { %v4053_v45 = vmul.f32 %v5712_v17, %v3997_v36  ;;  %v8251_v17 = vld [vmem:[#allocation38_spill] sm:$0xff] (!%p4887_p7) }
 0xd93   : > { %v5714_v52 = vpop.eup %5713  ;;  %vm4256_vm4 = vcmp.lt.s32.totalorder (!%p4887_p7), %v8251_v17, 4  ;;  %vm4236_vm12 = vcmp.eq.s32.totalorder (!%p4887_p7), %v8251_v17, 0  ;;  %vm4242_vm13 = vcmp.eq.s32.totalorder (!%p4887_p7), %v8251_v17, 1  ;;  %vm4248_vm14 = vcmp.eq.s32.totalorder (!%p4887_p7), %v8251_v17, 2 }
 0xd94   : > { %v4067_v51 = vmul.f32 %v4885_v21, %v4053_v45  ;;  %v4054_v40 = vmul.f32 %v5714_v52, %v3998_v50 }
 0xd96   : > { %v4081_v0 = vadd.f32 %v4886_v10, %v4067_v51  ;;  %v4068_v9 = vmul.f32 %v4885_v21, %v4054_v40 }
 0xd98   : > { %4089 = vst [vmem:[#allocation2 + $0x10] sm:$0xff] %v4081_v0  ;;  %v4082_v32 = vadd.f32 %v4886_v10, %v4068_v9  ;;  %v4020_v8 = vpop.xlane.xlu0 %4019 }
 0xd99   : > { %v4031_v7 = vmul.f32 0.0078125, %v4020_v8 }
 0xd9a   : > { %4090 = vst [vmem:[#allocation2 + $0x18] sm:$0xff] %v4082_v32  ;;  %v4022_v55 = vpop.xlane.xlu1 %4021 }
 0xd9b   : > { %v4039_v41 = vadd.f32 1e-12, %v4031_v7  ;;  %v4032_v28 = vmul.f32 0.0078125, %v4022_v55 }
 0xd9d   : > { %5715 = vrsqrt.f32 %v4039_v41  ;;  %v4040_v58 = vadd.f32 1e-12, %v4032_v28 }
 0xd9f   : > { %5717 = vrsqrt.f32 %v4040_v58  ;;  %v4100_v26 = vld [vmem:[#allocation2 + $0x10] sm:$0x1] (!%p4887_p7) }
 0xda0   : > { %v4024_v38 = vpop.xlane.xlu0 %4023  ;;  %v4104_v14 = vrot.slane (!%p4887_p7), %v4100_v26, 7 }
 0xda1   : > { %v4033_v29 = vmul.f32 0.0078125, %v4024_v38 }
 0xda2   : > { %v4026_v63 = vpop.xlane.xlu1 %4025 }
 0xda3   : > { %v4041_v24 = vadd.f32 1e-12, %v4033_v29  ;;  %v4034_v5 = vmul.f32 0.0078125, %v4026_v63  ;;  %v8252_v63 = vld [vmem:[#allocation37_spill] sm:$0xff] (!%p4887_p7) }
 0xda4   : > { %vm4233_vm6 = vcmp.eq.s32.totalorder (!%p4887_p7), %v8252_v63, 0  ;;  %vm4239_vm7 = vcmp.eq.s32.totalorder (!%p4887_p7), %v8252_v63, 1  ;;  %vm4245_vm8 = vcmp.eq.s32.totalorder (!%p4887_p7), %v8252_v63, 2  ;;  %vm4370_vm9 = vcmp.ne.s32.totalorder (!%p4887_p7), %v8252_v63, %v8251_v17 }
 0xda5   : > { %5719 = vrsqrt.f32 %v4041_v24  ;;  %v4042_v23 = vadd.f32 1e-12, %v4034_v5  ;;  %v4234_v24 = vstv (!%p4887_p7), %s7936_s0  ;;  %vm4251_vm10 = vcmp.eq.s32.totalorder (!%p4887_p7), %v8252_v63, 3 }
 0xda7   : > { %v5716_v60 = vpop.eup %5715  ;;  %5721 = vrsqrt.f32 %v4042_v23  ;;  %v4235_v23 = vsel (!%p4887_p7), %vm4233_vm6, %v4234_v24, 0 }
 0xda8   : > { %v4055_v36 = vmul.f32 %v5716_v60, %v7861_v48  ;;  %v4240_v60 = vstv (!%p4887_p7), %s7938_s3 }
 0xda9   : > { %v5718_v22 = vpop.eup %5717 }
 0xdaa   : > { %v4069_v50 = vmul.f32 %v4885_v21, %v4055_v36  ;;  %v4056_v18 = vmul.f32 %v5718_v22, %v7863_v4  ;;  %v4099_v4 = vld [vmem:[#allocation2] sm:$0x1] (!%p4887_p7)  ;;  %v4241_v36 = vsel (!%p4887_p7), %vm4239_vm7, %v4240_v60, %v4235_v23  ;;  %v4246_v22 = vstv (!%p4887_p7), %s7940_s9 }
 0xdab   : > { %v4113_v49 = vsel (!%p4887_p7), %vm4112_vm15, %v4099_v4, %v4104_v14  ;;  %v4237_v4 = vsel (!%p4887_p7), %vm4236_vm12, %v4234_v24, 0  ;;  %vm4254_vm15 = vcmp.eq.s32.totalorder (!%p4887_p7), %v8251_v17, 3 }
 0xdac   : > { %v4083_v31 = vadd.f32 %v4886_v10, %v4069_v50  ;;  %v4070_v12 = vmul.f32 %v4885_v21, %v4056_v18  ;;  %v4247_v50 = vsel (!%p4887_p7), %vm4245_vm8, %v4246_v22, %v4241_v36  ;;  %v4252_v18 = vstv (!%p4887_p7), %s7944_s19 }
 0xdad   : > { %v4243_v26 = vsel (!%p4887_p7), %vm4242_vm13, %v4240_v60, %v4237_v4 }
 0xdae   : > { %4091 = vst [vmem:[#allocation2 + $0x20] sm:$0xff] %v4083_v31  ;;  %v4084_v16 = vadd.f32 %v4886_v10, %v4070_v12  ;;  %v4253_v12 = vsel (!%p4887_p7), %vm4251_vm10, %v4252_v18, %v4247_v50 }
 0xdaf   : > { %v5720_v56 = vpop.eup %5719  ;;  %vm4271_vm11 = vcmp.eq.s32.totalorder (!%p4887_p7), %v8251_v17, %v4253_v12 }
 0xdb0   : > { %4092 = vst [vmem:[#allocation2 + $0x28] sm:$0xff] %v4084_v16  ;;  %v4057_v57 = vmul.f32 %v5720_v56, %v7869_v62 }
 0xdb1   : > { %v5722_v33 = vpop.eup %5721 }
 0xdb2   : > { %v4071_v34 = vmul.f32 %v4885_v21, %v4057_v57  ;;  %v4058_v2 = vmul.f32 %v5722_v33, %v7871_v6  ;;  %4098 = sbr.rel (%p4887_p7) target bundleno = 4390 (0x1126), region = 152  ;;  %v6199_v6 = vmov (!%p4887_p7), 0.0  }
 0xdb3   : > { %5225 = vmatprep.subr.bf16.mxu0 (!%p4887_p7), %v6199_v6  ;;  %5245 = vmatprep.subr.mxu1 (!%p4887_p7), %v6199_v6  ;;  %v4901_v31 = vsel (!%p4887_p7), %vm4370_vm9, 1.0, %v6199_v6 }
 0xdb4   : > { %v4085_v20 = vadd.f32 %v4886_v10, %v4071_v34  ;;  %v4072_v61 = vmul.f32 %v4885_v21, %v4058_v2  ;;  %5226 = vmatpush3.bf16.msra.mxu0 (!%p4887_p7), %v5731_v53  ;;  %v5736_v21 = vld [vmem:[%s8249_s5 + $0x28] sm:$0xff] (!%p4887_p7)   ;;  %5247 = vmatprep.mubr.msk.f32.mxu1 (!%p4887_p7), %vm6200_vm3, %v6199_v6  ;;  %v4900_v2 = vsel (!%p4887_p7), %vm4271_vm11, 1.0, %v6199_v6 }
 0xdb5   : > { %v4101_v3 = vld [vmem:[#allocation2 + $0x20] sm:$0x1] (!%p4887_p7)  ;;  %5227 = vmatprep.subr.bf16.mxu0 (!%p4887_p7), %v6199_v6  ;;  %5241 = vmatprep.mubr.msk.bf16.mxu0 (!%p4887_p7), %vm6200_vm3, %v6199_v6 }
 0xdb6   : > { %4093 = vst [vmem:[#allocation2 + $0x30] sm:$0xff] %v4085_v20  ;;  %v4086_v48 = vadd.f32 %v4886_v10, %v4072_v61  ;;  %v4107_v25 = vrot.slane (!%p4887_p7), %v4101_v3, 6  ;;  %v4249_v3 = vsel (!%p4887_p7), %vm4248_vm14, %v4246_v22, %v4243_v26 }
 0xdb8   : > { %4094 = vst [vmem:[#allocation2 + $0x38] sm:$0xff] %v4086_v48  ;;  %v4115_v13 = vsel (!%p4887_p7), %vm4114_vm0, %v4113_v49, %v4107_v25  ;;  %5228 = vmatpush3.bf16.msra.mxu0 (!%p4887_p7), %v5732_v47 }
 0xdb9   : > { %5229 = vmatprep.subr.bf16.mxu0 %v6199_v6 }
 0xdbc   : > { %5230 = vmatpush3.bf16.msra.mxu0 %v5733_v43 }
 0xdbd   : > { %v4102_v42 = vld [vmem:[#allocation2 + $0x30] sm:$0x1]  ;;  %5231 = vmatprep.subr.bf16.mxu0 %v6199_v6 }
 0xdbe   : > { %v4110_v62 = vrot.slane %v4102_v42, 5  ;;  %v4255_v42 = vsel %vm4254_vm15, %v4252_v18, %v4249_v3 }
 0xdbf   : > { %vm4373_vm0 = vcmp.eq.s32.totalorder %v4253_v12, %v4255_v42 }
 0xdc0   : > { %v4117_v54 = vsel %vm4116_vm1, %v4115_v13, %v4110_v62  ;;  %5232 = vmatpush3.bf16.msra.mxu0 %v5734_v11  ;;  %v4902_v14 = vsel %vm4373_vm0, 1.0, %v6199_v6  ;;  %vm4412_vm1 = vcmask 1044480  }
 0xdc1   : > { %v4287_v1 = vmul.f32 %v4117_v54, %v4117_v54  ;;  %5233 = vmatprep.subr.bf16.mxu0 %v6199_v6  ;;  %v4118_v46 = vpack.c.bf16 %v4117_v54, %v4117_v54  ;;  %v4376_v25 = vmul.f32 %v4902_v14, %v4901_v31 }
 0xdc3   : > { %v4288_v15 = vsel %vm4258_vm2, %v4287_v1, 0.0  ;;  %v4386_v62 = vsel %vm4365_vm5, %v4376_v25, 0.0 }
 0xdc4   : > { %4289 = vadd.xlane.f32.xlu0 %v4288_v15  ;;  %5234 = vmatpush3.bf16.msra.mxu0 %v5735_v59 }
 0xdc5   : > { %5235 = vmatprep.subr.bf16.mxu0 %v6199_v6 }
 0xdc8   : > { %5236 = vmatpush3.bf16.msra.mxu0 %v5736_v21 }
 0xdc9   : > { %5237 = vmatprep.subr.bf16.mxu0 %v6199_v6 }
 0xdcc   : > { %5238 = vmatpush3.bf16.msra.mxu0 %v5737_v35 }
 0xdcd   : > { %5239 = vmatprep.subr.bf16.mxu0 %v6199_v6 }
 0xdd0   : > { %5240 = vmatpush3.bf16.msra.mxu0 %v5738_v19 }
 0xdd3   : > { %5242 = vmatmul.mubr.bf16.vlgmr.msra.gmra.mrb[0].mxu0 %v4118_v46 }
 0xe51   : > { %v4290_v10 = vpop.xlane.xlu0 %4289 }
 0xe52   : > { %v4291_v44 = vadd.f32 1e-12, %v4290_v10 }
 0xe54   : > { %5739 = vrsqrt.f32 %v4291_v44 }
 0xe5e   : > { %v5740_v37 = vpop.eup %5739 }
 0xe5f   : > { %v4293_v27 = vmul.f32 %v5740_v37, %v4117_v54 }
 0xe61   : > { %5246 = vmatpush3.xpose.msra.mxu1 %v4293_v27 }
 0xe64   : > { %5248 = vmatmul.mubr.f32.vlgmr.msra.gmra.mrb[0].mxu1 %v4293_v27 }
 0xea6   : > { %v4224_v39 = vpop.f32.mrb[0].mxu0 }
 0xea7   : > { %v7929_v45 = vadd.f32 %v4888_v30, %v4224_v39  ;;  %v5243_v52 = vpop.f32.mrb[1].mxu0 }
 0xea8   : > { %v4227_v51 = vpop.f32.mrb[2].mxu0 }
 0xea9   : > { %v4257_v40 = vsel %vm4256_vm4, %v7929_v45, -1e+09  ;;  %v5244_v0 = vpop.f32.mrb[3].mxu0 }
 0xeaa   : > { %v4259_v9 = vsel %vm4258_vm2, %v4257_v40, -inf }
 0xeab   : > { %4260 = vmax.xlane.f32.xlu1 %v4259_v9 }
 0xf37   : > { %v4360_v32 = vpop.f32.mrb[0].mxu1 }
 0xf38   : > { %v4364_v8 = vmul.f32 3.3333333, %v4360_v32  ;;  %v5249_v7 = vpop.f32.mrb[1].mxu1  ;;  %v4261_v41 = vpop.xlane.xlu1 %4260 }
 0xf39   : > { %v4262_v28 = vsub.f32 %v4257_v40, %v4261_v41 }
 0xf3a   : > { %v4366_v55 = vsel %vm4365_vm5, %v4364_v8, -inf }
 0xf3b   : > { %4367 = vmax.xlane.f32.xlu0 %v4366_v55  ;;  %v4263_v38 = vmul.f32 1.442695, %v4262_v28  ;;  %v4274_v61 = vmul.f32 %v4900_v2, %v4262_v28 }
 0xf3d   : > { %5741 = vpow2.f32 %v4263_v38  ;;  %v4275_v48 = vsel %vm4258_vm2, %v4274_v61, 0.0 }
 0xf3f   : > { %4387 = vadd.xlane.f32.xlu0 %v4386_v62 }
 0xf47   : > { %v5742_v16 = vpop.eup %5741 }
 0xf48   : > { %v4265_v33 = vsel %vm4256_vm4, %v5742_v16, 0.0 }
 0xf49   : > { %v4266_v20 = vsel %vm4258_vm2, %v4265_v33, 0.0 }
 0xfc8   : > { %v4368_v58 = vpop.xlane.xlu0 %4367 }
 0xfc9   : > { %v4369_v29 = vsub.f32 %v4364_v8, %v4368_v58 }
 0xfcb   : > { %v4377_v5 = vmul.f32 1.442695, %v4369_v29 }
 0xfcc   : > { %v4388_v59 = vpop.xlane.xlu0 %4387 }
 0xfcd   : > { %5743 = vpow2.f32 %v4377_v5  ;;  %v4389_v6 = vmax.f32 %v4388_v59, 1.0 }
 0xfd7   : > { %v5744_v56 = vpop.eup %5743 }
 0xfd8   : > { %v4379_v57 = vmul.f32 %v5744_v56, %v4901_v31 }
 0xfda   : > { %v4380_v34 = vsel %vm4365_vm5, %v4379_v57, 0.0 }
 0xfdb   : > { %4381 = vadd.xlane.f32.xlu1 %v4380_v34 }
 0xfdf   : > { %4267 = vadd.xlane.f32.xlu1 %v4266_v20 }
 0xfe3   : > { %4276 = vadd.xlane.f32.xlu1 %v4275_v48 }
0x1068   : > { %v4382_v49 = vpop.xlane.xlu1 %4381 }
0x1069   : > { %5745 = vlog2.f32 %v4382_v49 }
0x106c   : > { %v4268_v15 = vpop.xlane.xlu1 %4267 }
0x106d   : > { %5747 = vlog2.f32 %v4268_v15 }
0x106e   : > { %5749 = vrcp.f32 %v4389_v6 }
0x1070   : > { %v4277_v21 = vpop.xlane.xlu1 %4276 }
0x1073   : > { %v5746_v53 = vpop.eup %5745 }
0x1074   : > { %v4384_v13 = vmul.f32 0.6931472, %v5746_v53 }
0x1076   : > { %v4385_v54 = vsub.f32 %v4369_v29, %v4384_v13 }
0x1077   : > { %v5748_v43 = vpop.eup %5747 }
0x1078   : > { %v4390_v47 = vmul.f32 %v4385_v54, %v4376_v25  ;;  %v4270_v11 = vmul.f32 0.6931472, %v5748_v43  ;;  %v5750_v44 = vpop.eup %5749 }
0x107a   : > { %v4391_v1 = vsel %vm4365_vm5, %v4390_v47, 0.0  ;;  %v4278_v35 = vsub.f32 %v4270_v11, %v4277_v21 }
0x107b   : > { %4392 = vadd.xlane.f32.xlu0 %v4391_v1 }
0x107c   : > { %v4279_v19 = vsel %vm4258_vm2, %v4278_v35, 0.0 }
0x107d   : > { %v4280_v46 = vrot.slane %v4279_v19, 4 }
0x107f   : > { %v4281_v10 = vadd.f32 %v4280_v46, %v4279_v19 }
0x1081   : > { %v4282_v37 = vrot.slane %v4281_v10, 2 }
0x1083   : > { %v4283_v52 = vadd.f32 %v4282_v37, %v4281_v10 }
0x1085   : > { %v4284_v0 = vrot.slane %v4283_v52, 1 }
0x1087   : > { %v4285_v8 = vadd.f32 %v4284_v0, %v4283_v52 }
0x1089   : > { %v4286_v41 = vmul.f32 0.25, %v4285_v8 }
0x108b   : > { %v4405_v38 = vmul.f32 0.1, %v4286_v41 }
0x1108   : > { %v4393_v27 = vpop.xlane.xlu0 %4392 }
0x1109   : > { %v4395_v30 = vmul.f32 %v5750_v44, %v4393_v27 }
0x110b   : > { %v4396_v39 = vsel %vm4258_vm2, %v4395_v30, 0.0 }
0x110c   : > { %v4397_v51 = vrot.slane %v4396_v39, 4 }
0x110e   : > { %v4398_v40 = vadd.f32 %v4397_v51, %v4396_v39 }
0x1110   : > { %v4399_v9 = vrot.slane %v4398_v40, 2 }
0x1112   : > { %v4400_v32 = vadd.f32 %v4399_v9, %v4398_v40 }
0x1114   : > { %v4401_v7 = vrot.slane %v4400_v32, 1 }
0x1116   : > { %v4402_v55 = vadd.f32 %v4401_v7, %v4400_v32 }
0x1118   : > { %v4403_v28 = vsub.f32 0.0, %v4402_v55 }
0x111a   : > { %v4404_v58 = vmul.f32 0.25, %v4403_v28 }
0x111c   : > { %v4406_v29 = vmul.f32 0.9, %v4404_v58 }
0x111e   : > { %v4407_v63 = vadd.f32 %v4406_v29, %v4405_v38 }
0x1120   : > { %v4408_v24 = vsel %vm4236_vm12, %v4407_v63, 0.0 }
0x1121   : > { %v4409_v5 = vsel %vm4242_vm13, %v4286_v41, %v4408_v24 }
0x1122   : > { %v4410_v23 = vsel %vm4248_vm14, %v4404_v58, %v4409_v5 }
0x1123   : > { %v4411_v60 = vsel %vm4258_vm2, %v7929_v45, %v4410_v23 }
0x1124   : > { %v4413_v36 = vsel %vm4412_vm1, %v4411_v60, 0.0 }
0x1125   : > { %4414 = vst [vmem:[#allocation23] sm:$0xff] %v4413_v36 }
0x1126 PF: > { %p5368_p6 = scmp.eq.s32.totalorder %s6334_s4, 1  ;;  %s6201_s8 = smov [#allocation23]  }
0x1127   : > { %s4422_s7 = sshll.u32 %s6201_s8, 4  ;;  %s4423_s7 = int_to_ptr.vmem [resolvable:$true] %s4422_s7 }
0x1128   : > { %s6087_s26 = scalar_lea.vmem %s4423_s7, 128  ;;  %p6094_p11 = scmp.lt.s32.totalorder %s4423_s7, %s4423_s7 }
0x1129   : > { %p6088_p10 = scmp.ne.s32.totalorder %s4423_s7, %s6087_s26  ;;  %p6095_p0 = scmp.lt.s32.totalorder %s6087_s26, %s6087_s26 }
0x112b   : > { %p6089_p8 = pnand %p6088_p10, %p5368_p6  ;;  %p6096_p4 = por %p6095_p0, %p6094_p11 }
0x112d   : > { %p6090_p1 = pneg %p6089_p8 }
0x112f   : > { %p6097_p9 = pnand %p6096_p4, %p6090_p1 }
0x1131   : > { %6100 = shalt.err (!%p6097_p9)
}
0x1132   : > { %s8253_s18 = sld [smem:[#allocation88_spill]] }
0x1138   : > { %s6101_s30 = scalar_lea.hbm %s8253_s18, 128 }
0x1139   : > { %p6102_p13 = scmp.ne.s32.totalorder %s8253_s18, %s6101_s30  ;;  %p6107_p5 = scmp.lt.u32.totalorder %s6101_s30, %s8253_s18 }
0x113b   : > { %p6103_p3 = pnand %p6102_p13, %p5368_p6 }
0x113d   : > { %p6104_p2 = pneg %p6103_p3 }
0x113f   : > { %p6109_p12 = pnand %p6107_p5, %p6104_p2 }
0x1141   : > { %6112 = shalt.err (!%p6109_p12)
}
0x1142   : > { %5323 = dma.vmem_to_hbm [thread:$0]  (%p5368_p6), %s4423_s7, 128, %s8253_s18, [#allocation7]  }
0x1143   : > { %6156 = dma.done.wait (%p5368_p6), [#allocation7], 128  }
0x1144   : > { %6158 = vsyncadd (%p5368_p6), [#allocation7], 4294967168 }
0x1145 PF: > { %s8254_s14 = sld [smem:[#allocation34_spill]]  ;;  %s8255_s28 = sld [smem:[#allocation32_spill]] }
0x1146   : > { %s8256_s29 = sld [smem:[#allocation33_spill]]  ;;  %s8257_s0 = sld [smem:[#allocation35_spill]] }
0x114b   : > { %p49_p7 = scmp.ge.s32.totalorder %s8254_s14, 4  }
0x114d   :  { %51 = sbr.rel (!%p49_p7) target bundleno = 42 (0x2a), region = 253 }
0x1154   :  { %4435 = vsyncpa [#allocation6], 1 }
0x1155   :  { %4437 = vsyncpa [#allocation6 + $0x1], 1 }
0x1156   :  { %4438 = vsyncpa [#allocation9], 1 }
0x1157   :  { %4439 = vsyncpa [#allocation12], 1 }
0x1158   :  { %4441 = vsyncpa [#allocation12 + $0x1], 1 }
0x1159   :  { %4442 = vsyncpa [#allocation15], 1 }
0x115a   :  { %4444 = vsyncpa [#allocation15 + $0x1], 1 }
0x115b   :  { %4445 = vsyncpa [#allocation18], 1 }
0x115c   :  { %4447 = vsyncpa [#allocation18 + $0x1], 1 }
0x115d   :  { %4448 = vsyncpa [#allocation21], 1 }
0x115e   :  { %4450 = vsyncpa [#allocation21 + $0x1], 1 }
0x115f   :  { %4451 = vsyncpa [#allocation7], 1 }
0x1160   :  { %4453 = vsyncpa [#allocation7 + $0x1], 1 }

</bundles_post_ra>
